<compile_context>
chip_gen: v7x
topology: tpu7x:2x2x1
jax: 0.10.0
libtpu: 0.0.40
codegen_flags: <defaults>
</compile_context>

<pallas_src>
import functools

import numpy as np

import jax
import jax.numpy as jnp
from jax import lax
from jax.experimental import pallas as pl
from jax.experimental.pallas import tpu as pltpu

BN_EPS = 1e-5

# DARTS_V2 normal cell genotype ------------------------------------------------
GENOTYPE_NORMAL = [
    ('sep_conv_3x3', 0), ('sep_conv_3x3', 1),
    ('sep_conv_3x3', 0), ('sep_conv_3x3', 1),
    ('sep_conv_3x3', 1), ('skip_connect', 0),
    ('skip_connect', 0), ('dil_conv_3x3', 2),
]
NORMAL_CONCAT = [2, 3, 4, 5]

_SHIFT_DYS = (-2, -1, 1, 2)   # vertical tap offsets needed for dilation 1 and 2


# ----------------------------------------------------------------------------
# Fused whole-cell Pallas kernel (one grid step = one batch sample)
# ----------------------------------------------------------------------------
def _cell_kernel(s0_ref, s1_ref, smat_ref, p0w_ref, p0b_ref, p1w_ref, p1b_ref,
                 uw_ref, ub_ref, o_ref, *, op_meta, indices, concat):
    shift_slot = {dy: i for i, dy in enumerate(_SHIFT_DYS)}

    def vshift(x, dy):
        # out[h, :] = x[h + dy, :], zero-filled at the image boundary.
        # Implemented as a tiny (H, H) matmul on the otherwise-idle MXU.
        if dy == 0:
            return x
        return jnp.dot(smat_ref[shift_slot[dy]], x,
                       preferred_element_type=jnp.float32)

    def conv_unit(x, u, d):
        # ReLU -> depthwise3x3 (dilation d) -> 1x1 conv -> folded BN.
        # Horizontal taps + channel mixing + BN scale are folded host-side
        # into three banded (W*C, W*C) matrices, one per vertical tap.
        xr = jnp.maximum(x, 0.0)
        acc = jnp.dot(vshift(xr, -d), uw_ref[u, 0],
                      preferred_element_type=jnp.float32)
        acc = acc + jnp.dot(xr, uw_ref[u, 1],
                            preferred_element_type=jnp.float32)
        acc = acc + jnp.dot(vshift(xr, d), uw_ref[u, 2],
                            preferred_element_type=jnp.float32)
        return acc + ub_ref[u]

    # preprocess0 / preprocess1 = ReLUConvBN(1x1): ReLU -> block-diag matmul
    # (BN scale folded into the weights) -> add shift.
    s0 = jnp.dot(jnp.maximum(s0_ref[0], 0.0), p0w_ref[...],
                 preferred_element_type=jnp.float32) + p0b_ref[...]
    s1 = jnp.dot(jnp.maximum(s1_ref[0], 0.0), p1w_ref[...],
                 preferred_element_type=jnp.float32) + p1b_ref[...]

    states = [s0, s1]
    for i in range(len(op_meta) // 2):
        acc = None
        for k in (2 * i, 2 * i + 1):
            h = states[indices[k]]
            meta = op_meta[k]
            if meta[0] == 'skip':
                y = h
            elif meta[0] == 'sep':
                y = conv_unit(conv_unit(h, meta[1], 1), meta[2], 1)
            else:  # 'dil'
                y = conv_unit(h, meta[1], 2)
            acc = y if acc is None else acc + y
        states.append(acc)

    for b, si in enumerate(concat):
        o_ref[0, b] = states[si]


def cell_forward_pallas(s0_nchw, s1_nchw, packed, op_meta):
    """Whole-cell forward as a single fused Pallas kernel, grid over batch."""
    N, Cpp, H, W = s0_nchw.shape
    Cp = s1_nchw.shape[1]
    WC = packed['p0w'].shape[1]
    C = WC // W
    nb = len(NORMAL_CONCAT)
    n_units = packed['uw'].shape[0]

    # NCHW -> lane-dense (N, H, W*C): channels minor within the lane axis.
    # (W*C = 128 at the test shapes -> full-lane vregs and unmasked stores.)
    s0 = jnp.transpose(s0_nchw, (0, 2, 3, 1)).reshape(N, H, W * Cpp)
    s1 = jnp.transpose(s1_nchw, (0, 2, 3, 1)).reshape(N, H, W * Cp)

    # Vertical-shift matrices: (S_dy @ x)[h] = x[h + dy], zero at boundaries.
    smat = jnp.asarray(
        np.stack([np.eye(H, k=dy, dtype=np.float32) for dy in _SHIFT_DYS]))

    kernel = functools.partial(
        _cell_kernel, op_meta=op_meta,
        indices=[i for _, i in GENOTYPE_NORMAL], concat=NORMAL_CONCAT)

    out = pl.pallas_call(
        kernel,
        grid=(N,),
        in_specs=[
            pl.BlockSpec((1, H, W * Cpp), lambda n: (n, 0, 0)),
            pl.BlockSpec((1, H, W * Cp), lambda n: (n, 0, 0)),
            pl.BlockSpec((len(_SHIFT_DYS), H, H), lambda n: (0, 0, 0)),
            pl.BlockSpec((W * Cpp, WC), lambda n: (0, 0)),
            pl.BlockSpec((1, WC), lambda n: (0, 0)),
            pl.BlockSpec((W * Cp, WC), lambda n: (0, 0)),
            pl.BlockSpec((1, WC), lambda n: (0, 0)),
            pl.BlockSpec((n_units, 3, WC, WC), lambda n: (0, 0, 0, 0)),
            pl.BlockSpec((n_units, 1, WC), lambda n: (0, 0, 0)),
        ],
        out_specs=pl.BlockSpec((1, nb, H, WC), lambda n: (n, 0, 0, 0)),
        out_shape=jax.ShapeDtypeStruct((N, nb, H, WC), jnp.float32),
        compiler_params=pltpu.CompilerParams(
            dimension_semantics=("parallel",)),
    )(s0, s1, smat, packed['p0w'], packed['p0b'], packed['p1w'],
      packed['p1b'], packed['uw'], packed['ub'])

    # (N, 4, H, W*C) -> NCHW (N, 4*C, H, W); channel = branch*C + c, matching
    # torch.cat([states[2..5]], dim=1).
    out = out.reshape(N, nb, H, W, C)
    return jnp.transpose(out, (0, 1, 4, 2, 3)).reshape(N, nb * C, H, W)


# ----------------------------------------------------------------------------
# Host-side weight folding / packing (lane-dense, BN folded into weights)
# ----------------------------------------------------------------------------
def pack_cell_params(params, W):
    C = params['pre0']['w'].shape[1]
    eyeW = np.eye(W, dtype=np.float32)

    def fold_1x1(p):
        wf = p['w'] * p['s'][None, :]                 # fold BN scale
        big = jnp.kron(jnp.asarray(eyeW), wf)         # (W*Cin, W*C) block-diag
        return big, jnp.tile(p['b'], W).reshape(1, W * C)

    def fold_unit(dw_w, pw_w, scale, shift, d):
        # relu -> dw3x3(dilation d) -> pw1x1 -> BN is linear after the relu:
        #   out = sum_ky  vshift(relu(x), (ky-1)*d) @ band_mat[ky]  + shift
        # band_mat[ky][wi*C+ci, wj*C+co] = dw[ky,kx,ci] * pw[ci,co] * scale[co]
        #   where wi = wj + (kx-1)*d  (zero outside the image -> exact padding)
        pwf = pw_w * scale[None, :]                    # (C, C)
        mats = []
        for ky in range(3):
            m = jnp.zeros((W * C, W * C), jnp.float32)
            for kx in range(3):
                off = (kx - 1) * d
                sel = jnp.asarray(np.eye(W, k=-off, dtype=np.float32))
                m = m + jnp.kron(sel, dw_w[ky, kx][:, None] * pwf)
            mats.append(m)
        return jnp.stack(mats), jnp.tile(shift, W).reshape(1, W * C)

    p0w, p0b = fold_1x1(params['pre0'])
    p1w, p1b = fold_1x1(params['pre1'])

    uw, ub, op_meta = [], [], []
    for (name, _), p in zip(GENOTYPE_NORMAL, params['ops']):
        if name == 'skip_connect':
            op_meta.append(('skip',))
        elif name == 'sep_conv_3x3':
            m1, b1 = fold_unit(p['dw1'], p['pw1'], p['s1'], p['b1'], 1)
            m2, b2 = fold_unit(p['dw2'], p['pw2'], p['s2'], p['b2'], 1)
            uw += [m1, m2]
            ub += [b1, b2]
            op_meta.append(('sep', len(uw) - 2, len(uw) - 1))
        elif name == 'dil_conv_3x3':
            m, b = fold_unit(p['dw'], p['pw'], p['s'], p['b'], 2)
            uw.append(m)
            ub.append(b)
            op_meta.append(('dil', len(uw) - 1))
        else:
            raise ValueError(name)

    packed = dict(p0w=p0w, p0b=p0b, p1w=p1w, p1b=p1b,
                  uw=jnp.stack(uw), ub=jnp.stack(ub))
    return packed, op_meta


# ----------------------------------------------------------------------------
# Pure-JAX reference (unfolded weights) for correctness check
# ----------------------------------------------------------------------------
def ref_pointwise_conv_bn(x, w, scale, shift, *, relu_input):
    xx = jnp.maximum(x, 0.0) if relu_input else x
    y = jnp.einsum('nhwc,cd->nhwd', xx, w)
    return y * scale + shift


def ref_relu_depthwise3x3(x, w, *, dilation):
    xx = jnp.maximum(x, 0.0)
    C = x.shape[-1]
    return lax.conv_general_dilated(
        xx, w.reshape(3, 3, 1, C), window_strides=(1, 1),
        padding=[(dilation, dilation)] * 2, rhs_dilation=(dilation, dilation),
        dimension_numbers=('NHWC', 'HWIO', 'NHWC'), feature_group_count=C)


def cell_forward_ref(s0_nchw, s1_nchw, params):
    s0 = jnp.transpose(s0_nchw, (0, 2, 3, 1))
    s1 = jnp.transpose(s1_nchw, (0, 2, 3, 1))
    s0 = ref_pointwise_conv_bn(s0, params['pre0']['w'], params['pre0']['s'],
                               params['pre0']['b'], relu_input=True)
    s1 = ref_pointwise_conv_bn(s1, params['pre1']['w'], params['pre1']['s'],
                               params['pre1']['b'], relu_input=True)
    states = [s0, s1]
    for i in range(len(GENOTYPE_NORMAL) // 2):
        outs = []
        for k in (2 * i, 2 * i + 1):
            name, idx = GENOTYPE_NORMAL[k]
            h = states[idx]
            p = params['ops'][k]
            if name == 'skip_connect':
                outs.append(h)
            elif name == 'sep_conv_3x3':
                y = ref_relu_depthwise3x3(h, p['dw1'], dilation=1)
                y = ref_pointwise_conv_bn(y, p['pw1'], p['s1'], p['b1'],
                                          relu_input=False)
                y = ref_relu_depthwise3x3(y, p['dw2'], dilation=1)
                y = ref_pointwise_conv_bn(y, p['pw2'], p['s2'], p['b2'],
                                          relu_input=False)
                outs.append(y)
            else:  # dil_conv_3x3
                y = ref_relu_depthwise3x3(h, p['dw'], dilation=2)
                y = ref_pointwise_conv_bn(y, p['pw'], p['s'], p['b'],
                                          relu_input=False)
                outs.append(y)
        states.append(outs[0] + outs[1])
    out = jnp.concatenate([states[i] for i in NORMAL_CONCAT], axis=-1)
    return jnp.transpose(out, (0, 3, 1, 2))


# ----------------------------------------------------------------------------
# Deterministic parameter init (eval-mode BN folded into scale/shift)
# ----------------------------------------------------------------------------
def fold_bn(key, C):
    k1, k2, k3, k4 = jax.random.split(key, 4)
    gamma = 1.0 + 0.1 * jax.random.normal(k1, (C,), jnp.float32)
    beta = 0.1 * jax.random.normal(k2, (C,), jnp.float32)
    mean = 0.1 * jax.random.normal(k3, (C,), jnp.float32)
    var = 1.0 + 0.1 * jax.random.uniform(k4, (C,), jnp.float32)
    scale = gamma / jnp.sqrt(var + BN_EPS)
    shift = beta - mean * scale
    return scale, shift


def init_relu_conv_bn(key, Cin, Cout):
    kw, kb = jax.random.split(key)
    w = jax.random.normal(kw, (Cin, Cout), jnp.float32) / jnp.sqrt(Cin)
    s, b = fold_bn(kb, Cout)
    return {'w': w, 's': s, 'b': b}


def init_sep(key, C):
    k = jax.random.split(key, 6)
    s1, b1 = fold_bn(k[4], C)
    s2, b2 = fold_bn(k[5], C)
    return {
        'dw1': jax.random.normal(k[0], (3, 3, C), jnp.float32) / 3.0,
        'pw1': jax.random.normal(k[1], (C, C), jnp.float32) / jnp.sqrt(C),
        's1': s1, 'b1': b1,
        'dw2': jax.random.normal(k[2], (3, 3, C), jnp.float32) / 3.0,
        'pw2': jax.random.normal(k[3], (C, C), jnp.float32) / jnp.sqrt(C),
        's2': s2, 'b2': b2,
    }


def init_dil(key, C):
    k = jax.random.split(key, 3)
    s, b = fold_bn(k[2], C)
    return {
        'dw': jax.random.normal(k[0], (3, 3, C), jnp.float32) / 3.0,
        'pw': jax.random.normal(k[1], (C, C), jnp.float32) / jnp.sqrt(C),
        's': s, 'b': b,
    }


def init_cell_params(key, C_prev_prev, C_prev, C):
    keys = jax.random.split(key, 2 + len(GENOTYPE_NORMAL))
    params = {
        'pre0': init_relu_conv_bn(keys[0], C_prev_prev, C),
        'pre1': init_relu_conv_bn(keys[1], C_prev, C),
        'ops': [],
    }
    for j, (name, _) in enumerate(GENOTYPE_NORMAL):
        k = keys[2 + j]
        if name == 'sep_conv_3x3':
            params['ops'].append(init_sep(k, C))
        elif name == 'dil_conv_3x3':
            params['ops'].append(init_dil(k, C))
        else:  # skip_connect
            params['ops'].append(None)
    return params


# ----------------------------------------------------------------------------
if __name__ == "__main__":
    key = jax.random.PRNGKey(0)
    N, C_prev_prev, C_prev, C, H, W = 2, 8, 8, 8, 16, 16   # W*C = 128 lanes
    k0, k1, kp = jax.random.split(key, 3)
    s0 = jax.random.normal(k0, (N, C_prev_prev, H, W), jnp.float32)  # NCHW
    s1 = jax.random.normal(k1, (N, C_prev, H, W), jnp.float32)       # NCHW
    params = init_cell_params(kp, C_prev_prev, C_prev, C)

    packed, op_meta = pack_cell_params(params, W)

    run = jax.jit(lambda a, b: cell_forward_pallas(a, b, packed, op_meta))
    out = jax.block_until_ready(run(s0, s1))

    ref = cell_forward_ref(s0, s1, params)

    assert out.shape == (N, len(NORMAL_CONCAT) * C, H, W), out.shape
    max_err = float(jnp.max(jnp.abs(out - ref)))
    assert jnp.allclose(out, ref, atol=1e-3, rtol=1e-3), max_err
    print("KERNEL_OK")
</pallas_src>

<mosaic_0001>
module attributes {stable_mosaic.version = 11 : i64} {
  func.func @_cell_kernel(%arg0: i32, %arg1: memref<1x16x128xf32, #tpu.memory_space<vmem>>, %arg2: memref<1x16x128xf32, #tpu.memory_space<vmem>>, %arg3: memref<4x16x16xf32, #tpu.memory_space<vmem>>, %arg4: memref<128x128xf32, #tpu.memory_space<vmem>>, %arg5: memref<1x128xf32, #tpu.memory_space<vmem>>, %arg6: memref<128x128xf32, #tpu.memory_space<vmem>>, %arg7: memref<1x128xf32, #tpu.memory_space<vmem>>, %arg8: memref<11x3x128x128xf32, #tpu.memory_space<vmem>>, %arg9: memref<11x1x128xf32, #tpu.memory_space<vmem>>, %arg10: memref<1x4x16x128xf32, #tpu.memory_space<vmem>>) attributes {dimension_semantics = [#tpu.dimension_semantics<parallel>], iteration_bounds = array<i64: 2>, scalar_prefetch = 0 : i64, scratch_operands = 0 : i64, tpu.core_type = #tpu.core_type<tc>, window_params = [{transform_indices = @transform_0, window_bounds = array<i64: 1, 16, 128>}, {transform_indices = @transform_1, window_bounds = array<i64: 1, 16, 128>}, {pipeline_mode = #tpu.pipeline_mode<synchronous>, transform_indices = @transform_2, window_bounds = array<i64: 4, 16, 16>}, {pipeline_mode = #tpu.pipeline_mode<synchronous>, transform_indices = @transform_3, window_bounds = array<i64: 128, 128>}, {pipeline_mode = #tpu.pipeline_mode<synchronous>, transform_indices = @transform_4, window_bounds = array<i64: 1, 128>}, {pipeline_mode = #tpu.pipeline_mode<synchronous>, transform_indices = @transform_5, window_bounds = array<i64: 128, 128>}, {pipeline_mode = #tpu.pipeline_mode<synchronous>, transform_indices = @transform_6, window_bounds = array<i64: 1, 128>}, {pipeline_mode = #tpu.pipeline_mode<synchronous>, transform_indices = @transform_7, window_bounds = array<i64: 11, 3, 128, 128>}, {pipeline_mode = #tpu.pipeline_mode<synchronous>, transform_indices = @transform_8, window_bounds = array<i64: 11, 1, 128>}, {transform_indices = @transform_9, window_bounds = array<i64: 1, 4, 16, 128>}]} {
    %c0 = arith.constant 0 : index
    %c0_0 = arith.constant 0 : index
    %c0_1 = arith.constant 0 : index
    %0 = vector.load %arg1[%c0, %c0_0, %c0_1] : memref<1x16x128xf32, #tpu.memory_space<vmem>>, vector<1x16x128xf32>
    %1 = vector.shape_cast %0 : vector<1x16x128xf32> to vector<16x128xf32>
    %cst = arith.constant 0.000000e+00 : f32
    %2 = vector.broadcast %cst : f32 to vector<16x128xf32>
    %3 = arith.maximumf %1, %2 : vector<16x128xf32>
    %c0_2 = arith.constant 0 : index
    %c0_3 = arith.constant 0 : index
    %4 = vector.load %arg4[%c0_2, %c0_3] : memref<128x128xf32, #tpu.memory_space<vmem>>, vector<128x128xf32>
    %cst_4 = arith.constant dense<0.000000e+00> : vector<16x128xf32>
    %5 = tpu.matmul %3, %4, %cst_4 {dimension_numbers = #tpu.dot_dimension_numbers<[1], [0], [0], [1], [0, 0, 1, 1], [], []>} : vector<16x128xf32>, vector<128x128xf32>, vector<16x128xf32> -> vector<16x128xf32>
    %c0_5 = arith.constant 0 : index
    %c0_6 = arith.constant 0 : index
    %6 = vector.load %arg5[%c0_5, %c0_6] : memref<1x128xf32, #tpu.memory_space<vmem>>, vector<1x128xf32>
    %7 = vector.broadcast %6 : vector<1x128xf32> to vector<16x128xf32>
    %8 = arith.addf %5, %7 : vector<16x128xf32>
    %c0_7 = arith.constant 0 : index
    %c0_8 = arith.constant 0 : index
    %c0_9 = arith.constant 0 : index
    %9 = vector.load %arg2[%c0_7, %c0_8, %c0_9] : memref<1x16x128xf32, #tpu.memory_space<vmem>>, vector<1x16x128xf32>
    %10 = vector.shape_cast %9 : vector<1x16x128xf32> to vector<16x128xf32>
    %cst_10 = arith.constant 0.000000e+00 : f32
    %11 = vector.broadcast %cst_10 : f32 to vector<16x128xf32>
    %12 = arith.maximumf %10, %11 : vector<16x128xf32>
    %c0_11 = arith.constant 0 : index
    %c0_12 = arith.constant 0 : index
    %13 = vector.load %arg6[%c0_11, %c0_12] : memref<128x128xf32, #tpu.memory_space<vmem>>, vector<128x128xf32>
    %cst_13 = arith.constant dense<0.000000e+00> : vector<16x128xf32>
    %14 = tpu.matmul %12, %13, %cst_13 {dimension_numbers = #tpu.dot_dimension_numbers<[1], [0], [0], [1], [0, 0, 1, 1], [], []>} : vector<16x128xf32>, vector<128x128xf32>, vector<16x128xf32> -> vector<16x128xf32>
    %c0_14 = arith.constant 0 : index
    %c0_15 = arith.constant 0 : index
    %15 = vector.load %arg7[%c0_14, %c0_15] : memref<1x128xf32, #tpu.memory_space<vmem>>, vector<1x128xf32>
    %16 = vector.broadcast %15 : vector<1x128xf32> to vector<16x128xf32>
    %17 = arith.addf %14, %16 : vector<16x128xf32>
    %cst_16 = arith.constant 0.000000e+00 : f32
    %18 = vector.broadcast %cst_16 : f32 to vector<16x128xf32>
    %19 = arith.maximumf %8, %18 : vector<16x128xf32>
    %c1 = arith.constant 1 : index
    %c0_17 = arith.constant 0 : index
    %c0_18 = arith.constant 0 : index
    %20 = vector.load %arg3[%c1, %c0_17, %c0_18] : memref<4x16x16xf32, #tpu.memory_space<vmem>>, vector<1x16x16xf32>
    %21 = vector.shape_cast %20 : vector<1x16x16xf32> to vector<16x16xf32>
    %cst_19 = arith.constant dense<0.000000e+00> : vector<16x128xf32>
    %22 = tpu.matmul %21, %19, %cst_19 {dimension_numbers = #tpu.dot_dimension_numbers<[1], [0], [0], [1], [0, 0, 1, 1], [], []>} : vector<16x16xf32>, vector<16x128xf32>, vector<16x128xf32> -> vector<16x128xf32>
    %c0_20 = arith.constant 0 : index
    %c0_21 = arith.constant 0 : index
    %c0_22 = arith.constant 0 : index
    %c0_23 = arith.constant 0 : index
    %23 = vector.load %arg8[%c0_20, %c0_21, %c0_22, %c0_23] : memref<11x3x128x128xf32, #tpu.memory_space<vmem>>, vector<1x1x128x128xf32>
    %24 = vector.shape_cast %23 : vector<1x1x128x128xf32> to vector<128x128xf32>
    %cst_24 = arith.constant dense<0.000000e+00> : vector<16x128xf32>
    %25 = tpu.matmul %22, %24, %cst_24 {dimension_numbers = #tpu.dot_dimension_numbers<[1], [0], [0], [1], [0, 0, 1, 1], [], []>} : vector<16x128xf32>, vector<128x128xf32>, vector<16x128xf32> -> vector<16x128xf32>
    %c0_25 = arith.constant 0 : index
    %c1_26 = arith.constant 1 : index
    %c0_27 = arith.constant 0 : index
    %c0_28 = arith.constant 0 : index
    %26 = vector.load %arg8[%c0_25, %c1_26, %c0_27, %c0_28] : memref<11x3x128x128xf32, #tpu.memory_space<vmem>>, vector<1x1x128x128xf32>
    %27 = vector.shape_cast %26 : vector<1x1x128x128xf32> to vector<128x128xf32>
    %cst_29 = arith.constant dense<0.000000e+00> : vector<16x128xf32>
    %28 = tpu.matmul %19, %27, %cst_29 {dimension_numbers = #tpu.dot_dimension_numbers<[1], [0], [0], [1], [0, 0, 1, 1], [], []>} : vector<16x128xf32>, vector<128x128xf32>, vector<16x128xf32> -> vector<16x128xf32>
    %29 = arith.addf %25, %28 : vector<16x128xf32>
    %c2 = arith.constant 2 : index
    %c0_30 = arith.constant 0 : index
    %c0_31 = arith.constant 0 : index
    %30 = vector.load %arg3[%c2, %c0_30, %c0_31] : memref<4x16x16xf32, #tpu.memory_space<vmem>>, vector<1x16x16xf32>
    %31 = vector.shape_cast %30 : vector<1x16x16xf32> to vector<16x16xf32>
    %cst_32 = arith.constant dense<0.000000e+00> : vector<16x128xf32>
    %32 = tpu.matmul %31, %19, %cst_32 {dimension_numbers = #tpu.dot_dimension_numbers<[1], [0], [0], [1], [0, 0, 1, 1], [], []>} : vector<16x16xf32>, vector<16x128xf32>, vector<16x128xf32> -> vector<16x128xf32>
    %c0_33 = arith.constant 0 : index
    %c2_34 = arith.constant 2 : index
    %c0_35 = arith.constant 0 : index
    %c0_36 = arith.constant 0 : index
    %33 = vector.load %arg8[%c0_33, %c2_34, %c0_35, %c0_36] : memref<11x3x128x128xf32, #tpu.memory_space<vmem>>, vector<1x1x128x128xf32>
    %34 = vector.shape_cast %33 : vector<1x1x128x128xf32> to vector<128x128xf32>
    %cst_37 = arith.constant dense<0.000000e+00> : vector<16x128xf32>
    %35 = tpu.matmul %32, %34, %cst_37 {dimension_numbers = #tpu.dot_dimension_numbers<[1], [0], [0], [1], [0, 0, 1, 1], [], []>} : vector<16x128xf32>, vector<128x128xf32>, vector<16x128xf32> -> vector<16x128xf32>
    %36 = arith.addf %29, %35 : vector<16x128xf32>
    %c0_38 = arith.constant 0 : index
    %c0_39 = arith.constant 0 : index
    %c0_40 = arith.constant 0 : index
    %37 = vector.load %arg9[%c0_38, %c0_39, %c0_40] : memref<11x1x128xf32, #tpu.memory_space<vmem>>, vector<1x1x128xf32>
    %38 = vector.shape_cast %37 : vector<1x1x128xf32> to vector<1x128xf32>
    %39 = vector.broadcast %38 : vector<1x128xf32> to vector<16x128xf32>
    %40 = arith.addf %36, %39 : vector<16x128xf32>
    %cst_41 = arith.constant 0.000000e+00 : f32
    %41 = vector.broadcast %cst_41 : f32 to vector<16x128xf32>
    %42 = arith.maximumf %40, %41 : vector<16x128xf32>
    %c1_42 = arith.constant 1 : index
    %c0_43 = arith.constant 0 : index
    %c0_44 = arith.constant 0 : index
    %43 = vector.load %arg3[%c1_42, %c0_43, %c0_44] : memref<4x16x16xf32, #tpu.memory_space<vmem>>, vector<1x16x16xf32>
    %44 = vector.shape_cast %43 : vector<1x16x16xf32> to vector<16x16xf32>
    %cst_45 = arith.constant dense<0.000000e+00> : vector<16x128xf32>
    %45 = tpu.matmul %44, %42, %cst_45 {dimension_numbers = #tpu.dot_dimension_numbers<[1], [0], [0], [1], [0, 0, 1, 1], [], []>} : vector<16x16xf32>, vector<16x128xf32>, vector<16x128xf32> -> vector<16x128xf32>
    %c1_46 = arith.constant 1 : index
    %c0_47 = arith.constant 0 : index
    %c0_48 = arith.constant 0 : index
    %c0_49 = arith.constant 0 : index
    %46 = vector.load %arg8[%c1_46, %c0_47, %c0_48, %c0_49] : memref<11x3x128x128xf32, #tpu.memory_space<vmem>>, vector<1x1x128x128xf32>
    %47 = vector.shape_cast %46 : vector<1x1x128x128xf32> to vector<128x128xf32>
    %cst_50 = arith.constant dense<0.000000e+00> : vector<16x128xf32>
    %48 = tpu.matmul %45, %47, %cst_50 {dimension_numbers = #tpu.dot_dimension_numbers<[1], [0], [0], [1], [0, 0, 1, 1], [], []>} : vector<16x128xf32>, vector<128x128xf32>, vector<16x128xf32> -> vector<16x128xf32>
    %c1_51 = arith.constant 1 : index
    %c1_52 = arith.constant 1 : index
    %c0_53 = arith.constant 0 : index
    %c0_54 = arith.constant 0 : index
    %49 = vector.load %arg8[%c1_51, %c1_52, %c0_53, %c0_54] : memref<11x3x128x128xf32, #tpu.memory_space<vmem>>, vector<1x1x128x128xf32>
    %50 = vector.shape_cast %49 : vector<1x1x128x128xf32> to vector<128x128xf32>
    %cst_55 = arith.constant dense<0.000000e+00> : vector<16x128xf32>
    %51 = tpu.matmul %42, %50, %cst_55 {dimension_numbers = #tpu.dot_dimension_numbers<[1], [0], [0], [1], [0, 0, 1, 1], [], []>} : vector<16x128xf32>, vector<128x128xf32>, vector<16x128xf32> -> vector<16x128xf32>
    %52 = arith.addf %48, %51 : vector<16x128xf32>
    %c2_56 = arith.constant 2 : index
    %c0_57 = arith.constant 0 : index
    %c0_58 = arith.constant 0 : index
    %53 = vector.load %arg3[%c2_56, %c0_57, %c0_58] : memref<4x16x16xf32, #tpu.memory_space<vmem>>, vector<1x16x16xf32>
    %54 = vector.shape_cast %53 : vector<1x16x16xf32> to vector<16x16xf32>
    %cst_59 = arith.constant dense<0.000000e+00> : vector<16x128xf32>
    %55 = tpu.matmul %54, %42, %cst_59 {dimension_numbers = #tpu.dot_dimension_numbers<[1], [0], [0], [1], [0, 0, 1, 1], [], []>} : vector<16x16xf32>, vector<16x128xf32>, vector<16x128xf32> -> vector<16x128xf32>
    %c1_60 = arith.constant 1 : index
    %c2_61 = arith.constant 2 : index
    %c0_62 = arith.constant 0 : index
    %c0_63 = arith.constant 0 : index
    %56 = vector.load %arg8[%c1_60, %c2_61, %c0_62, %c0_63] : memref<11x3x128x128xf32, #tpu.memory_space<vmem>>, vector<1x1x128x128xf32>
    %57 = vector.shape_cast %56 : vector<1x1x128x128xf32> to vector<128x128xf32>
    %cst_64 = arith.constant dense<0.000000e+00> : vector<16x128xf32>
    %58 = tpu.matmul %55, %57, %cst_64 {dimension_numbers = #tpu.dot_dimension_numbers<[1], [0], [0], [1], [0, 0, 1, 1], [], []>} : vector<16x128xf32>, vector<128x128xf32>, vector<16x128xf32> -> vector<16x128xf32>
    %59 = arith.addf %52, %58 : vector<16x128xf32>
    %c1_65 = arith.constant 1 : index
    %c0_66 = arith.constant 0 : index
    %c0_67 = arith.constant 0 : index
    %60 = vector.load %arg9[%c1_65, %c0_66, %c0_67] : memref<11x1x128xf32, #tpu.memory_space<vmem>>, vector<1x1x128xf32>
    %61 = vector.shape_cast %60 : vector<1x1x128xf32> to vector<1x128xf32>
    %62 = vector.broadcast %61 : vector<1x128xf32> to vector<16x128xf32>
    %63 = arith.addf %59, %62 : vector<16x128xf32>
    %cst_68 = arith.constant 0.000000e+00 : f32
    %64 = vector.broadcast %cst_68 : f32 to vector<16x128xf32>
    %65 = arith.maximumf %17, %64 : vector<16x128xf32>
    %c1_69 = arith.constant 1 : index
    %c0_70 = arith.constant 0 : index
    %c0_71 = arith.constant 0 : index
    %66 = vector.load %arg3[%c1_69, %c0_70, %c0_71] : memref<4x16x16xf32, #tpu.memory_space<vmem>>, vector<1x16x16xf32>
    %67 = vector.shape_cast %66 : vector<1x16x16xf32> to vector<16x16xf32>
    %cst_72 = arith.constant dense<0.000000e+00> : vector<16x128xf32>
    %68 = tpu.matmul %67, %65, %cst_72 {dimension_numbers = #tpu.dot_dimension_numbers<[1], [0], [0], [1], [0, 0, 1, 1], [], []>} : vector<16x16xf32>, vector<16x128xf32>, vector<16x128xf32> -> vector<16x128xf32>
    %c2_73 = arith.constant 2 : index
    %c0_74 = arith.constant 0 : index
    %c0_75 = arith.constant 0 : index
    %c0_76 = arith.constant 0 : index
    %69 = vector.load %arg8[%c2_73, %c0_74, %c0_75, %c0_76] : memref<11x3x128x128xf32, #tpu.memory_space<vmem>>, vector<1x1x128x128xf32>
    %70 = vector.shape_cast %69 : vector<1x1x128x128xf32> to vector<128x128xf32>
    %cst_77 = arith.constant dense<0.000000e+00> : vector<16x128xf32>
    %71 = tpu.matmul %68, %70, %cst_77 {dimension_numbers = #tpu.dot_dimension_numbers<[1], [0], [0], [1], [0, 0, 1, 1], [], []>} : vector<16x128xf32>, vector<128x128xf32>, vector<16x128xf32> -> vector<16x128xf32>
    %c2_78 = arith.constant 2 : index
    %c1_79 = arith.constant 1 : index
    %c0_80 = arith.constant 0 : index
    %c0_81 = arith.constant 0 : index
    %72 = vector.load %arg8[%c2_78, %c1_79, %c0_80, %c0_81] : memref<11x3x128x128xf32, #tpu.memory_space<vmem>>, vector<1x1x128x128xf32>
    %73 = vector.shape_cast %72 : vector<1x1x128x128xf32> to vector<128x128xf32>
    %cst_82 = arith.constant dense<0.000000e+00> : vector<16x128xf32>
    %74 = tpu.matmul %65, %73, %cst_82 {dimension_numbers = #tpu.dot_dimension_numbers<[1], [0], [0], [1], [0, 0, 1, 1], [], []>} : vector<16x128xf32>, vector<128x128xf32>, vector<16x128xf32> -> vector<16x128xf32>
    %75 = arith.addf %71, %74 : vector<16x128xf32>
    %c2_83 = arith.constant 2 : index
    %c0_84 = arith.constant 0 : index
    %c0_85 = arith.constant 0 : index
    %76 = vector.load %arg3[%c2_83, %c0_84, %c0_85] : memref<4x16x16xf32, #tpu.memory_space<vmem>>, vector<1x16x16xf32>
    %77 = vector.shape_cast %76 : vector<1x16x16xf32> to vector<16x16xf32>
    %cst_86 = arith.constant dense<0.000000e+00> : vector<16x128xf32>
    %78 = tpu.matmul %77, %65, %cst_86 {dimension_numbers = #tpu.dot_dimension_numbers<[1], [0], [0], [1], [0, 0, 1, 1], [], []>} : vector<16x16xf32>, vector<16x128xf32>, vector<16x128xf32> -> vector<16x128xf32>
    %c2_87 = arith.constant 2 : index
    %c2_88 = arith.constant 2 : index
    %c0_89 = arith.constant 0 : index
    %c0_90 = arith.constant 0 : index
    %79 = vector.load %arg8[%c2_87, %c2_88, %c0_89, %c0_90] : memref<11x3x128x128xf32, #tpu.memory_space<vmem>>, vector<1x1x128x128xf32>
    %80 = vector.shape_cast %79 : vector<1x1x128x128xf32> to vector<128x128xf32>
    %cst_91 = arith.constant dense<0.000000e+00> : vector<16x128xf32>
    %81 = tpu.matmul %78, %80, %cst_91 {dimension_numbers = #tpu.dot_dimension_numbers<[1], [0], [0], [1], [0, 0, 1, 1], [], []>} : vector<16x128xf32>, vector<128x128xf32>, vector<16x128xf32> -> vector<16x128xf32>
    %82 = arith.addf %75, %81 : vector<16x128xf32>
    %c2_92 = arith.constant 2 : index
    %c0_93 = arith.constant 0 : index
    %c0_94 = arith.constant 0 : index
    %83 = vector.load %arg9[%c2_92, %c0_93, %c0_94] : memref<11x1x128xf32, #tpu.memory_space<vmem>>, vector<1x1x128xf32>
    %84 = vector.shape_cast %83 : vector<1x1x128xf32> to vector<1x128xf32>
    %85 = vector.broadcast %84 : vector<1x128xf32> to vector<16x128xf32>
    %86 = arith.addf %82, %85 : vector<16x128xf32>
    %cst_95 = arith.constant 0.000000e+00 : f32
    %87 = vector.broadcast %cst_95 : f32 to vector<16x128xf32>
    %88 = arith.maximumf %86, %87 : vector<16x128xf32>
    %c1_96 = arith.constant 1 : index
    %c0_97 = arith.constant 0 : index
    %c0_98 = arith.constant 0 : index
    %89 = vector.load %arg3[%c1_96, %c0_97, %c0_98] : memref<4x16x16xf32, #tpu.memory_space<vmem>>, vector<1x16x16xf32>
    %90 = vector.shape_cast %89 : vector<1x16x16xf32> to vector<16x16xf32>
    %cst_99 = arith.constant dense<0.000000e+00> : vector<16x128xf32>
    %91 = tpu.matmul %90, %88, %cst_99 {dimension_numbers = #tpu.dot_dimension_numbers<[1], [0], [0], [1], [0, 0, 1, 1], [], []>} : vector<16x16xf32>, vector<16x128xf32>, vector<16x128xf32> -> vector<16x128xf32>
    %c3 = arith.constant 3 : index
    %c0_100 = arith.constant 0 : index
    %c0_101 = arith.constant 0 : index
    %c0_102 = arith.constant 0 : index
    %92 = vector.load %arg8[%c3, %c0_100, %c0_101, %c0_102] : memref<11x3x128x128xf32, #tpu.memory_space<vmem>>, vector<1x1x128x128xf32>
    %93 = vector.shape_cast %92 : vector<1x1x128x128xf32> to vector<128x128xf32>
    %cst_103 = arith.constant dense<0.000000e+00> : vector<16x128xf32>
    %94 = tpu.matmul %91, %93, %cst_103 {dimension_numbers = #tpu.dot_dimension_numbers<[1], [0], [0], [1], [0, 0, 1, 1], [], []>} : vector<16x128xf32>, vector<128x128xf32>, vector<16x128xf32> -> vector<16x128xf32>
    %c3_104 = arith.constant 3 : index
    %c1_105 = arith.constant 1 : index
    %c0_106 = arith.constant 0 : index
    %c0_107 = arith.constant 0 : index
    %95 = vector.load %arg8[%c3_104, %c1_105, %c0_106, %c0_107] : memref<11x3x128x128xf32, #tpu.memory_space<vmem>>, vector<1x1x128x128xf32>
    %96 = vector.shape_cast %95 : vector<1x1x128x128xf32> to vector<128x128xf32>
    %cst_108 = arith.constant dense<0.000000e+00> : vector<16x128xf32>
    %97 = tpu.matmul %88, %96, %cst_108 {dimension_numbers = #tpu.dot_dimension_numbers<[1], [0], [0], [1], [0, 0, 1, 1], [], []>} : vector<16x128xf32>, vector<128x128xf32>, vector<16x128xf32> -> vector<16x128xf32>
    %98 = arith.addf %94, %97 : vector<16x128xf32>
    %c2_109 = arith.constant 2 : index
    %c0_110 = arith.constant 0 : index
    %c0_111 = arith.constant 0 : index
    %99 = vector.load %arg3[%c2_109, %c0_110, %c0_111] : memref<4x16x16xf32, #tpu.memory_space<vmem>>, vector<1x16x16xf32>
    %100 = vector.shape_cast %99 : vector<1x16x16xf32> to vector<16x16xf32>
    %cst_112 = arith.constant dense<0.000000e+00> : vector<16x128xf32>
    %101 = tpu.matmul %100, %88, %cst_112 {dimension_numbers = #tpu.dot_dimension_numbers<[1], [0], [0], [1], [0, 0, 1, 1], [], []>} : vector<16x16xf32>, vector<16x128xf32>, vector<16x128xf32> -> vector<16x128xf32>
    %c3_113 = arith.constant 3 : index
    %c2_114 = arith.constant 2 : index
    %c0_115 = arith.constant 0 : index
    %c0_116 = arith.constant 0 : index
    %102 = vector.load %arg8[%c3_113, %c2_114, %c0_115, %c0_116] : memref<11x3x128x128xf32, #tpu.memory_space<vmem>>, vector<1x1x128x128xf32>
    %103 = vector.shape_cast %102 : vector<1x1x128x128xf32> to vector<128x128xf32>
    %cst_117 = arith.constant dense<0.000000e+00> : vector<16x128xf32>
    %104 = tpu.matmul %101, %103, %cst_117 {dimension_numbers = #tpu.dot_dimension_numbers<[1], [0], [0], [1], [0, 0, 1, 1], [], []>} : vector<16x128xf32>, vector<128x128xf32>, vector<16x128xf32> -> vector<16x128xf32>
    %105 = arith.addf %98, %104 : vector<16x128xf32>
    %c3_118 = arith.constant 3 : index
    %c0_119 = arith.constant 0 : index
    %c0_120 = arith.constant 0 : index
    %106 = vector.load %arg9[%c3_118, %c0_119, %c0_120] : memref<11x1x128xf32, #tpu.memory_space<vmem>>, vector<1x1x128xf32>
    %107 = vector.shape_cast %106 : vector<1x1x128xf32> to vector<1x128xf32>
    %108 = vector.broadcast %107 : vector<1x128xf32> to vector<16x128xf32>
    %109 = arith.addf %105, %108 : vector<16x128xf32>
    %110 = arith.addf %63, %109 : vector<16x128xf32>
    %cst_121 = arith.constant 0.000000e+00 : f32
    %111 = vector.broadcast %cst_121 : f32 to vector<16x128xf32>
    %112 = arith.maximumf %8, %111 : vector<16x128xf32>
    %c1_122 = arith.constant 1 : index
    %c0_123 = arith.constant 0 : index
    %c0_124 = arith.constant 0 : index
    %113 = vector.load %arg3[%c1_122, %c0_123, %c0_124] : memref<4x16x16xf32, #tpu.memory_space<vmem>>, vector<1x16x16xf32>
    %114 = vector.shape_cast %113 : vector<1x16x16xf32> to vector<16x16xf32>
    %cst_125 = arith.constant dense<0.000000e+00> : vector<16x128xf32>
    %115 = tpu.matmul %114, %112, %cst_125 {dimension_numbers = #tpu.dot_dimension_numbers<[1], [0], [0], [1], [0, 0, 1, 1], [], []>} : vector<16x16xf32>, vector<16x128xf32>, vector<16x128xf32> -> vector<16x128xf32>
    %c4 = arith.constant 4 : index
    %c0_126 = arith.constant 0 : index
    %c0_127 = arith.constant 0 : index
    %c0_128 = arith.constant 0 : index
    %116 = vector.load %arg8[%c4, %c0_126, %c0_127, %c0_128] : memref<11x3x128x128xf32, #tpu.memory_space<vmem>>, vector<1x1x128x128xf32>
    %117 = vector.shape_cast %116 : vector<1x1x128x128xf32> to vector<128x128xf32>
    %cst_129 = arith.constant dense<0.000000e+00> : vector<16x128xf32>
    %118 = tpu.matmul %115, %117, %cst_129 {dimension_numbers = #tpu.dot_dimension_numbers<[1], [0], [0], [1], [0, 0, 1, 1], [], []>} : vector<16x128xf32>, vector<128x128xf32>, vector<16x128xf32> -> vector<16x128xf32>
    %c4_130 = arith.constant 4 : index
    %c1_131 = arith.constant 1 : index
    %c0_132 = arith.constant 0 : index
    %c0_133 = arith.constant 0 : index
    %119 = vector.load %arg8[%c4_130, %c1_131, %c0_132, %c0_133] : memref<11x3x128x128xf32, #tpu.memory_space<vmem>>, vector<1x1x128x128xf32>
    %120 = vector.shape_cast %119 : vector<1x1x128x128xf32> to vector<128x128xf32>
    %cst_134 = arith.constant dense<0.000000e+00> : vector<16x128xf32>
    %121 = tpu.matmul %112, %120, %cst_134 {dimension_numbers = #tpu.dot_dimension_numbers<[1], [0], [0], [1], [0, 0, 1, 1], [], []>} : vector<16x128xf32>, vector<128x128xf32>, vector<16x128xf32> -> vector<16x128xf32>
    %122 = arith.addf %118, %121 : vector<16x128xf32>
    %c2_135 = arith.constant 2 : index
    %c0_136 = arith.constant 0 : index
    %c0_137 = arith.constant 0 : index
    %123 = vector.load %arg3[%c2_135, %c0_136, %c0_137] : memref<4x16x16xf32, #tpu.memory_space<vmem>>, vector<1x16x16xf32>
    %124 = vector.shape_cast %123 : vector<1x16x16xf32> to vector<16x16xf32>
    %cst_138 = arith.constant dense<0.000000e+00> : vector<16x128xf32>
    %125 = tpu.matmul %124, %112, %cst_138 {dimension_numbers = #tpu.dot_dimension_numbers<[1], [0], [0], [1], [0, 0, 1, 1], [], []>} : vector<16x16xf32>, vector<16x128xf32>, vector<16x128xf32> -> vector<16x128xf32>
    %c4_139 = arith.constant 4 : index
    %c2_140 = arith.constant 2 : index
    %c0_141 = arith.constant 0 : index
    %c0_142 = arith.constant 0 : index
    %126 = vector.load %arg8[%c4_139, %c2_140, %c0_141, %c0_142] : memref<11x3x128x128xf32, #tpu.memory_space<vmem>>, vector<1x1x128x128xf32>
    %127 = vector.shape_cast %126 : vector<1x1x128x128xf32> to vector<128x128xf32>
    %cst_143 = arith.constant dense<0.000000e+00> : vector<16x128xf32>
    %128 = tpu.matmul %125, %127, %cst_143 {dimension_numbers = #tpu.dot_dimension_numbers<[1], [0], [0], [1], [0, 0, 1, 1], [], []>} : vector<16x128xf32>, vector<128x128xf32>, vector<16x128xf32> -> vector<16x128xf32>
    %129 = arith.addf %122, %128 : vector<16x128xf32>
    %c4_144 = arith.constant 4 : index
    %c0_145 = arith.constant 0 : index
    %c0_146 = arith.constant 0 : index
    %130 = vector.load %arg9[%c4_144, %c0_145, %c0_146] : memref<11x1x128xf32, #tpu.memory_space<vmem>>, vector<1x1x128xf32>
    %131 = vector.shape_cast %130 : vector<1x1x128xf32> to vector<1x128xf32>
    %132 = vector.broadcast %131 : vector<1x128xf32> to vector<16x128xf32>
    %133 = arith.addf %129, %132 : vector<16x128xf32>
    %cst_147 = arith.constant 0.000000e+00 : f32
    %134 = vector.broadcast %cst_147 : f32 to vector<16x128xf32>
    %135 = arith.maximumf %133, %134 : vector<16x128xf32>
    %c1_148 = arith.constant 1 : index
    %c0_149 = arith.constant 0 : index
    %c0_150 = arith.constant 0 : index
    %136 = vector.load %arg3[%c1_148, %c0_149, %c0_150] : memref<4x16x16xf32, #tpu.memory_space<vmem>>, vector<1x16x16xf32>
    %137 = vector.shape_cast %136 : vector<1x16x16xf32> to vector<16x16xf32>
    %cst_151 = arith.constant dense<0.000000e+00> : vector<16x128xf32>
    %138 = tpu.matmul %137, %135, %cst_151 {dimension_numbers = #tpu.dot_dimension_numbers<[1], [0], [0], [1], [0, 0, 1, 1], [], []>} : vector<16x16xf32>, vector<16x128xf32>, vector<16x128xf32> -> vector<16x128xf32>
    %c5 = arith.constant 5 : index
    %c0_152 = arith.constant 0 : index
    %c0_153 = arith.constant 0 : index
    %c0_154 = arith.constant 0 : index
    %139 = vector.load %arg8[%c5, %c0_152, %c0_153, %c0_154] : memref<11x3x128x128xf32, #tpu.memory_space<vmem>>, vector<1x1x128x128xf32>
    %140 = vector.shape_cast %139 : vector<1x1x128x128xf32> to vector<128x128xf32>
    %cst_155 = arith.constant dense<0.000000e+00> : vector<16x128xf32>
    %141 = tpu.matmul %138, %140, %cst_155 {dimension_numbers = #tpu.dot_dimension_numbers<[1], [0], [0], [1], [0, 0, 1, 1], [], []>} : vector<16x128xf32>, vector<128x128xf32>, vector<16x128xf32> -> vector<16x128xf32>
    %c5_156 = arith.constant 5 : index
    %c1_157 = arith.constant 1 : index
    %c0_158 = arith.constant 0 : index
    %c0_159 = arith.constant 0 : index
    %142 = vector.load %arg8[%c5_156, %c1_157, %c0_158, %c0_159] : memref<11x3x128x128xf32, #tpu.memory_space<vmem>>, vector<1x1x128x128xf32>
    %143 = vector.shape_cast %142 : vector<1x1x128x128xf32> to vector<128x128xf32>
    %cst_160 = arith.constant dense<0.000000e+00> : vector<16x128xf32>
    %144 = tpu.matmul %135, %143, %cst_160 {dimension_numbers = #tpu.dot_dimension_numbers<[1], [0], [0], [1], [0, 0, 1, 1], [], []>} : vector<16x128xf32>, vector<128x128xf32>, vector<16x128xf32> -> vector<16x128xf32>
    %145 = arith.addf %141, %144 : vector<16x128xf32>
    %c2_161 = arith.constant 2 : index
    %c0_162 = arith.constant 0 : index
    %c0_163 = arith.constant 0 : index
    %146 = vector.load %arg3[%c2_161, %c0_162, %c0_163] : memref<4x16x16xf32, #tpu.memory_space<vmem>>, vector<1x16x16xf32>
    %147 = vector.shape_cast %146 : vector<1x16x16xf32> to vector<16x16xf32>
    %cst_164 = arith.constant dense<0.000000e+00> : vector<16x128xf32>
    %148 = tpu.matmul %147, %135, %cst_164 {dimension_numbers = #tpu.dot_dimension_numbers<[1], [0], [0], [1], [0, 0, 1, 1], [], []>} : vector<16x16xf32>, vector<16x128xf32>, vector<16x128xf32> -> vector<16x128xf32>
    %c5_165 = arith.constant 5 : index
    %c2_166 = arith.constant 2 : index
    %c0_167 = arith.constant 0 : index
    %c0_168 = arith.constant 0 : index
    %149 = vector.load %arg8[%c5_165, %c2_166, %c0_167, %c0_168] : memref<11x3x128x128xf32, #tpu.memory_space<vmem>>, vector<1x1x128x128xf32>
    %150 = vector.shape_cast %149 : vector<1x1x128x128xf32> to vector<128x128xf32>
    %cst_169 = arith.constant dense<0.000000e+00> : vector<16x128xf32>
    %151 = tpu.matmul %148, %150, %cst_169 {dimension_numbers = #tpu.dot_dimension_numbers<[1], [0], [0], [1], [0, 0, 1, 1], [], []>} : vector<16x128xf32>, vector<128x128xf32>, vector<16x128xf32> -> vector<16x128xf32>
    %152 = arith.addf %145, %151 : vector<16x128xf32>
    %c5_170 = arith.constant 5 : index
    %c0_171 = arith.constant 0 : index
    %c0_172 = arith.constant 0 : index
    %153 = vector.load %arg9[%c5_170, %c0_171, %c0_172] : memref<11x1x128xf32, #tpu.memory_space<vmem>>, vector<1x1x128xf32>
    %154 = vector.shape_cast %153 : vector<1x1x128xf32> to vector<1x128xf32>
    %155 = vector.broadcast %154 : vector<1x128xf32> to vector<16x128xf32>
    %156 = arith.addf %152, %155 : vector<16x128xf32>
    %cst_173 = arith.constant 0.000000e+00 : f32
    %157 = vector.broadcast %cst_173 : f32 to vector<16x128xf32>
    %158 = arith.maximumf %17, %157 : vector<16x128xf32>
    %c1_174 = arith.constant 1 : index
    %c0_175 = arith.constant 0 : index
    %c0_176 = arith.constant 0 : index
    %159 = vector.load %arg3[%c1_174, %c0_175, %c0_176] : memref<4x16x16xf32, #tpu.memory_space<vmem>>, vector<1x16x16xf32>
    %160 = vector.shape_cast %159 : vector<1x16x16xf32> to vector<16x16xf32>
    %cst_177 = arith.constant dense<0.000000e+00> : vector<16x128xf32>
    %161 = tpu.matmul %160, %158, %cst_177 {dimension_numbers = #tpu.dot_dimension_numbers<[1], [0], [0], [1], [0, 0, 1, 1], [], []>} : vector<16x16xf32>, vector<16x128xf32>, vector<16x128xf32> -> vector<16x128xf32>
    %c6 = arith.constant 6 : index
    %c0_178 = arith.constant 0 : index
    %c0_179 = arith.constant 0 : index
    %c0_180 = arith.constant 0 : index
    %162 = vector.load %arg8[%c6, %c0_178, %c0_179, %c0_180] : memref<11x3x128x128xf32, #tpu.memory_space<vmem>>, vector<1x1x128x128xf32>
    %163 = vector.shape_cast %162 : vector<1x1x128x128xf32> to vector<128x128xf32>
    %cst_181 = arith.constant dense<0.000000e+00> : vector<16x128xf32>
    %164 = tpu.matmul %161, %163, %cst_181 {dimension_numbers = #tpu.dot_dimension_numbers<[1], [0], [0], [1], [0, 0, 1, 1], [], []>} : vector<16x128xf32>, vector<128x128xf32>, vector<16x128xf32> -> vector<16x128xf32>
    %c6_182 = arith.constant 6 : index
    %c1_183 = arith.constant 1 : index
    %c0_184 = arith.constant 0 : index
    %c0_185 = arith.constant 0 : index
    %165 = vector.load %arg8[%c6_182, %c1_183, %c0_184, %c0_185] : memref<11x3x128x128xf32, #tpu.memory_space<vmem>>, vector<1x1x128x128xf32>
    %166 = vector.shape_cast %165 : vector<1x1x128x128xf32> to vector<128x128xf32>
    %cst_186 = arith.constant dense<0.000000e+00> : vector<16x128xf32>
    %167 = tpu.matmul %158, %166, %cst_186 {dimension_numbers = #tpu.dot_dimension_numbers<[1], [0], [0], [1], [0, 0, 1, 1], [], []>} : vector<16x128xf32>, vector<128x128xf32>, vector<16x128xf32> -> vector<16x128xf32>
    %168 = arith.addf %164, %167 : vector<16x128xf32>
    %c2_187 = arith.constant 2 : index
    %c0_188 = arith.constant 0 : index
    %c0_189 = arith.constant 0 : index
    %169 = vector.load %arg3[%c2_187, %c0_188, %c0_189] : memref<4x16x16xf32, #tpu.memory_space<vmem>>, vector<1x16x16xf32>
    %170 = vector.shape_cast %169 : vector<1x16x16xf32> to vector<16x16xf32>
    %cst_190 = arith.constant dense<0.000000e+00> : vector<16x128xf32>
    %171 = tpu.matmul %170, %158, %cst_190 {dimension_numbers = #tpu.dot_dimension_numbers<[1], [0], [0], [1], [0, 0, 1, 1], [], []>} : vector<16x16xf32>, vector<16x128xf32>, vector<16x128xf32> -> vector<16x128xf32>
    %c6_191 = arith.constant 6 : index
    %c2_192 = arith.constant 2 : index
    %c0_193 = arith.constant 0 : index
    %c0_194 = arith.constant 0 : index
    %172 = vector.load %arg8[%c6_191, %c2_192, %c0_193, %c0_194] : memref<11x3x128x128xf32, #tpu.memory_space<vmem>>, vector<1x1x128x128xf32>
    %173 = vector.shape_cast %172 : vector<1x1x128x128xf32> to vector<128x128xf32>
    %cst_195 = arith.constant dense<0.000000e+00> : vector<16x128xf32>
    %174 = tpu.matmul %171, %173, %cst_195 {dimension_numbers = #tpu.dot_dimension_numbers<[1], [0], [0], [1], [0, 0, 1, 1], [], []>} : vector<16x128xf32>, vector<128x128xf32>, vector<16x128xf32> -> vector<16x128xf32>
    %175 = arith.addf %168, %174 : vector<16x128xf32>
    %c6_196 = arith.constant 6 : index
    %c0_197 = arith.constant 0 : index
    %c0_198 = arith.constant 0 : index
    %176 = vector.load %arg9[%c6_196, %c0_197, %c0_198] : memref<11x1x128xf32, #tpu.memory_space<vmem>>, vector<1x1x128xf32>
    %177 = vector.shape_cast %176 : vector<1x1x128xf32> to vector<1x128xf32>
    %178 = vector.broadcast %177 : vector<1x128xf32> to vector<16x128xf32>
    %179 = arith.addf %175, %178 : vector<16x128xf32>
    %cst_199 = arith.constant 0.000000e+00 : f32
    %180 = vector.broadcast %cst_199 : f32 to vector<16x128xf32>
    %181 = arith.maximumf %179, %180 : vector<16x128xf32>
    %c1_200 = arith.constant 1 : index
    %c0_201 = arith.constant 0 : index
    %c0_202 = arith.constant 0 : index
    %182 = vector.load %arg3[%c1_200, %c0_201, %c0_202] : memref<4x16x16xf32, #tpu.memory_space<vmem>>, vector<1x16x16xf32>
    %183 = vector.shape_cast %182 : vector<1x16x16xf32> to vector<16x16xf32>
    %cst_203 = arith.constant dense<0.000000e+00> : vector<16x128xf32>
    %184 = tpu.matmul %183, %181, %cst_203 {dimension_numbers = #tpu.dot_dimension_numbers<[1], [0], [0], [1], [0, 0, 1, 1], [], []>} : vector<16x16xf32>, vector<16x128xf32>, vector<16x128xf32> -> vector<16x128xf32>
    %c7 = arith.constant 7 : index
    %c0_204 = arith.constant 0 : index
    %c0_205 = arith.constant 0 : index
    %c0_206 = arith.constant 0 : index
    %185 = vector.load %arg8[%c7, %c0_204, %c0_205, %c0_206] : memref<11x3x128x128xf32, #tpu.memory_space<vmem>>, vector<1x1x128x128xf32>
    %186 = vector.shape_cast %185 : vector<1x1x128x128xf32> to vector<128x128xf32>
    %cst_207 = arith.constant dense<0.000000e+00> : vector<16x128xf32>
    %187 = tpu.matmul %184, %186, %cst_207 {dimension_numbers = #tpu.dot_dimension_numbers<[1], [0], [0], [1], [0, 0, 1, 1], [], []>} : vector<16x128xf32>, vector<128x128xf32>, vector<16x128xf32> -> vector<16x128xf32>
    %c7_208 = arith.constant 7 : index
    %c1_209 = arith.constant 1 : index
    %c0_210 = arith.constant 0 : index
    %c0_211 = arith.constant 0 : index
    %188 = vector.load %arg8[%c7_208, %c1_209, %c0_210, %c0_211] : memref<11x3x128x128xf32, #tpu.memory_space<vmem>>, vector<1x1x128x128xf32>
    %189 = vector.shape_cast %188 : vector<1x1x128x128xf32> to vector<128x128xf32>
    %cst_212 = arith.constant dense<0.000000e+00> : vector<16x128xf32>
    %190 = tpu.matmul %181, %189, %cst_212 {dimension_numbers = #tpu.dot_dimension_numbers<[1], [0], [0], [1], [0, 0, 1, 1], [], []>} : vector<16x128xf32>, vector<128x128xf32>, vector<16x128xf32> -> vector<16x128xf32>
    %191 = arith.addf %187, %190 : vector<16x128xf32>
    %c2_213 = arith.constant 2 : index
    %c0_214 = arith.constant 0 : index
    %c0_215 = arith.constant 0 : index
    %192 = vector.load %arg3[%c2_213, %c0_214, %c0_215] : memref<4x16x16xf32, #tpu.memory_space<vmem>>, vector<1x16x16xf32>
    %193 = vector.shape_cast %192 : vector<1x16x16xf32> to vector<16x16xf32>
    %cst_216 = arith.constant dense<0.000000e+00> : vector<16x128xf32>
    %194 = tpu.matmul %193, %181, %cst_216 {dimension_numbers = #tpu.dot_dimension_numbers<[1], [0], [0], [1], [0, 0, 1, 1], [], []>} : vector<16x16xf32>, vector<16x128xf32>, vector<16x128xf32> -> vector<16x128xf32>
    %c7_217 = arith.constant 7 : index
    %c2_218 = arith.constant 2 : index
    %c0_219 = arith.constant 0 : index
    %c0_220 = arith.constant 0 : index
    %195 = vector.load %arg8[%c7_217, %c2_218, %c0_219, %c0_220] : memref<11x3x128x128xf32, #tpu.memory_space<vmem>>, vector<1x1x128x128xf32>
    %196 = vector.shape_cast %195 : vector<1x1x128x128xf32> to vector<128x128xf32>
    %cst_221 = arith.constant dense<0.000000e+00> : vector<16x128xf32>
    %197 = tpu.matmul %194, %196, %cst_221 {dimension_numbers = #tpu.dot_dimension_numbers<[1], [0], [0], [1], [0, 0, 1, 1], [], []>} : vector<16x128xf32>, vector<128x128xf32>, vector<16x128xf32> -> vector<16x128xf32>
    %198 = arith.addf %191, %197 : vector<16x128xf32>
    %c7_222 = arith.constant 7 : index
    %c0_223 = arith.constant 0 : index
    %c0_224 = arith.constant 0 : index
    %199 = vector.load %arg9[%c7_222, %c0_223, %c0_224] : memref<11x1x128xf32, #tpu.memory_space<vmem>>, vector<1x1x128xf32>
    %200 = vector.shape_cast %199 : vector<1x1x128xf32> to vector<1x128xf32>
    %201 = vector.broadcast %200 : vector<1x128xf32> to vector<16x128xf32>
    %202 = arith.addf %198, %201 : vector<16x128xf32>
    %203 = arith.addf %156, %202 : vector<16x128xf32>
    %cst_225 = arith.constant 0.000000e+00 : f32
    %204 = vector.broadcast %cst_225 : f32 to vector<16x128xf32>
    %205 = arith.maximumf %17, %204 : vector<16x128xf32>
    %c1_226 = arith.constant 1 : index
    %c0_227 = arith.constant 0 : index
    %c0_228 = arith.constant 0 : index
    %206 = vector.load %arg3[%c1_226, %c0_227, %c0_228] : memref<4x16x16xf32, #tpu.memory_space<vmem>>, vector<1x16x16xf32>
    %207 = vector.shape_cast %206 : vector<1x16x16xf32> to vector<16x16xf32>
    %cst_229 = arith.constant dense<0.000000e+00> : vector<16x128xf32>
    %208 = tpu.matmul %207, %205, %cst_229 {dimension_numbers = #tpu.dot_dimension_numbers<[1], [0], [0], [1], [0, 0, 1, 1], [], []>} : vector<16x16xf32>, vector<16x128xf32>, vector<16x128xf32> -> vector<16x128xf32>
    %c8 = arith.constant 8 : index
    %c0_230 = arith.constant 0 : index
    %c0_231 = arith.constant 0 : index
    %c0_232 = arith.constant 0 : index
    %209 = vector.load %arg8[%c8, %c0_230, %c0_231, %c0_232] : memref<11x3x128x128xf32, #tpu.memory_space<vmem>>, vector<1x1x128x128xf32>
    %210 = vector.shape_cast %209 : vector<1x1x128x128xf32> to vector<128x128xf32>
    %cst_233 = arith.constant dense<0.000000e+00> : vector<16x128xf32>
    %211 = tpu.matmul %208, %210, %cst_233 {dimension_numbers = #tpu.dot_dimension_numbers<[1], [0], [0], [1], [0, 0, 1, 1], [], []>} : vector<16x128xf32>, vector<128x128xf32>, vector<16x128xf32> -> vector<16x128xf32>
    %c8_234 = arith.constant 8 : index
    %c1_235 = arith.constant 1 : index
    %c0_236 = arith.constant 0 : index
    %c0_237 = arith.constant 0 : index
    %212 = vector.load %arg8[%c8_234, %c1_235, %c0_236, %c0_237] : memref<11x3x128x128xf32, #tpu.memory_space<vmem>>, vector<1x1x128x128xf32>
    %213 = vector.shape_cast %212 : vector<1x1x128x128xf32> to vector<128x128xf32>
    %cst_238 = arith.constant dense<0.000000e+00> : vector<16x128xf32>
    %214 = tpu.matmul %205, %213, %cst_238 {dimension_numbers = #tpu.dot_dimension_numbers<[1], [0], [0], [1], [0, 0, 1, 1], [], []>} : vector<16x128xf32>, vector<128x128xf32>, vector<16x128xf32> -> vector<16x128xf32>
    %215 = arith.addf %211, %214 : vector<16x128xf32>
    %c2_239 = arith.constant 2 : index
    %c0_240 = arith.constant 0 : index
    %c0_241 = arith.constant 0 : index
    %216 = vector.load %arg3[%c2_239, %c0_240, %c0_241] : memref<4x16x16xf32, #tpu.memory_space<vmem>>, vector<1x16x16xf32>
    %217 = vector.shape_cast %216 : vector<1x16x16xf32> to vector<16x16xf32>
    %cst_242 = arith.constant dense<0.000000e+00> : vector<16x128xf32>
    %218 = tpu.matmul %217, %205, %cst_242 {dimension_numbers = #tpu.dot_dimension_numbers<[1], [0], [0], [1], [0, 0, 1, 1], [], []>} : vector<16x16xf32>, vector<16x128xf32>, vector<16x128xf32> -> vector<16x128xf32>
    %c8_243 = arith.constant 8 : index
    %c2_244 = arith.constant 2 : index
    %c0_245 = arith.constant 0 : index
    %c0_246 = arith.constant 0 : index
    %219 = vector.load %arg8[%c8_243, %c2_244, %c0_245, %c0_246] : memref<11x3x128x128xf32, #tpu.memory_space<vmem>>, vector<1x1x128x128xf32>
    %220 = vector.shape_cast %219 : vector<1x1x128x128xf32> to vector<128x128xf32>
    %cst_247 = arith.constant dense<0.000000e+00> : vector<16x128xf32>
    %221 = tpu.matmul %218, %220, %cst_247 {dimension_numbers = #tpu.dot_dimension_numbers<[1], [0], [0], [1], [0, 0, 1, 1], [], []>} : vector<16x128xf32>, vector<128x128xf32>, vector<16x128xf32> -> vector<16x128xf32>
    %222 = arith.addf %215, %221 : vector<16x128xf32>
    %c8_248 = arith.constant 8 : index
    %c0_249 = arith.constant 0 : index
    %c0_250 = arith.constant 0 : index
    %223 = vector.load %arg9[%c8_248, %c0_249, %c0_250] : memref<11x1x128xf32, #tpu.memory_space<vmem>>, vector<1x1x128xf32>
    %224 = vector.shape_cast %223 : vector<1x1x128xf32> to vector<1x128xf32>
    %225 = vector.broadcast %224 : vector<1x128xf32> to vector<16x128xf32>
    %226 = arith.addf %222, %225 : vector<16x128xf32>
    %cst_251 = arith.constant 0.000000e+00 : f32
    %227 = vector.broadcast %cst_251 : f32 to vector<16x128xf32>
    %228 = arith.maximumf %226, %227 : vector<16x128xf32>
    %c1_252 = arith.constant 1 : index
    %c0_253 = arith.constant 0 : index
    %c0_254 = arith.constant 0 : index
    %229 = vector.load %arg3[%c1_252, %c0_253, %c0_254] : memref<4x16x16xf32, #tpu.memory_space<vmem>>, vector<1x16x16xf32>
    %230 = vector.shape_cast %229 : vector<1x16x16xf32> to vector<16x16xf32>
    %cst_255 = arith.constant dense<0.000000e+00> : vector<16x128xf32>
    %231 = tpu.matmul %230, %228, %cst_255 {dimension_numbers = #tpu.dot_dimension_numbers<[1], [0], [0], [1], [0, 0, 1, 1], [], []>} : vector<16x16xf32>, vector<16x128xf32>, vector<16x128xf32> -> vector<16x128xf32>
    %c9 = arith.constant 9 : index
    %c0_256 = arith.constant 0 : index
    %c0_257 = arith.constant 0 : index
    %c0_258 = arith.constant 0 : index
    %232 = vector.load %arg8[%c9, %c0_256, %c0_257, %c0_258] : memref<11x3x128x128xf32, #tpu.memory_space<vmem>>, vector<1x1x128x128xf32>
    %233 = vector.shape_cast %232 : vector<1x1x128x128xf32> to vector<128x128xf32>
    %cst_259 = arith.constant dense<0.000000e+00> : vector<16x128xf32>
    %234 = tpu.matmul %231, %233, %cst_259 {dimension_numbers = #tpu.dot_dimension_numbers<[1], [0], [0], [1], [0, 0, 1, 1], [], []>} : vector<16x128xf32>, vector<128x128xf32>, vector<16x128xf32> -> vector<16x128xf32>
    %c9_260 = arith.constant 9 : index
    %c1_261 = arith.constant 1 : index
    %c0_262 = arith.constant 0 : index
    %c0_263 = arith.constant 0 : index
    %235 = vector.load %arg8[%c9_260, %c1_261, %c0_262, %c0_263] : memref<11x3x128x128xf32, #tpu.memory_space<vmem>>, vector<1x1x128x128xf32>
    %236 = vector.shape_cast %235 : vector<1x1x128x128xf32> to vector<128x128xf32>
    %cst_264 = arith.constant dense<0.000000e+00> : vector<16x128xf32>
    %237 = tpu.matmul %228, %236, %cst_264 {dimension_numbers = #tpu.dot_dimension_numbers<[1], [0], [0], [1], [0, 0, 1, 1], [], []>} : vector<16x128xf32>, vector<128x128xf32>, vector<16x128xf32> -> vector<16x128xf32>
    %238 = arith.addf %234, %237 : vector<16x128xf32>
    %c2_265 = arith.constant 2 : index
    %c0_266 = arith.constant 0 : index
    %c0_267 = arith.constant 0 : index
    %239 = vector.load %arg3[%c2_265, %c0_266, %c0_267] : memref<4x16x16xf32, #tpu.memory_space<vmem>>, vector<1x16x16xf32>
    %240 = vector.shape_cast %239 : vector<1x16x16xf32> to vector<16x16xf32>
    %cst_268 = arith.constant dense<0.000000e+00> : vector<16x128xf32>
    %241 = tpu.matmul %240, %228, %cst_268 {dimension_numbers = #tpu.dot_dimension_numbers<[1], [0], [0], [1], [0, 0, 1, 1], [], []>} : vector<16x16xf32>, vector<16x128xf32>, vector<16x128xf32> -> vector<16x128xf32>
    %c9_269 = arith.constant 9 : index
    %c2_270 = arith.constant 2 : index
    %c0_271 = arith.constant 0 : index
    %c0_272 = arith.constant 0 : index
    %242 = vector.load %arg8[%c9_269, %c2_270, %c0_271, %c0_272] : memref<11x3x128x128xf32, #tpu.memory_space<vmem>>, vector<1x1x128x128xf32>
    %243 = vector.shape_cast %242 : vector<1x1x128x128xf32> to vector<128x128xf32>
    %cst_273 = arith.constant dense<0.000000e+00> : vector<16x128xf32>
    %244 = tpu.matmul %241, %243, %cst_273 {dimension_numbers = #tpu.dot_dimension_numbers<[1], [0], [0], [1], [0, 0, 1, 1], [], []>} : vector<16x128xf32>, vector<128x128xf32>, vector<16x128xf32> -> vector<16x128xf32>
    %245 = arith.addf %238, %244 : vector<16x128xf32>
    %c9_274 = arith.constant 9 : index
    %c0_275 = arith.constant 0 : index
    %c0_276 = arith.constant 0 : index
    %246 = vector.load %arg9[%c9_274, %c0_275, %c0_276] : memref<11x1x128xf32, #tpu.memory_space<vmem>>, vector<1x1x128xf32>
    %247 = vector.shape_cast %246 : vector<1x1x128xf32> to vector<1x128xf32>
    %248 = vector.broadcast %247 : vector<1x128xf32> to vector<16x128xf32>
    %249 = arith.addf %245, %248 : vector<16x128xf32>
    %250 = arith.addf %249, %8 : vector<16x128xf32>
    %cst_277 = arith.constant 0.000000e+00 : f32
    %251 = vector.broadcast %cst_277 : f32 to vector<16x128xf32>
    %252 = arith.maximumf %110, %251 : vector<16x128xf32>
    %c0_278 = arith.constant 0 : index
    %c0_279 = arith.constant 0 : index
    %c0_280 = arith.constant 0 : index
    %253 = vector.load %arg3[%c0_278, %c0_279, %c0_280] : memref<4x16x16xf32, #tpu.memory_space<vmem>>, vector<1x16x16xf32>
    %254 = vector.shape_cast %253 : vector<1x16x16xf32> to vector<16x16xf32>
    %cst_281 = arith.constant dense<0.000000e+00> : vector<16x128xf32>
    %255 = tpu.matmul %254, %252, %cst_281 {dimension_numbers = #tpu.dot_dimension_numbers<[1], [0], [0], [1], [0, 0, 1, 1], [], []>} : vector<16x16xf32>, vector<16x128xf32>, vector<16x128xf32> -> vector<16x128xf32>
    %c10 = arith.constant 10 : index
    %c0_282 = arith.constant 0 : index
    %c0_283 = arith.constant 0 : index
    %c0_284 = arith.constant 0 : index
    %256 = vector.load %arg8[%c10, %c0_282, %c0_283, %c0_284] : memref<11x3x128x128xf32, #tpu.memory_space<vmem>>, vector<1x1x128x128xf32>
    %257 = vector.shape_cast %256 : vector<1x1x128x128xf32> to vector<128x128xf32>
    %cst_285 = arith.constant dense<0.000000e+00> : vector<16x128xf32>
    %258 = tpu.matmul %255, %257, %cst_285 {dimension_numbers = #tpu.dot_dimension_numbers<[1], [0], [0], [1], [0, 0, 1, 1], [], []>} : vector<16x128xf32>, vector<128x128xf32>, vector<16x128xf32> -> vector<16x128xf32>
    %c10_286 = arith.constant 10 : index
    %c1_287 = arith.constant 1 : index
    %c0_288 = arith.constant 0 : index
    %c0_289 = arith.constant 0 : index
    %259 = vector.load %arg8[%c10_286, %c1_287, %c0_288, %c0_289] : memref<11x3x128x128xf32, #tpu.memory_space<vmem>>, vector<1x1x128x128xf32>
    %260 = vector.shape_cast %259 : vector<1x1x128x128xf32> to vector<128x128xf32>
    %cst_290 = arith.constant dense<0.000000e+00> : vector<16x128xf32>
    %261 = tpu.matmul %252, %260, %cst_290 {dimension_numbers = #tpu.dot_dimension_numbers<[1], [0], [0], [1], [0, 0, 1, 1], [], []>} : vector<16x128xf32>, vector<128x128xf32>, vector<16x128xf32> -> vector<16x128xf32>
    %262 = arith.addf %258, %261 : vector<16x128xf32>
    %c3_291 = arith.constant 3 : index
    %c0_292 = arith.constant 0 : index
    %c0_293 = arith.constant 0 : index
    %263 = vector.load %arg3[%c3_291, %c0_292, %c0_293] : memref<4x16x16xf32, #tpu.memory_space<vmem>>, vector<1x16x16xf32>
    %264 = vector.shape_cast %263 : vector<1x16x16xf32> to vector<16x16xf32>
    %cst_294 = arith.constant dense<0.000000e+00> : vector<16x128xf32>
    %265 = tpu.matmul %264, %252, %cst_294 {dimension_numbers = #tpu.dot_dimension_numbers<[1], [0], [0], [1], [0, 0, 1, 1], [], []>} : vector<16x16xf32>, vector<16x128xf32>, vector<16x128xf32> -> vector<16x128xf32>
    %c10_295 = arith.constant 10 : index
    %c2_296 = arith.constant 2 : index
    %c0_297 = arith.constant 0 : index
    %c0_298 = arith.constant 0 : index
    %266 = vector.load %arg8[%c10_295, %c2_296, %c0_297, %c0_298] : memref<11x3x128x128xf32, #tpu.memory_space<vmem>>, vector<1x1x128x128xf32>
    %267 = vector.shape_cast %266 : vector<1x1x128x128xf32> to vector<128x128xf32>
    %cst_299 = arith.constant dense<0.000000e+00> : vector<16x128xf32>
    %268 = tpu.matmul %265, %267, %cst_299 {dimension_numbers = #tpu.dot_dimension_numbers<[1], [0], [0], [1], [0, 0, 1, 1], [], []>} : vector<16x128xf32>, vector<128x128xf32>, vector<16x128xf32> -> vector<16x128xf32>
    %269 = arith.addf %262, %268 : vector<16x128xf32>
    %c10_300 = arith.constant 10 : index
    %c0_301 = arith.constant 0 : index
    %c0_302 = arith.constant 0 : index
    %270 = vector.load %arg9[%c10_300, %c0_301, %c0_302] : memref<11x1x128xf32, #tpu.memory_space<vmem>>, vector<1x1x128xf32>
    %271 = vector.shape_cast %270 : vector<1x1x128xf32> to vector<1x128xf32>
    %272 = vector.broadcast %271 : vector<1x128xf32> to vector<16x128xf32>
    %273 = arith.addf %269, %272 : vector<16x128xf32>
    %274 = arith.addf %8, %273 : vector<16x128xf32>
    %c0_303 = arith.constant 0 : index
    %c0_304 = arith.constant 0 : index
    %c0_305 = arith.constant 0 : index
    %c0_306 = arith.constant 0 : index
    %275 = vector.load %arg10[%c0_303, %c0_304, %c0_305, %c0_306] : memref<1x4x16x128xf32, #tpu.memory_space<vmem>>, vector<1x1x16x128xf32>
    %276 = vector.shape_cast %275 : vector<1x1x16x128xf32> to vector<16x128xf32>
    %277 = vector.shape_cast %110 : vector<16x128xf32> to vector<1x1x16x128xf32>
    tpu.vector_store %arg10[%c0_303, %c0_304, %c0_305, %c0_306], %277 {strides = array<i32>} : memref<1x4x16x128xf32, #tpu.memory_space<vmem>>, vector<1x1x16x128xf32>,
    %c0_307 = arith.constant 0 : index
    %c1_308 = arith.constant 1 : index
    %c0_309 = arith.constant 0 : index
    %c0_310 = arith.constant 0 : index
    %278 = vector.load %arg10[%c0_307, %c1_308, %c0_309, %c0_310] : memref<1x4x16x128xf32, #tpu.memory_space<vmem>>, vector<1x1x16x128xf32>
    %279 = vector.shape_cast %278 : vector<1x1x16x128xf32> to vector<16x128xf32>
    %280 = vector.shape_cast %203 : vector<16x128xf32> to vector<1x1x16x128xf32>
    tpu.vector_store %arg10[%c0_307, %c1_308, %c0_309, %c0_310], %280 {strides = array<i32>} : memref<1x4x16x128xf32, #tpu.memory_space<vmem>>, vector<1x1x16x128xf32>,
    %c0_311 = arith.constant 0 : index
    %c2_312 = arith.constant 2 : index
    %c0_313 = arith.constant 0 : index
    %c0_314 = arith.constant 0 : index
    %281 = vector.load %arg10[%c0_311, %c2_312, %c0_313, %c0_314] : memref<1x4x16x128xf32, #tpu.memory_space<vmem>>, vector<1x1x16x128xf32>
    %282 = vector.shape_cast %281 : vector<1x1x16x128xf32> to vector<16x128xf32>
    %283 = vector.shape_cast %250 : vector<16x128xf32> to vector<1x1x16x128xf32>
    tpu.vector_store %arg10[%c0_311, %c2_312, %c0_313, %c0_314], %283 {strides = array<i32>} : memref<1x4x16x128xf32, #tpu.memory_space<vmem>>, vector<1x1x16x128xf32>,
    %c0_315 = arith.constant 0 : index
    %c3_316 = arith.constant 3 : index
    %c0_317 = arith.constant 0 : index
    %c0_318 = arith.constant 0 : index
    %284 = vector.load %arg10[%c0_315, %c3_316, %c0_317, %c0_318] : memref<1x4x16x128xf32, #tpu.memory_space<vmem>>, vector<1x1x16x128xf32>
    %285 = vector.shape_cast %284 : vector<1x1x16x128xf32> to vector<16x128xf32>
    %286 = vector.shape_cast %274 : vector<16x128xf32> to vector<1x1x16x128xf32>
    tpu.vector_store %arg10[%c0_315, %c3_316, %c0_317, %c0_318], %286 {strides = array<i32>} : memref<1x4x16x128xf32, #tpu.memory_space<vmem>>, vector<1x1x16x128xf32>,
    return
  }
  func.func @transform_0(%arg0: i32) -> (i32, i32, i32) {
    %c0_i32 = arith.constant 0 : i32
    %c0_i32_0 = arith.constant 0 : i32
    %c0_i32_1 = arith.constant 0 : i32
    return %arg0, %c0_i32, %c0_i32_0 : i32, i32, i32
  }
  func.func @transform_1(%arg0: i32) -> (i32, i32, i32) {
    %c0_i32 = arith.constant 0 : i32
    %c0_i32_0 = arith.constant 0 : i32
    %c0_i32_1 = arith.constant 0 : i32
    return %arg0, %c0_i32, %c0_i32_0 : i32, i32, i32
  }
  func.func @transform_2(%arg0: i32) -> (i32, i32, i32) {
    %c0_i32 = arith.constant 0 : i32
    %c0_i32_0 = arith.constant 0 : i32
    %c0_i32_1 = arith.constant 0 : i32
    %c0_i32_2 = arith.constant 0 : i32
    return %c0_i32, %c0_i32_0, %c0_i32_1 : i32, i32, i32
  }
  func.func @transform_3(%arg0: i32) -> (i32, i32) {
    %c0_i32 = arith.constant 0 : i32
    %c0_i32_0 = arith.constant 0 : i32
    %c0_i32_1 = arith.constant 0 : i32
    return %c0_i32, %c0_i32_0 : i32, i32
  }
  func.func @transform_4(%arg0: i32) -> (i32, i32) {
    %c0_i32 = arith.constant 0 : i32
    %c0_i32_0 = arith.constant 0 : i32
    %c0_i32_1 = arith.constant 0 : i32
    return %c0_i32, %c0_i32_0 : i32, i32
  }
  func.func @transform_5(%arg0: i32) -> (i32, i32) {
    %c0_i32 = arith.constant 0 : i32
    %c0_i32_0 = arith.constant 0 : i32
    %c0_i32_1 = arith.constant 0 : i32
    return %c0_i32, %c0_i32_0 : i32, i32
  }
  func.func @transform_6(%arg0: i32) -> (i32, i32) {
    %c0_i32 = arith.constant 0 : i32
    %c0_i32_0 = arith.constant 0 : i32
    %c0_i32_1 = arith.constant 0 : i32
    return %c0_i32, %c0_i32_0 : i32, i32
  }
  func.func @transform_7(%arg0: i32) -> (i32, i32, i32, i32) {
    %c0_i32 = arith.constant 0 : i32
    %c0_i32_0 = arith.constant 0 : i32
    %c0_i32_1 = arith.constant 0 : i32
    %c0_i32_2 = arith.constant 0 : i32
    %c0_i32_3 = arith.constant 0 : i32
    return %c0_i32, %c0_i32_0, %c0_i32_1, %c0_i32_2 : i32, i32, i32, i32
  }
  func.func @transform_8(%arg0: i32) -> (i32, i32, i32) {
    %c0_i32 = arith.constant 0 : i32
    %c0_i32_0 = arith.constant 0 : i32
    %c0_i32_1 = arith.constant 0 : i32
    %c0_i32_2 = arith.constant 0 : i32
    return %c0_i32, %c0_i32_0, %c0_i32_1 : i32, i32, i32
  }
  func.func @transform_9(%arg0: i32) -> (i32, i32, i32, i32) {
    %c0_i32 = arith.constant 0 : i32
    %c0_i32_0 = arith.constant 0 : i32
    %c0_i32_1 = arith.constant 0 : i32
    %c0_i32_2 = arith.constant 0 : i32
    return %arg0, %c0_i32, %c0_i32_0, %c0_i32_1 : i32, i32, i32, i32
  }
}

</mosaic_0001>

<bundles_post_ra>
// kernel: _lambda_.1
= control target key start
LH: loop header
LB: loop body
LE: loop exit
PB: predicated region body
PF: predicated region fallthrough
CT: control target
= control target key end

     0   :  { %14 = vsyncpa [#allocation3], 0  ;;  %s9451_s0 = inlined_call_operand.vmem [shape: f32[2,16,128], index: 0, kind: input, shape index: {}]   ;;  %s9452_s1 = inlined_call_operand.vmem [shape: f32[2,16,128], index: 1, kind: input, shape index: {}]   ;;  %s9453_s2 = inlined_call_operand.hbm [shape: f32[4,16,16], index: 2, kind: input, shape index: {}]   ;;  %s9454_s3 = inlined_call_operand.hbm [shape: f32[128,128], index: 3, kind: input, shape index: {}]   ;;  %s9455_s4 = inlined_call_operand.hbm [shape: f32[1,128], index: 4, kind: input, shape index: {}]   ;;  %s9456_s5 = inlined_call_operand.hbm [shape: f32[128,128], index: 5, kind: input, shape index: {}]   ;;  %s9457_s6 = inlined_call_operand.hbm [shape: f32[1,128], index: 6, kind: input, shape index: {}]   ;;  %s9458_s7 = inlined_call_operand.hbm [shape: f32[11,3,128,128], index: 7, kind: input, shape index: {}]   ;;  %s9459_s8 = inlined_call_operand.hbm [shape: f32[11,1,128], index: 8, kind: input, shape index: {}]   ;;  %s9460_s9 = inlined_call_operand.vmem [shape: f32[2,4,16,128], index: 9, kind: output, shape index: {}]  }
   0x1   :  { %15 = vsyncpa [#allocation5], 0 }
   0x2   :  { %16 = vsyncpa [#allocation8], 0 }
   0x3   :  { %17 = vsyncpa [#allocation11], 0  ;;  %s8949_s30 = smov 0  }
   0x4 LB: > { %s8955_s10 = sadd.s32 4294967295, %s8886_s30   ;;  %p5230_p0 = scmp.ge.s32.totalorder %s8886_s30, 1  ;;  %s8886_s30 = sphi %s8949_s30, %s23_s30  }
   0x5   : > { %p253_p1 = scmp.lt.s32.totalorder %s8886_s30, 3  ;;  %p9461_p2 = scmp.eq.s32.totalorder %s8955_s10, 0 }
   0x6   : > { %s8888_s12 = smov [#allocation4]   ;;  %s8889_s14 = smov [#allocation7]  }
   0x7   : > { %p8960_p3 = pnand %p5230_p0, %p253_p1  ;;  %s278_s13 = sshll.u32 %s8888_s12, 4  ;;  %s8964_s13 = int_to_ptr.vmem [resolvable:$true] %s278_s13 }
   0x8   : > { %s302_s15 = sshll.u32 %s8889_s14, 4  ;;  %s8890_s17 = smov [#allocation10]   ;;  %s8968_s15 = int_to_ptr.vmem [resolvable:$true] %s302_s15 }
   0x9   : > { %s9463_s11 = scalar_select %p8960_p3, 1, 0 }
   0xa   : > { %p8608_p4 = pneg %p8960_p3  ;;  %s326_s18 = sshll.u32 %s8890_s17, 4  ;;  %s8976_s18 = int_to_ptr.vmem [resolvable:$true] %s326_s18 }
   0xb   : > { %s8891_s19 = smov [#allocation2]   ;;  %s8668_s23 = scalar_lea.hbm %s9454_s3, 2048 }
   0xc   : > { %p8972_p5 = pnand %p9461_p2, %p8608_p4  ;;  %s8978_s20 = sshll.u32 %s8891_s19, 4  ;;  %s266_s20 = int_to_ptr.vmem [resolvable:$true] %s8978_s20 }
   0xd   : > { %p8669_p6 = scmp.ne.s32.totalorder %s9454_s3, %s8668_s23  ;;  %p8675_p10 = scmp.lt.u32.totalorder %s8668_s23, %s9454_s3 }
   0xe   : > { %p8988_p7 = pneg %p8972_p5 }
  0x10   : > { %p8671_p8 = pnand %p8988_p7, %p8669_p6 }
  0x12   : > { %p8672_p9 = pneg %p8671_p8 }
  0x14   : > { %p8677_p11 = pnand %p8675_p10, %p8672_p9 }
  0x16   : > { %8680 = shalt.err (!%p8677_p11)
}
  0x17   : > { %s8681_s29 = scalar_lea.vmem %s8964_s13, 2048  ;;  %p8689_p1 = scmp.lt.s32.totalorder %s8964_s13, %s8964_s13 }
  0x18   : > { %p8682_p12 = scmp.ne.s32.totalorder %s8964_s13, %s8681_s29  ;;  %p8690_p4 = scmp.lt.s32.totalorder %s8681_s29, %s8681_s29 }
  0x1a   : > { %p8684_p13 = pnand %p8682_p12, %p8988_p7  ;;  %p8691_p6 = por %p8690_p4, %p8689_p1 }
  0x1c   : > { %p8685_p0 = pneg %p8684_p13 }
  0x1e   : > { %p8692_p8 = pnand %p8691_p6, %p8685_p0 }
  0x20   : > { %8695 = shalt.err (!%p8692_p8)
}
  0x21   : > { %s8892_s12 = smov 128   ;;  %s8893_s14 = smov 8  }
  0x22   : > { %8614 = dma.hbm_to_vmem [thread:$0]  (!%p8972_p5), %s9454_s3, 2048, %s8964_s13, [#allocation5], %s8892_s12, %s8892_s12, %s8893_s14  }
  0x23   : > { %s8696_s23 = scalar_lea.hbm %s9456_s5, 2048 }
  0x24   : > { %p8697_p9 = scmp.ne.s32.totalorder %s9456_s5, %s8696_s23  ;;  %p8703_p12 = scmp.lt.u32.totalorder %s8696_s23, %s9456_s5 }
  0x26   : > { %p8699_p10 = pnand %p8697_p9, %p8988_p7 }
  0x28   : > { %p8700_p11 = pneg %p8699_p10 }
  0x2a   : > { %p8705_p13 = pnand %p8703_p12, %p8700_p11 }
  0x2c   : > { %8708 = shalt.err (!%p8705_p13)
}
  0x2d   : > { %s8709_s13 = scalar_lea.vmem %s8968_s15, 2048  ;;  %p8717_p6 = scmp.lt.s32.totalorder %s8968_s15, %s8968_s15 }
  0x2e   : > { %p8710_p0 = scmp.ne.s32.totalorder %s8968_s15, %s8709_s13  ;;  %p8718_p8 = scmp.lt.s32.totalorder %s8709_s13, %s8709_s13 }
  0x30   : > { %p8712_p1 = pnand %p8710_p0, %p8988_p7  ;;  %p8719_p9 = por %p8718_p8, %p8717_p6 }
  0x32   : > { %p8713_p4 = pneg %p8712_p1 }
  0x34   : > { %p8720_p10 = pnand %p8719_p9, %p8713_p4 }
  0x36   : > { %8723 = shalt.err (!%p8720_p10)
}
  0x37   : > { %8620 = dma.hbm_to_vmem [thread:$0]  (!%p8972_p5), %s9456_s5, 2048, %s8968_s15, [#allocation8], %s8892_s12, %s8892_s12, %s8893_s14  }
  0x38   : > { %s8724_s22 = scalar_lea.hbm %s9458_s7, 67584 }
  0x39   : > { %p8725_p11 = scmp.ne.s32.totalorder %s9458_s7, %s8724_s22  ;;  %p8731_p0 = scmp.lt.u32.totalorder %s8724_s22, %s9458_s7 }
  0x3b   : > { %p8727_p12 = pnand %p8725_p11, %p8988_p7 }
  0x3d   : > { %p8728_p13 = pneg %p8727_p12 }
  0x3f   : > { %p8733_p1 = pnand %p8731_p0, %p8728_p13 }
  0x41   : > { %8736 = shalt.err (!%p8733_p1)
}
  0x42   : > { %s8737_s15 = scalar_lea.vmem %s8976_s18, 67584  ;;  %p8745_p9 = scmp.lt.s32.totalorder %s8976_s18, %s8976_s18 }
  0x43   : > { %p8738_p4 = scmp.ne.s32.totalorder %s8976_s18, %s8737_s15  ;;  %p8746_p10 = scmp.lt.s32.totalorder %s8737_s15, %s8737_s15 }
  0x45   : > { %p8740_p6 = pnand %p8738_p4, %p8988_p7  ;;  %p8747_p11 = por %p8746_p10, %p8745_p9 }
  0x47   : > { %p8741_p8 = pneg %p8740_p6 }
  0x49   : > { %p8748_p12 = pnand %p8747_p11, %p8741_p8 }
  0x4b   : > { %8751 = shalt.err (!%p8748_p12)
}
  0x4c   : > { %8626 = dma.hbm_to_vmem [thread:$0]  (!%p8972_p5), %s9458_s7, 67584, %s8976_s18, [#allocation11], %s8892_s12, %s8892_s12, %s8893_s14  }
  0x4d   : > { %s8752_s19 = scalar_lea.hbm %s9453_s2, 1024 }
  0x4e   : > { %p8753_p13 = scmp.ne.s32.totalorder %s9453_s2, %s8752_s19  ;;  %p8759_p4 = scmp.lt.u32.totalorder %s8752_s19, %s9453_s2 }
  0x50   : > { %p8755_p0 = pnand %p8753_p13, %p8988_p7 }
  0x52   : > { %p8756_p1 = pneg %p8755_p0 }
  0x54   : > { %p8761_p6 = pnand %p8759_p4, %p8756_p1 }
  0x56   : > { %8764 = shalt.err (!%p8761_p6)
}
  0x57   : > { %s8765_s25 = scalar_lea.vmem %s266_s20, 1024  ;;  %p8773_p11 = scmp.lt.s32.totalorder %s266_s20, %s266_s20 }
  0x58   : > { %p8766_p8 = scmp.ne.s32.totalorder %s266_s20, %s8765_s25  ;;  %p8774_p12 = scmp.lt.s32.totalorder %s8765_s25, %s8765_s25 }
  0x5a   : > { %p8768_p9 = pnand %p8766_p8, %p8988_p7  ;;  %p8775_p2 = por %p8774_p12, %p8773_p11 }
  0x5c   : > { %p8769_p10 = pneg %p8768_p9 }
  0x5e   : > { %p8776_p3 = pnand %p8775_p2, %p8769_p10 }
  0x60   : > { %8779 = shalt.err (!%p8776_p3)
}
  0x61   : > { %8611 = dma.hbm_to_vmem [thread:$0]  (!%p8972_p5), %s9453_s2, 1024, %s266_s20, [#allocation3], %s8892_s12, %s8892_s12, %s8893_s14  }
  0x62   : > { %s8894_s15 = smov [#allocation6]   ;;  %s8895_s13 = smov [#allocation9]  }
  0x63   : > { %s292_s28 = sshll.u32 %s8894_s15, 4  ;;  %s316_s29 = sshll.u32 %s8895_s13, 4  ;;  %s293_s28 = int_to_ptr.vmem [resolvable:$true] %s292_s28  ;;  %s317_s29 = int_to_ptr.vmem [resolvable:$true] %s316_s29 }
  0x64   : > { %s8780_s21 = scalar_lea.hbm %s9455_s4, 16 }
  0x65   : > { %p8781_p2 = scmp.ne.s32.totalorder %s9455_s4, %s8780_s21  ;;  %p8787_p0 = scmp.lt.u32.totalorder %s8780_s21, %s9455_s4 }
  0x67   : > { %p8783_p3 = pnand %p8781_p2, %p8988_p7 }
  0x69   : > { %p8784_p13 = pneg %p8783_p3 }
  0x6b   : > { %p8789_p1 = pnand %p8787_p0, %p8784_p13 }
  0x6d   : > { %8792 = shalt.err (!%p8789_p1)
}
  0x6e   : > { %s8793_s20 = scalar_lea.vmem %s293_s28, 16  ;;  %s8800_s12 = scalar_lea.vmem %s293_s28, 32 }
  0x6f   : > { %p8794_p4 = scmp.ne.s32.totalorder %s293_s28, %s8793_s20  ;;  %p8801_p9 = scmp.lt.s32.totalorder %s293_s28, %s293_s28 }
  0x70   : > { %p8802_p10 = scmp.lt.s32.totalorder %s8800_s12, %s8793_s20 }
  0x71   : > { %p8796_p6 = pnand %p8794_p4, %p8988_p7 }
  0x72   : > { %p8803_p11 = por %p8802_p10, %p8801_p9 }
  0x73   : > { %p8797_p8 = pneg %p8796_p6 }
  0x75   : > { %p8804_p12 = pnand %p8803_p11, %p8797_p8 }
  0x77   : > { %8807 = shalt.err (!%p8804_p12)
}
  0x78   : > { %8617 = dma.hbm_to_vmem [thread:$0]  (!%p8972_p5), %s9455_s4, 16, %s293_s28, [#allocation5]  }
  0x79   : > { %s8808_s13 = scalar_lea.hbm %s9457_s6, 16 }
  0x7a   : > { %p8809_p2 = scmp.ne.s32.totalorder %s9457_s6, %s8808_s13  ;;  %p8815_p0 = scmp.lt.u32.totalorder %s8808_s13, %s9457_s6 }
  0x7c   : > { %p8811_p3 = pnand %p8809_p2, %p8988_p7 }
  0x7e   : > { %p8812_p13 = pneg %p8811_p3 }
  0x80   : > { %p8817_p1 = pnand %p8815_p0, %p8812_p13 }
  0x82   : > { %8820 = shalt.err (!%p8817_p1)
}
  0x83   : > { %s8821_s23 = scalar_lea.vmem %s317_s29, 16  ;;  %s8828_s28 = scalar_lea.vmem %s317_s29, 32 }
  0x84   : > { %p8822_p4 = scmp.ne.s32.totalorder %s317_s29, %s8821_s23  ;;  %p8829_p9 = scmp.lt.s32.totalorder %s317_s29, %s317_s29 }
  0x85   : > { %p8830_p10 = scmp.lt.s32.totalorder %s8828_s28, %s8821_s23 }
  0x86   : > { %p8824_p6 = pnand %p8822_p4, %p8988_p7 }
  0x87   : > { %p8831_p11 = por %p8830_p10, %p8829_p9 }
  0x88   : > { %p8825_p8 = pneg %p8824_p6 }
  0x8a   : > { %p8832_p12 = pnand %p8831_p11, %p8825_p8 }
  0x8c   : > { %8835 = shalt.err (!%p8832_p12)
}
  0x8d   : > { %8623 = dma.hbm_to_vmem [thread:$0]  (!%p8972_p5), %s9457_s6, 16, %s317_s29, [#allocation8]  }
  0x8e   : > { %s8896_s20 = smov [#allocation12]   ;;  %s8836_s27 = scalar_lea.hbm %s9459_s8, 176 }
  0x8f   : > { %s339_s12 = sshll.u32 %s8896_s20, 4  ;;  %p8837_p2 = scmp.ne.s32.totalorder %s9459_s8, %s8836_s27  ;;  %s340_s12 = int_to_ptr.vmem [resolvable:$true] %s339_s12 }
  0x90   : > { %p8843_p0 = scmp.lt.u32.totalorder %s8836_s27, %s9459_s8 }
  0x91   : > { %p8839_p3 = pnand %p8837_p2, %p8988_p7 }
  0x93   : > { %p8840_p13 = pneg %p8839_p3 }
  0x95   : > { %p8845_p1 = pnand %p8843_p0, %p8840_p13 }
  0x97   : > { %8848 = shalt.err (!%p8845_p1)
}
  0x98   : > { %s8849_s29 = scalar_lea.vmem %s340_s12, 176  ;;  %s8856_s21 = scalar_lea.vmem %s340_s12, 192 }
  0x99   : > { %p8850_p4 = scmp.ne.s32.totalorder %s340_s12, %s8849_s29  ;;  %p8857_p9 = scmp.lt.s32.totalorder %s340_s12, %s340_s12 }
  0x9a   : > { %p8858_p10 = scmp.lt.s32.totalorder %s8856_s21, %s8849_s29 }
  0x9b   : > { %p8852_p6 = pnand %p8850_p4, %p8988_p7 }
  0x9c   : > { %p8859_p11 = por %p8858_p10, %p8857_p9 }
  0x9d   : > { %p8853_p8 = pneg %p8852_p6 }
  0x9f   : > { %p8860_p12 = pnand %p8859_p11, %p8853_p8 }
  0xa1   : > { %8863 = shalt.err (!%p8860_p12)
}
  0xa2   : > { %s8897_s22 = smov 16   ;;  %s8898_s23 = smov 1  }
  0xa3   : > { %8629 = dma.hbm_to_vmem [thread:$0]  (!%p8972_p5), %s9459_s8, 176, %s340_s12, [#allocation11], %s8897_s22, %s8897_s22, %s8898_s23  }
  0xa4   : > { %p9466_p2 = scmp.ne.s32.totalorder %s9463_s11, 0 }
  0xa5   : > { %p9467_p7 = scmp.eq.s32.totalorder (!%p9466_p2), %s8955_s10, 0 }
  0xa6   : > { %371 = sbr.rel (%p9466_p2) target bundleno = 3588 (0xe04), region = 56 }
  0xad   : > { %8869 = dma.done.wait (%p9467_p7), [#allocation3], 1024   ;;  %p9468_p3 = pmov %p9467_p7 }
  0xaf   : > { %8871 = vsyncadd (%p9468_p3), [#allocation3], 4294966272  ;;  %p9469_p13 = pmov %p9468_p3 }
  0xb0   : > { %p9470_p0 = pmov %p9468_p3 }
  0xb1   : > { %8873 = dma.done.wait (%p9469_p13), [#allocation5], 2064  }
  0xb2   : > { %8875 = vsyncadd (%p9470_p0), [#allocation5], 4294965232  ;;  %p9471_p1 = pmov %p9470_p0 }
  0xb3   : > { %p9472_p5 = pmov %p9470_p0 }
  0xb4   : > { %8877 = dma.done.wait (%p9471_p1), [#allocation8], 2064  }
  0xb5   : > { %8879 = vsyncadd (%p9472_p5), [#allocation8], 4294965232  ;;  %p9473_p4 = pmov %p9470_p0 }
  0xb6   : > { %p9474_p6 = pmov %p9470_p0 }
  0xb7   : > { %8881 = dma.done.wait (%p9473_p4), [#allocation11], 67760  }
  0xb8   : > { %8883 = vsyncadd (%p9474_p6), [#allocation11], 4294899536  ;;  %p436_p8 = scmp.lt.s32.totalorder %s8955_s10, 1  ;;  %v455_v0 = vld [vmem:[#allocation4] sm:$0xff]  ;;  %v456_v1 = vld [vmem:[#allocation4 + $0x8] sm:$0xff]  ;;  %vm660_vm0 = vcmask 130048  }
  0xb9   : > { %v457_v2 = vld [vmem:[#allocation4 + $0x10] sm:$0xff]  ;;  %v7340_v3 = vpack.c.bf16 %v456_v1, %v455_v0  ;;  %v458_v4 = vld [vmem:[#allocation4 + $0x18] sm:$0xff]  ;;  %v459_v6 = vld [vmem:[#allocation4 + $0x20] sm:$0xff] }
  0xba   : > { %s9476_s10 = smov (!%p436_p8, %s8955_s10), 1  ;;  %v7344_v5 = vpack.c.bf16 %v458_v4, %v457_v2  ;;  %v460_v7 = vld [vmem:[#allocation4 + $0x28] sm:$0xff]  ;;  %v461_v10 = vld [vmem:[#allocation4 + $0x30] sm:$0xff]  ;;  %v462_v11 = vld [vmem:[#allocation4 + $0x38] sm:$0xff] }
  0xbb   : > { %s5306_s11 = sshll.u32 %s9476_s10, 4  ;;  %7341 = vmatprep.subr.bf16.mxu0 %v7340_v3  ;;  %v7348_v8 = vpack.c.bf16 %v460_v7, %v459_v6  ;;  %v759_v13 = vld [vmem:[#allocation10 + $0x80] sm:$0xff]  ;;  %v760_v14 = vld [vmem:[#allocation10 + $0x88] sm:$0xff]  ;;  %v761_v16 = vld [vmem:[#allocation10 + $0x90] sm:$0xff]  ;;  %v7352_v18 = vpack.c.bf16 %v462_v11, %v461_v10  ;;  %s5308_s18 = sshll.u32 %s9476_s10, 6 }
  0xbc   : > { %s9168_s25 = scalar_lea.vmem %s9451_s0, %s5306_s11  ;;  %7343 = vmatpush3.bf16.msra.mxu0 %v7340_v3  ;;  %v7408_v15 = vpack.c.bf16 %v760_v14, %v759_v13  ;;  %v762_v17 = vld [vmem:[#allocation10 + $0x98] sm:$0xff]  ;;  %v763_v20 = vld [vmem:[#allocation10 + $0xa0] sm:$0xff]  ;;  %v764_v23 = vld [vmem:[#allocation10 + $0xa8] sm:$0xff]  ;;  %s445_s14 = scalar_lea.vmem %s9452_s1, %s5306_s11 }
  0xbd   : > { %7345 = vmatprep.subr.bf16.mxu0 %v7344_v5  ;;  %v451_v9 = vld [vmem:[%s9168_s25] sm:$0xff]  ;;  %v7412_v19 = vpack.c.bf16 %v762_v17, %v761_v16  ;;  %v464_v22 = vld [vmem:[#allocation4 + $0x48] sm:$0xff]  ;;  %v7416_v24 = vpack.c.bf16 %v764_v23, %v763_v20  ;;  %v765_v26 = vld [vmem:[#allocation10 + $0xb0] sm:$0xff]  ;;  %s9381_s13 = scalar_lea.vmem %s9460_s9, %s5308_s18 }
  0xbe   : > { %v453_v12 = vmax.f32 %v451_v9, 0.0  ;;  %v463_v21 = vld [vmem:[#allocation4 + $0x40] sm:$0xff]  ;;  %7409 = vmatprep.subr.bf16.mxu1 %v7408_v15  ;;  %v465_v28 = vld [vmem:[#allocation4 + $0x50] sm:$0xff]  ;;  %v466_v29 = vld [vmem:[#allocation4 + $0x58] sm:$0xff] }
  0xbf   : > { %7411 = vmatpush3.bf16.msra.mxu1 %v7408_v15  ;;  %v7356_v25 = vpack.c.bf16 %v464_v22, %v463_v21  ;;  %v766_v27 = vld [vmem:[#allocation10 + $0xb8] sm:$0xff]  ;;  %v7360_v31 = vpack.c.bf16 %v466_v29, %v465_v28  ;;  %v767_v32 = vld [vmem:[#allocation10 + $0xc0] sm:$0xff]  ;;  %v768_v33 = vld [vmem:[#allocation10 + $0xc8] sm:$0xff] }
  0xc0   : > { %7347 = vmatpush3.bf16.msra.mxu0 %v7344_v5  ;;  %6035 = vmatprep.mubr.f32.mxu0 %v453_v12  ;;  %v7420_v30 = vpack.c.bf16 %v766_v27, %v765_v26  ;;  %v467_v34 = vld [vmem:[#allocation4 + $0x60] sm:$0xff]  ;;  %v468_v35 = vld [vmem:[#allocation4 + $0x68] sm:$0xff]  ;;  %v7424_v36 = vpack.c.bf16 %v768_v33, %v767_v32  ;;  %v769_v38 = vld [vmem:[#allocation10 + $0xd0] sm:$0xff] }
  0xc1   : > { %7349 = vmatprep.subr.bf16.mxu0 %v7348_v8  ;;  %7413 = vmatprep.subr.bf16.mxu1 %v7412_v19  ;;  %v7364_v37 = vpack.c.bf16 %v468_v35, %v467_v34  ;;  %v770_v39 = vld [vmem:[#allocation10 + $0xd8] sm:$0xff]  ;;  %v469_v40 = vld [vmem:[#allocation4 + $0x70] sm:$0xff]  ;;  %v771_v44 = vld [vmem:[#allocation10 + $0xe0] sm:$0xff] }
  0xc2   : > { %v470_v41 = vld [vmem:[#allocation4 + $0x78] sm:$0xff]  ;;  %v7428_v42 = vpack.c.bf16 %v770_v39, %v769_v38  ;;  %v772_v45 = vld [vmem:[#allocation10 + $0xe8] sm:$0xff]  ;;  %v557_v46 = vld [vmem:[#allocation7] sm:$0xff] }
  0xc3   : > { %7415 = vmatpush3.bf16.msra.mxu1 %v7412_v19  ;;  %v7368_v43 = vpack.c.bf16 %v470_v41, %v469_v40  ;;  %v558_v47 = vld [vmem:[#allocation7 + $0x8] sm:$0xff]  ;;  %v7432_v49 = vpack.c.bf16 %v772_v45, %v771_v44  ;;  %v559_v51 = vld [vmem:[#allocation7 + $0x10] sm:$0xff]  ;;  %v560_v52 = vld [vmem:[#allocation7 + $0x18] sm:$0xff] }
  0xc4   : > { %7351 = vmatpush3.bf16.msra.mxu0 %v7348_v8  ;;  %7417 = vmatprep.subr.bf16.mxu1 %v7416_v24  ;;  %v452_v48 = vld [vmem:[%s9168_s25 + $0x8] sm:$0xff]  ;;  %v7372_v50 = vpack.c.bf16 %v558_v47, %v557_v46  ;;  %v7376_v54 = vpack.c.bf16 %v560_v52, %v559_v51  ;;  %v563_v58 = vld [vmem:[#allocation7 + $0x30] sm:$0xff]  ;;  %v564_v59 = vld [vmem:[#allocation7 + $0x38] sm:$0xff] }
  0xc5   : > { %7353 = vmatprep.subr.bf16.mxu0 %v7352_v18  ;;  %v454_v53 = vmax.f32 %v452_v48, 0.0  ;;  %v561_v55 = vld [vmem:[#allocation7 + $0x20] sm:$0xff]  ;;  %v562_v56 = vld [vmem:[#allocation7 + $0x28] sm:$0xff]  ;;  %v7384_v60 = vpack.c.bf16 %v564_v59, %v563_v58  ;;  %v567_v0 = vld [vmem:[#allocation7 + $0x50] sm:$0xff] }
  0xc6   : > { %v7380_v57 = vpack.c.bf16 %v562_v56, %v561_v55  ;;  %v565_v61 = vld [vmem:[#allocation7 + $0x40] sm:$0xff]  ;;  %v566_v62 = vld [vmem:[#allocation7 + $0x48] sm:$0xff]  ;;  %v568_v1 = vld [vmem:[#allocation7 + $0x58] sm:$0xff] }
  0xc7   : > { %7419 = vmatpush3.bf16.msra.mxu1 %v7416_v24  ;;  %v7388_v63 = vpack.c.bf16 %v566_v62, %v565_v61  ;;  %v7392_v2 = vpack.c.bf16 %v568_v1, %v567_v0  ;;  %v569_v3 = vld [vmem:[#allocation7 + $0x60] sm:$0xff]  ;;  %v570_v4 = vld [vmem:[#allocation7 + $0x68] sm:$0xff]  ;;  %v571_v7 = vld [vmem:[#allocation7 + $0x70] sm:$0xff] }
  0xc8   : > { %7355 = vmatpush3.bf16.msra.mxu0 %v7352_v18  ;;  %7421 = vmatprep.subr.bf16.mxu1 %v7420_v30  ;;  %v7396_v5 = vpack.c.bf16 %v570_v4, %v569_v3  ;;  %v554_v6 = vld [vmem:[%s445_s14 + $0x8] sm:$0xff]  ;;  %v572_v8 = vld [vmem:[#allocation7 + $0x78] sm:$0xff]  ;;  %v9177_v16 = vld [vmem:[#allocation2 + $0x10] sm:$0xff] }
  0xc9   : > { %7357 = vmatprep.subr.bf16.mxu0 %v7356_v25  ;;  %v7400_v9 = vpack.c.bf16 %v572_v8, %v571_v7  ;;  %v773_v10 = vld [vmem:[#allocation10 + $0xf0] sm:$0xff]  ;;  %v774_v11 = vld [vmem:[#allocation10 + $0xf8] sm:$0xff]  ;;  %v556_v14 = vmax.f32 %v554_v6, 0.0  ;;  %v742_v17 = vld [vmem:[#allocation10] sm:$0xff] }
  0xca   : > { %v7436_v12 = vpack.c.bf16 %v774_v11, %v773_v10  ;;  %v553_v13 = vld [vmem:[%s445_s14] sm:$0xff]  ;;  %v743_v18 = vld [vmem:[#allocation10 + $0x8] sm:$0xff]  ;;  %v9195_v33 = vld [vmem:[#allocation2 + $0x18] sm:$0xff] }
  0xcb   : > { %7423 = vmatpush3.bf16.msra.mxu1 %v7420_v30  ;;  %v555_v15 = vmax.f32 %v553_v13, 0.0  ;;  %v7440_v19 = vpack.c.bf16 %v743_v18, %v742_v17  ;;  %v5253_v20 = vld [vmem:[#allocation6] ss:$0 sm:$0xff]  ;;  %v747_v32 = vld [vmem:[#allocation10 + $0x28] sm:$0xff]  ;;  %v750_v40 = vld [vmem:[#allocation10 + $0x40] sm:$0xff] }
  0xcc   : > { %7359 = vmatpush3.bf16.msra.mxu0 %v7356_v25  ;;  %7425 = vmatprep.subr.bf16.mxu1 %v7424_v36  ;;  %v744_v25 = vld [vmem:[#allocation10 + $0x10] sm:$0xff]  ;;  %v745_v26 = vld [vmem:[#allocation10 + $0x18] sm:$0xff]  ;;  %v9203_v38 = vld [vmem:[#allocation2 + $0x28] sm:$0xff] }
  0xcd   : > { %7361 = vmatprep.subr.bf16.mxu0 %v7360_v31  ;;  %v7444_v29 = vpack.c.bf16 %v745_v26, %v744_v25  ;;  %v9197_v34 = vld [vmem:[#allocation2 + $0x20] sm:$0xff]  ;;  %v751_v41 = vld [vmem:[#allocation10 + $0x48] sm:$0xff]  ;;  %v1016_v3 = vld [vmem:[#allocation10 + $0x130] sm:$0xff] }
  0xce   : > { %v753_v44 = vld [vmem:[#allocation10 + $0x58] sm:$0xff]  ;;  %v754_v46 = vld [vmem:[#allocation10 + $0x60] sm:$0xff]  ;;  %v755_v47 = vld [vmem:[#allocation10 + $0x68] sm:$0xff] }
  0xcf   : > { %7427 = vmatpush3.bf16.msra.mxu1 %v7424_v36  ;;  %v748_v36 = vld [vmem:[#allocation10 + $0x30] sm:$0xff]  ;;  %v7464_v48 = vpack.c.bf16 %v755_v47, %v754_v46  ;;  %v1011_v55 = vld [vmem:[#allocation10 + $0x108] sm:$0xff]  ;;  %v1013_v58 = vld [vmem:[#allocation10 + $0x118] sm:$0xff] }
  0xd0   : > { %7363 = vmatpush3.bf16.msra.mxu0 %v7360_v31  ;;  %7429 = vmatprep.subr.bf16.mxu1 %v7428_v42  ;;  %v746_v31 = vld [vmem:[#allocation10 + $0x20] sm:$0xff]  ;;  %v1017_v4 = vld [vmem:[#allocation10 + $0x138] sm:$0xff]  ;;  %v1019_v7 = vld [vmem:[#allocation10 + $0x148] sm:$0xff] }
  0xd1   : > { %7365 = vmatprep.subr.bf16.mxu0 %v7364_v37  ;;  %v7448_v35 = vpack.c.bf16 %v747_v32, %v746_v31  ;;  %v1014_v62 = vld [vmem:[#allocation10 + $0x120] sm:$0xff]  ;;  %v1021_v10 = vld [vmem:[#allocation10 + $0x158] sm:$0xff]  ;;  %v1023_v13 = vld [vmem:[#allocation10 + $0x168] sm:$0xff] }
  0xd2   : > { %v1018_v6 = vld [vmem:[#allocation10 + $0x140] sm:$0xff]  ;;  %v1024_v17 = vld [vmem:[#allocation10 + $0x170] sm:$0xff]  ;;  %v1025_v18 = vld [vmem:[#allocation10 + $0x178] sm:$0xff] }
  0xd3   : > { %7431 = vmatpush3.bf16.msra.mxu1 %v7428_v42  ;;  %v7456_v42 = vpack.c.bf16 %v751_v41, %v750_v40  ;;  %v7492_v8 = vpack.c.bf16 %v1019_v7, %v1018_v6  ;;  %v1647_v26 = vld [vmem:[#allocation10 + $0x380] sm:$0xff]  ;;  %v1649_v32 = vld [vmem:[#allocation10 + $0x390] sm:$0xff] }
  0xd4   : > { %7367 = vmatpush3.bf16.msra.mxu0 %v7364_v37  ;;  %7433 = vmatprep.subr.bf16.mxu1 %v7432_v49  ;;  %v749_v37 = vld [vmem:[#allocation10 + $0x38] sm:$0xff]  ;;  %v1653_v41 = vld [vmem:[#allocation10 + $0x3b0] sm:$0xff] }
  0xd5   : > { %7369 = vmatprep.subr.bf16.mxu0 %v7368_v43  ;;  %v7452_v39 = vpack.c.bf16 %v749_v37, %v748_v36  ;;  %v1651_v37 = vld [vmem:[#allocation10 + $0x3a0] sm:$0xff]  ;;  %v1657_v47 = vld [vmem:[#allocation10 + $0x3d0] sm:$0xff] }
  0xd6   : > { %v1209_v7 = vld [vmem:[#allocation10 + $0x210] sm:$0xff] }
  0xd7   : > { %7435 = vmatpush3.bf16.msra.mxu1 %v7432_v49  ;;  %v756_v49 = vld [vmem:[#allocation10 + $0x70] sm:$0xff] }
  0xd8   : > { %7371 = vmatpush3.bf16.msra.mxu0 %v7368_v43  ;;  %7437 = vmatprep.subr.bf16.mxu1 %v7436_v12  ;;  %v752_v43 = vld [vmem:[#allocation10 + $0x50] sm:$0xff] }
  0xd9   : > { %7373 = vmatprep.subr.bf16.mxu0 %v7372_v50  ;;  %v7460_v45 = vpack.c.bf16 %v753_v44, %v752_v43  ;;  %v1655_v44 = vld [vmem:[#allocation10 + $0x3c0] sm:$0xff] }
  0xdb   : > { %6036 = vmatmul.mubr.f32.vlgmr.msra.gmra.mrb[0].mxu0 %v454_v53  ;;  %7439 = vmatpush3.bf16.msra.mxu1 %v7436_v12  ;;  %v1022_v12 = vld [vmem:[#allocation10 + $0x160] sm:$0xff] }
  0xdc   : > { %7375 = vmatpush3.bf16.msra.mxu0 %v7372_v50  ;;  %6070 = vmatprep.mubr.f32.mxu0 %v555_v15  ;;  %v757_v50 = vld [vmem:[#allocation10 + $0x78] sm:$0xff]  ;;  %v7500_v15 = vpack.c.bf16 %v1023_v13, %v1022_v12  ;;  %v1213_v13 = vld [vmem:[#allocation10 + $0x230] sm:$0xff] }
  0xdd   : > { %7377 = vmatprep.subr.bf16.mxu0 %v7376_v54  ;;  %7441 = vmatprep.subr.bf16.mxu1 %v7440_v19  ;;  %v7468_v51 = vpack.c.bf16 %v757_v50, %v756_v49  ;;  %v1659_v50 = vld [vmem:[#allocation10 + $0x3e0] sm:$0xff] }
  0xe0   : > { %7379 = vmatpush3.bf16.msra.mxu0 %v7376_v54  ;;  %v1010_v54 = vld [vmem:[#allocation10 + $0x100] sm:$0xff] }
  0xe1   : > { %7381 = vmatprep.subr.bf16.mxu0 %v7380_v57  ;;  %v7476_v56 = vpack.c.bf16 %v1011_v55, %v1010_v54  ;;  %v1662_v54 = vld [vmem:[#allocation10 + $0x3f8] sm:$0xff] }
  0xe4   : > { %7383 = vmatpush3.bf16.msra.mxu0 %v7380_v57  ;;  %v1012_v57 = vld [vmem:[#allocation10 + $0x110] sm:$0xff] }
  0xe5   : > { %7385 = vmatprep.subr.bf16.mxu0 %v7384_v60  ;;  %v7480_v61 = vpack.c.bf16 %v1013_v58, %v1012_v57 }
  0xe8   : > { %7387 = vmatpush3.bf16.msra.mxu0 %v7384_v60 }
  0xe9   : > { %7389 = vmatprep.subr.bf16.mxu0 %v7388_v63 }
  0xec   : > { %7391 = vmatpush3.bf16.msra.mxu0 %v7388_v63  ;;  %v1015_v63 = vld [vmem:[#allocation10 + $0x128] sm:$0xff] }
  0xed   : > { %7393 = vmatprep.subr.bf16.mxu0 %v7392_v2  ;;  %v7484_v1 = vpack.c.bf16 %v1015_v63, %v1014_v62 }
  0xf0   : > { %7395 = vmatpush3.bf16.msra.mxu0 %v7392_v2 }
  0xf1   : > { %7397 = vmatprep.subr.bf16.mxu0 %v7396_v5 }
  0xf4   : > { %7399 = vmatpush3.bf16.msra.mxu0 %v7396_v5  ;;  %v7488_v5 = vpack.c.bf16 %v1017_v4, %v1016_v3  ;;  %v1208_v3 = vld [vmem:[#allocation10 + $0x208] sm:$0xff] }
  0xf5   : > { %7401 = vmatprep.subr.bf16.mxu0 %v7400_v9 }
  0xf8   : > { %7403 = vmatpush3.bf16.msra.mxu0 %v7400_v9  ;;  %v1020_v9 = vld [vmem:[#allocation10 + $0x150] sm:$0xff] }
  0xf9   : > { %v7496_v11 = vpack.c.bf16 %v1021_v10, %v1020_v9  ;;  %v1211_v10 = vld [vmem:[#allocation10 + $0x220] sm:$0xff] }
  0xfb   : > { %6071 = vmatmul.mubr.f32.vlgmr.msra.gmra.mrb[2].mxu0 %v556_v14  ;;  %v5254_v14 = vld [vmem:[#allocation9] ss:$0 sm:$0xff] }
  0xfc   : > { %6077 = vmatprep.mubr.msk.f32.mxu0 %vm660_vm0, %v9177_v16 }
 0x1ae   : > { %v6037_v21 = vpop.f32.mrb[0].mxu0 }
 0x1af   : > { %v9181_v22 = vadd.f32 %v6037_v21, %v5253_v20  ;;  %v544_v23 = vpop.f32.mrb[1].mxu0  ;;  %v7504_v21 = vpack.c.bf16 %v1025_v18, %v1024_v17  ;;  %v1215_v17 = vld [vmem:[#allocation10 + $0x240] sm:$0xff]  ;;  %v1216_v18 = vld [vmem:[#allocation10 + $0x248] sm:$0xff] }
 0x1b0   : > { %v9183_v24 = vadd.f32 %v5253_v20, %v544_v23 }
 0x1b1   : > { %v9186_v27 = vmax.f32 %v9181_v22, 0.0 }
 0x1b2   : > { %v9189_v28 = vmax.f32 %v9183_v24, 0.0 }
 0x1b4   : > { %6112 = vmatprep.mubr.f32.mxu1 %v9189_v28  ;;  %v7404_v30 = vpack.c.bf16 %v9186_v27, %v9189_v28 }
 0x1b5   : > { %6113 = vmatmul.mubr.f32.vlgmr.msra.gmra.mrb[0].mxu1 %v9186_v27 }
 0x1b6   : > { %7405 = vmatprep.subr.bf16.mxu0 %v7404_v30  ;;  %7443 = vmatpush3.bf16.msra.mxu1 %v7440_v19 }
 0x1b7   : > { %7407 = vmatpush3.bf16.msra.mxu0 %v7404_v30  ;;  %7445 = vmatprep.subr.bf16.mxu1 %v7444_v29 }
 0x1b8   : > { %7473 = vmatprep.subr.bf16.mxu0 %v7404_v30 }
 0x1ba   : > { %6078 = vmatmul.mubr.msk.f32.vlgmr.msra.gmra.mrb[4].mxu0 %vm660_vm0, %v9195_v33  ;;  %7447 = vmatpush3.bf16.msra.mxu1 %v7444_v29  ;;  %v1648_v29 = vld [vmem:[#allocation10 + $0x388] sm:$0xff] }
 0x1bb   : > { %7475 = vmatpush3.bf16.msra.mxu0 %v7404_v30  ;;  %6154 = vmatprep.mubr.msk.f32.mxu0 %vm660_vm0, %v9197_v34  ;;  %v7616_v31 = vpack.c.bf16 %v1648_v29, %v1647_v26  ;;  %v1220_v29 = vld [vmem:[#allocation10 + $0x268] sm:$0xff] }
 0x1bc   : > { %7449 = vmatprep.subr.bf16.mxu1 %v7448_v35 }
 0x1be   : > { %6155 = vmatmul.mubr.msk.f32.vlgmr.msra.gmra.mrb[6].mxu0 %vm660_vm0, %v9203_v38  ;;  %7451 = vmatpush3.bf16.msra.mxu1 %v7448_v35  ;;  %v1650_v35 = vld [vmem:[#allocation10 + $0x398] sm:$0xff] }
 0x1bf   : > { %7453 = vmatprep.subr.bf16.mxu1 %v7452_v39  ;;  %6196 = vmatprep.mubr.msk.f32.mxu0 %vm660_vm0, %v9177_v16  ;;  %v7620_v36 = vpack.c.bf16 %v1650_v35, %v1649_v32  ;;  %v1221_v32 = vld [vmem:[#allocation10 + $0x270] sm:$0xff]  ;;  %v1222_v35 = vld [vmem:[#allocation10 + $0x278] sm:$0xff] }
 0x1c2   : > { %7455 = vmatpush3.bf16.msra.mxu1 %v7452_v39  ;;  %v1652_v39 = vld [vmem:[#allocation10 + $0x3a8] sm:$0xff] }
 0x1c3   : > { %7457 = vmatprep.subr.bf16.mxu1 %v7456_v42  ;;  %v7624_v40 = vpack.c.bf16 %v1652_v39, %v1651_v37  ;;  %v1190_v37 = vld [vmem:[#allocation10 + $0x180] sm:$0xff]  ;;  %v1191_v39 = vld [vmem:[#allocation10 + $0x188] sm:$0xff] }
 0x1c6   : > { %7459 = vmatpush3.bf16.msra.mxu1 %v7456_v42  ;;  %v1654_v42 = vld [vmem:[#allocation10 + $0x3b8] sm:$0xff] }
 0x1c7   : > { %7461 = vmatprep.subr.bf16.mxu1 %v7460_v45  ;;  %v7628_v43 = vpack.c.bf16 %v1654_v42, %v1653_v41  ;;  %v1192_v41 = vld [vmem:[#allocation10 + $0x190] sm:$0xff]  ;;  %v1193_v42 = vld [vmem:[#allocation10 + $0x198] sm:$0xff] }
 0x1ca   : > { %7463 = vmatpush3.bf16.msra.mxu1 %v7460_v45  ;;  %v1656_v45 = vld [vmem:[#allocation10 + $0x3c8] sm:$0xff] }
 0x1cb   : > { %7465 = vmatprep.subr.bf16.mxu1 %v7464_v48  ;;  %v7632_v46 = vpack.c.bf16 %v1656_v45, %v1655_v44  ;;  %v1194_v44 = vld [vmem:[#allocation10 + $0x1a0] sm:$0xff]  ;;  %v1195_v45 = vld [vmem:[#allocation10 + $0x1a8] sm:$0xff] }
 0x1ce   : > { %7467 = vmatpush3.bf16.msra.mxu1 %v7464_v48  ;;  %v6072_v52 = vpop.f32.mrb[2].mxu0  ;;  %v1658_v48 = vld [vmem:[#allocation10 + $0x3d8] sm:$0xff] }
 0x1cf   : > { %7469 = vmatprep.subr.bf16.mxu1 %v7468_v51  ;;  %v646_v53 = vpop.f32.mrb[3].mxu0  ;;  %v652_v19 = vadd.f32 %v6072_v52, %v5254_v14  ;;  %v7636_v49 = vpack.c.bf16 %v1658_v48, %v1657_v47  ;;  %v1196_v47 = vld [vmem:[#allocation10 + $0x1b0] sm:$0xff]  ;;  %v1197_v48 = vld [vmem:[#allocation10 + $0x1b8] sm:$0xff] }
 0x1d0   : > { %v647_v20 = vadd.f32 %v5254_v14, %v646_v53  ;;  %v1661_v53 = vld [vmem:[#allocation10 + $0x3f0] sm:$0xff]  ;;  %v1214_v14 = vld [vmem:[#allocation10 + $0x238] sm:$0xff] }
 0x1d1   : > { %v9220_v23 = vmax.f32 %v652_v19, 0.0  ;;  %v7644_v55 = vpack.c.bf16 %v1662_v54, %v1661_v53  ;;  %v7528_v19 = vpack.c.bf16 %v1216_v18, %v1215_v17  ;;  %v1200_v53 = vld [vmem:[#allocation10 + $0x1d0] sm:$0xff]  ;;  %v1201_v54 = vld [vmem:[#allocation10 + $0x1d8] sm:$0xff]  ;;  %v1457_v18 = vld [vmem:[#allocation10 + $0x2c0] sm:$0xff] }
 0x1d2   : > { %7471 = vmatpush3.bf16.msra.mxu1 %v7468_v51  ;;  %v9222_v25 = vmax.f32 %v647_v20, 0.0  ;;  %v1660_v51 = vld [vmem:[#allocation10 + $0x3e8] sm:$0xff]  ;;  %v1217_v20 = vld [vmem:[#allocation10 + $0x250] sm:$0xff] }
 0x1d3   : > { %7477 = vmatprep.subr.bf16.mxu1 %v7476_v56  ;;  %v7640_v52 = vpack.c.bf16 %v1660_v51, %v1659_v50  ;;  %v1198_v50 = vld [vmem:[#allocation10 + $0x1c0] sm:$0xff]  ;;  %v1199_v51 = vld [vmem:[#allocation10 + $0x1c8] sm:$0xff] }
 0x1d4   : > { %v9226_v30 = vpack.c.bf16 %v9220_v23, %v9222_v25 }
 0x28d   : > { %v9209_v59 = vpop.f32.mrb[4].mxu0 }
 0x28e   : > { %v9211_v60 = vpop.f32.mrb[5].mxu0 }
 0x28f   : > { %6147 = vmatprep.mubr.f32.mxu1 %v9211_v60 }
 0x290   : > { %6148 = vmatmul.mubr.f32.vlgmr.msra.gmra.mrb[0].mxu1 %v9209_v59 }
 0x291   : > { %7479 = vmatpush3.bf16.msra.mxu1 %v7476_v56  ;;  %v9215_v0 = vpop.f32.mrb[6].mxu0  ;;  %v5259_v56 = vld [vmem:[#allocation12] ss:$0 sm:$0xff] }
 0x292   : > { %7481 = vmatprep.subr.bf16.mxu1 %v7480_v61  ;;  %v9217_v2 = vpop.f32.mrb[7].mxu0 }
 0x293   : > { %6189 = vmatprep.mubr.f32.mxu1 %v9217_v2 }
 0x295   : > { %7483 = vmatpush3.bf16.msra.mxu1 %v7480_v61 }
 0x296   : > { %7485 = vmatprep.subr.bf16.mxu1 %v7484_v1 }
 0x299   : > { %7487 = vmatpush3.bf16.msra.mxu1 %v7484_v1  ;;  %v1207_v1 = vld [vmem:[#allocation10 + $0x200] sm:$0xff] }
 0x29a   : > { %7489 = vmatprep.subr.bf16.mxu1 %v7488_v5  ;;  %v7512_v6 = vpack.c.bf16 %v1208_v3, %v1207_v1  ;;  %v1449_v1 = vld [vmem:[#allocation10 + $0x280] sm:$0xff]  ;;  %v1450_v3 = vld [vmem:[#allocation10 + $0x288] sm:$0xff] }
 0x29d   : > { %7491 = vmatpush3.bf16.msra.mxu1 %v7488_v5 }
 0x29e   : > { %7493 = vmatprep.subr.bf16.mxu1 %v7492_v8 }
 0x2a1   : > { %7495 = vmatpush3.bf16.msra.mxu1 %v7492_v8  ;;  %v1210_v8 = vld [vmem:[#allocation10 + $0x218] sm:$0xff] }
 0x2a2   : > { %7497 = vmatprep.subr.bf16.mxu1 %v7496_v11  ;;  %v7516_v9 = vpack.c.bf16 %v1210_v8, %v1209_v7  ;;  %v7580_v7 = vpack.c.bf16 %v1450_v3, %v1449_v1  ;;  %v1451_v8 = vld [vmem:[#allocation10 + $0x290] sm:$0xff]  ;;  %v1645_v1 = vld [vmem:[#allocation10 + $0x378] sm:$0xff] }
 0x2a5   : > { %7499 = vmatpush3.bf16.msra.mxu1 %v7496_v11  ;;  %v1212_v11 = vld [vmem:[#allocation10 + $0x228] sm:$0xff] }
 0x2a6   : > { %7501 = vmatprep.subr.bf16.mxu1 %v7500_v15  ;;  %v7520_v12 = vpack.c.bf16 %v1212_v11, %v1211_v10  ;;  %v1453_v11 = vld [vmem:[#allocation10 + $0x2a0] sm:$0xff] }
 0x2a9   : > { %7503 = vmatpush3.bf16.msra.mxu1 %v7500_v15  ;;  %v7524_v15 = vpack.c.bf16 %v1214_v14, %v1213_v13  ;;  %v1455_v14 = vld [vmem:[#allocation10 + $0x2b0] sm:$0xff] }
 0x2aa   : > { %7505 = vmatprep.subr.bf16.mxu1 %v7504_v21 }
 0x2ad   : > { %7507 = vmatpush3.bf16.msra.mxu1 %v7504_v21  ;;  %v1218_v21 = vld [vmem:[#allocation10 + $0x258] sm:$0xff] }
 0x2ae   : > { %7613 = vmatprep.subr.bf16.mxu1 %v9226_v30  ;;  %v7532_v26 = vpack.c.bf16 %v1218_v21, %v1217_v20  ;;  %v1459_v20 = vld [vmem:[#allocation10 + $0x2d0] sm:$0xff]  ;;  %v1460_v21 = vld [vmem:[#allocation10 + $0x2d8] sm:$0xff] }
 0x2b0   : > { %6190 = vmatmul.mubr.f32.vlgmr.msra.gmra.mrb[0].mxu1 %v9215_v0 }
 0x2b1   : > { %7615 = vmatpush3.bf16.msra.mxu1 %v9226_v30  ;;  %6315 = vmatprep.mubr.msk.f32.mxu1 %vm660_vm0, %v9177_v16 }
 0x2b2   : > { %7617 = vmatprep.subr.bf16.mxu1 %v7616_v31 }
 0x2b4   : > { %6316 = vmatmul.mubr.msk.f32.vlgmr.msra.gmra.mrb[2].mxu1 %vm660_vm0, %v9195_v33 }
 0x2b5   : > { %7619 = vmatpush3.bf16.msra.mxu1 %v7616_v31  ;;  %6350 = vmatprep.mubr.f32.mxu1 %v9222_v25 }
 0x2b6   : > { %7621 = vmatprep.subr.bf16.mxu1 %v7620_v36 }
 0x2b9   : > { %7623 = vmatpush3.bf16.msra.mxu1 %v7620_v36  ;;  %v7540_v36 = vpack.c.bf16 %v1222_v35, %v1221_v32  ;;  %v1463_v32 = vld [vmem:[#allocation10 + $0x2f0] sm:$0xff]  ;;  %v1464_v35 = vld [vmem:[#allocation10 + $0x2f8] sm:$0xff] }
 0x2ba   : > { %7625 = vmatprep.subr.bf16.mxu1 %v7624_v40 }
 0x2bd   : > { %7627 = vmatpush3.bf16.msra.mxu1 %v7624_v40  ;;  %v7544_v40 = vpack.c.bf16 %v1191_v39, %v1190_v37  ;;  %v1630_v37 = vld [vmem:[#allocation10 + $0x300] sm:$0xff]  ;;  %v1631_v39 = vld [vmem:[#allocation10 + $0x308] sm:$0xff] }
 0x2be   : > { %7629 = vmatprep.subr.bf16.mxu1 %v7628_v43 }
 0x2c1   : > { %7631 = vmatpush3.bf16.msra.mxu1 %v7628_v43  ;;  %v7548_v43 = vpack.c.bf16 %v1193_v42, %v1192_v41  ;;  %v7648_v42 = vpack.c.bf16 %v1631_v39, %v1630_v37 }
 0x2c2   : > { %7633 = vmatprep.subr.bf16.mxu1 %v7632_v46 }
 0x2c5   : > { %7635 = vmatpush3.bf16.msra.mxu1 %v7632_v46  ;;  %v7552_v46 = vpack.c.bf16 %v1195_v45, %v1194_v44 }
 0x2c6   : > { %7637 = vmatprep.subr.bf16.mxu1 %v7636_v49 }
 0x2c9   : > { %7639 = vmatpush3.bf16.msra.mxu1 %v7636_v49  ;;  %v7556_v49 = vpack.c.bf16 %v1197_v48, %v1196_v47  ;;  %v1635_v47 = vld [vmem:[#allocation10 + $0x328] sm:$0xff] }
 0x2ca   : > { %7641 = vmatprep.subr.bf16.mxu1 %v7640_v52 }
 0x2cd   : > { %7643 = vmatpush3.bf16.msra.mxu1 %v7640_v52  ;;  %v7560_v52 = vpack.c.bf16 %v1199_v51, %v1198_v50  ;;  %v1637_v50 = vld [vmem:[#allocation10 + $0x338] sm:$0xff] }
 0x2ce   : > { %7645 = vmatprep.subr.bf16.mxu1 %v7644_v55 }
 0x2d1   : > { %7647 = vmatpush3.bf16.msra.mxu1 %v7644_v55  ;;  %v7564_v55 = vpack.c.bf16 %v1201_v54, %v1200_v53  ;;  %v1639_v53 = vld [vmem:[#allocation10 + $0x348] sm:$0xff] }
 0x2d2   : > { %7649 = vmatprep.subr.bf16.mxu1 %v7648_v42 }
 0x2d4   : > { %6351 = vmatmul.mubr.f32.vlgmr.msra.gmra.mrb[4].mxu1 %v9220_v23 }
 0x2d5   : > { %7651 = vmatpush3.bf16.msra.mxu1 %v7648_v42  ;;  %v2453_v42 = vld [vmem:[#allocation10 + $0x688] sm:$0xff] }
 0x383   : > { %v6191_v57 = vpop.f32.mrb[0].mxu1 }
 0x384   : > { %v1111_v58 = vadd.f32 %v6191_v57, %v5259_v56  ;;  %v1092_v61 = vpop.f32.mrb[1].mxu1  ;;  %v1203_v57 = vld [vmem:[#allocation10 + $0x1e8] sm:$0xff] }
 0x385   : > { %v1110_v62 = vadd.f32 %v5259_v56, %v1092_v61  ;;  %v1202_v56 = vld [vmem:[#allocation10 + $0x1e0] sm:$0xff]  ;;  %v1204_v61 = vld [vmem:[#allocation10 + $0x1f0] sm:$0xff] }
 0x386   : > { %v1113_v63 = vmax.f32 %v1111_v58, 0.0  ;;  %v7568_v58 = vpack.c.bf16 %v1203_v57, %v1202_v56  ;;  %v1641_v56 = vld [vmem:[#allocation10 + $0x358] sm:$0xff] }
 0x387   : > { %v1112_v4 = vmax.f32 %v1110_v62, 0.0  ;;  %v1205_v62 = vld [vmem:[#allocation10 + $0x1f8] sm:$0xff]  ;;  %v9250_v41 = vpop.f32.mrb[2].mxu1 }
 0x388   : > { %v9252_v44 = vpop.f32.mrb[3].mxu1 }
 0x389   : > { %v9237_v5 = vpack.c.bf16 %v1113_v63, %v1112_v4  ;;  %6385 = vmatprep.mubr.f32.mxu1 %v9252_v44 }
 0x38b   : > { %7509 = vmatprep.subr.bf16.mxu0 %v9237_v5 }
 0x38c   : > { %7511 = vmatpush3.bf16.msra.mxu0 %v9237_v5 }
 0x38d   : > { %7513 = vmatprep.subr.bf16.mxu0 %v7512_v6 }
 0x38f   : > { %6197 = vmatmul.mubr.msk.f32.vlgmr.msra.gmra.mrb[8].mxu0 %vm660_vm0, %v9195_v33  ;;  %v1219_v33 = vld [vmem:[#allocation10 + $0x260] sm:$0xff] }
 0x390   : > { %7515 = vmatpush3.bf16.msra.mxu0 %v7512_v6  ;;  %6231 = vmatprep.mubr.f32.mxu0 %v1112_v4  ;;  %v7536_v31 = vpack.c.bf16 %v1220_v29, %v1219_v33  ;;  %v1461_v33 = vld [vmem:[#allocation10 + $0x2e0] sm:$0xff]  ;;  %v1462_v29 = vld [vmem:[#allocation10 + $0x2e8] sm:$0xff] }
 0x391   : > { %7517 = vmatprep.subr.bf16.mxu0 %v7516_v9 }
 0x394   : > { %7519 = vmatpush3.bf16.msra.mxu0 %v7516_v9  ;;  %v1452_v9 = vld [vmem:[#allocation10 + $0x298] sm:$0xff] }
 0x395   : > { %7521 = vmatprep.subr.bf16.mxu0 %v7520_v12  ;;  %v7584_v10 = vpack.c.bf16 %v1452_v9, %v1451_v8  ;;  %v1891_v8 = vld [vmem:[#allocation10 + $0x410] sm:$0xff]  ;;  %v1892_v9 = vld [vmem:[#allocation10 + $0x418] sm:$0xff] }
 0x398   : > { %7523 = vmatpush3.bf16.msra.mxu0 %v7520_v12  ;;  %v1454_v12 = vld [vmem:[#allocation10 + $0x2a8] sm:$0xff] }
 0x399   : > { %7525 = vmatprep.subr.bf16.mxu0 %v7524_v15  ;;  %v7588_v13 = vpack.c.bf16 %v1454_v12, %v1453_v11  ;;  %v1893_v11 = vld [vmem:[#allocation10 + $0x420] sm:$0xff]  ;;  %v1894_v12 = vld [vmem:[#allocation10 + $0x428] sm:$0xff] }
 0x39c   : > { %7527 = vmatpush3.bf16.msra.mxu0 %v7524_v15  ;;  %v1456_v15 = vld [vmem:[#allocation10 + $0x2b8] sm:$0xff] }
 0x39d   : > { %7529 = vmatprep.subr.bf16.mxu0 %v7528_v19  ;;  %v7592_v17 = vpack.c.bf16 %v1456_v15, %v1455_v14  ;;  %v1895_v14 = vld [vmem:[#allocation10 + $0x430] sm:$0xff]  ;;  %v1896_v15 = vld [vmem:[#allocation10 + $0x438] sm:$0xff] }
 0x3a0   : > { %7531 = vmatpush3.bf16.msra.mxu0 %v7528_v19 }
 0x3a1   : > { %7533 = vmatprep.subr.bf16.mxu0 %v7532_v26 }
 0x3a4   : > { %7535 = vmatpush3.bf16.msra.mxu0 %v7532_v26  ;;  %v7600_v26 = vpack.c.bf16 %v1460_v21, %v1459_v20  ;;  %v1899_v20 = vld [vmem:[#allocation10 + $0x450] sm:$0xff]  ;;  %v1900_v21 = vld [vmem:[#allocation10 + $0x458] sm:$0xff] }
 0x3a5   : > { %7537 = vmatprep.subr.bf16.mxu0 %v7536_v31 }
 0x3a8   : > { %7539 = vmatpush3.bf16.msra.mxu0 %v7536_v31  ;;  %v7604_v31 = vpack.c.bf16 %v1462_v29, %v1461_v33  ;;  %v1901_v33 = vld [vmem:[#allocation10 + $0x460] sm:$0xff]  ;;  %v1902_v29 = vld [vmem:[#allocation10 + $0x468] sm:$0xff] }
 0x3a9   : > { %7541 = vmatprep.subr.bf16.mxu0 %v7540_v36 }
 0x3ac   : > { %7543 = vmatpush3.bf16.msra.mxu0 %v7540_v36  ;;  %v7608_v36 = vpack.c.bf16 %v1464_v35, %v1463_v32  ;;  %v1903_v32 = vld [vmem:[#allocation10 + $0x470] sm:$0xff]  ;;  %v1904_v35 = vld [vmem:[#allocation10 + $0x478] sm:$0xff] }
 0x3ad   : > { %7545 = vmatprep.subr.bf16.mxu0 %v7544_v40 }
 0x3af   : > { %6232 = vmatmul.mubr.f32.vlgmr.msra.gmra.mrb[10].mxu0 %v1113_v63  ;;  %v7572_v63 = vpack.c.bf16 %v1205_v62, %v1204_v61  ;;  %v1643_v61 = vld [vmem:[#allocation10 + $0x368] sm:$0xff] }
 0x3b0   : > { %7547 = vmatpush3.bf16.msra.mxu0 %v7544_v40  ;;  %v1632_v40 = vld [vmem:[#allocation10 + $0x310] sm:$0xff] }
 0x3b1   : > { %7549 = vmatprep.subr.bf16.mxu0 %v7548_v43 }
 0x3b4   : > { %7551 = vmatpush3.bf16.msra.mxu0 %v7548_v43  ;;  %v1633_v43 = vld [vmem:[#allocation10 + $0x318] sm:$0xff] }
 0x3b5   : > { %7553 = vmatprep.subr.bf16.mxu0 %v7552_v46  ;;  %v7652_v45 = vpack.c.bf16 %v1633_v43, %v1632_v40  ;;  %v2452_v40 = vld [vmem:[#allocation10 + $0x680] sm:$0xff] }
 0x3b6   : > { %v7820_v43 = vpack.c.bf16 %v2453_v42, %v2452_v40  ;;  %v2623_v42 = vld [vmem:[#allocation10 + $0x720] sm:$0xff] }
 0x3b7   : > { %7653 = vmatprep.subr.bf16.mxu1 %v7652_v45 }
 0x3b8   : > { %7555 = vmatpush3.bf16.msra.mxu0 %v7552_v46  ;;  %v1634_v46 = vld [vmem:[#allocation10 + $0x320] sm:$0xff]  ;;  %7655 = vmatpush3.bf16.msra.mxu1 %v7652_v45  ;;  %v2454_v45 = vld [vmem:[#allocation10 + $0x690] sm:$0xff] }
 0x3b9   : > { %7557 = vmatprep.subr.bf16.mxu0 %v7556_v49  ;;  %v7656_v48 = vpack.c.bf16 %v1635_v47, %v1634_v46  ;;  %v2455_v46 = vld [vmem:[#allocation10 + $0x698] sm:$0xff] }
 0x3bb   : > { %7657 = vmatprep.subr.bf16.mxu1 %v7656_v48 }
 0x3bc   : > { %7559 = vmatpush3.bf16.msra.mxu0 %v7556_v49  ;;  %v1636_v49 = vld [vmem:[#allocation10 + $0x330] sm:$0xff]  ;;  %7659 = vmatpush3.bf16.msra.mxu1 %v7656_v48 }
 0x3bd   : > { %7561 = vmatprep.subr.bf16.mxu0 %v7560_v52  ;;  %v7660_v51 = vpack.c.bf16 %v1637_v50, %v1636_v49  ;;  %v2457_v49 = vld [vmem:[#allocation10 + $0x6a8] sm:$0xff]  ;;  %v2459_v50 = vld [vmem:[#allocation10 + $0x6b8] sm:$0xff] }
 0x3bf   : > { %7661 = vmatprep.subr.bf16.mxu1 %v7660_v51 }
 0x3c0   : > { %7563 = vmatpush3.bf16.msra.mxu0 %v7560_v52  ;;  %v1638_v52 = vld [vmem:[#allocation10 + $0x340] sm:$0xff]  ;;  %7663 = vmatpush3.bf16.msra.mxu1 %v7660_v51 }
 0x3c1   : > { %7565 = vmatprep.subr.bf16.mxu0 %v7564_v55  ;;  %v7664_v54 = vpack.c.bf16 %v1639_v53, %v1638_v52  ;;  %v2460_v52 = vld [vmem:[#allocation10 + $0x6c0] sm:$0xff]  ;;  %v2461_v53 = vld [vmem:[#allocation10 + $0x6c8] sm:$0xff] }
 0x3c3   : > { %7665 = vmatprep.subr.bf16.mxu1 %v7664_v54 }
 0x3c4   : > { %7567 = vmatpush3.bf16.msra.mxu0 %v7564_v55  ;;  %v1640_v55 = vld [vmem:[#allocation10 + $0x350] sm:$0xff]  ;;  %7667 = vmatpush3.bf16.msra.mxu1 %v7664_v54  ;;  %v7836_v54 = vpack.c.bf16 %v2461_v53, %v2460_v52  ;;  %v2631_v52 = vld [vmem:[#allocation10 + $0x760] sm:$0xff]  ;;  %v2632_v53 = vld [vmem:[#allocation10 + $0x768] sm:$0xff] }
 0x3c5   : > { %7569 = vmatprep.subr.bf16.mxu0 %v7568_v58  ;;  %v7668_v57 = vpack.c.bf16 %v1641_v56, %v1640_v55  ;;  %v2462_v55 = vld [vmem:[#allocation10 + $0x6d0] sm:$0xff]  ;;  %v2463_v56 = vld [vmem:[#allocation10 + $0x6d8] sm:$0xff] }
 0x3c7   : > { %7669 = vmatprep.subr.bf16.mxu1 %v7668_v57 }
 0x3c8   : > { %7571 = vmatpush3.bf16.msra.mxu0 %v7568_v58  ;;  %v1642_v58 = vld [vmem:[#allocation10 + $0x360] sm:$0xff]  ;;  %7671 = vmatpush3.bf16.msra.mxu1 %v7668_v57  ;;  %v7840_v57 = vpack.c.bf16 %v2463_v56, %v2462_v55  ;;  %v2634_v55 = vld [vmem:[#allocation10 + $0x778] sm:$0xff] }
 0x3c9   : > { %7573 = vmatprep.subr.bf16.mxu0 %v7572_v63  ;;  %v7672_v62 = vpack.c.bf16 %v1643_v61, %v1642_v58  ;;  %v2464_v58 = vld [vmem:[#allocation10 + $0x6e0] sm:$0xff]  ;;  %v2465_v61 = vld [vmem:[#allocation10 + $0x6e8] sm:$0xff] }
 0x3cb   : > { %7673 = vmatprep.subr.bf16.mxu1 %v7672_v62 }
 0x3cc   : > { %7575 = vmatpush3.bf16.msra.mxu0 %v7572_v63  ;;  %v1644_v63 = vld [vmem:[#allocation10 + $0x370] sm:$0xff]  ;;  %7675 = vmatpush3.bf16.msra.mxu1 %v7672_v62 }
 0x3cd   : > { %7577 = vmatprep.subr.bf16.mxu0 %v9237_v5  ;;  %v7676_v3 = vpack.c.bf16 %v1645_v1, %v1644_v63  ;;  %v2466_v62 = vld [vmem:[#allocation10 + $0x6f0] sm:$0xff]  ;;  %v2467_v63 = vld [vmem:[#allocation10 + $0x6f8] sm:$0xff] }
 0x3ce   : > { %v7848_v1 = vpack.c.bf16 %v2467_v63, %v2466_v62  ;;  %v3183_v62 = vld [vmem:[#allocation10 + $0x998] sm:$0xff] }
 0x3cf   : > { %7677 = vmatprep.subr.bf16.mxu1 %v7676_v3 }
 0x3d0   : > { %7679 = vmatpush3.bf16.msra.mxu1 %v7676_v3  ;;  %v2435_v3 = vld [vmem:[#allocation10 + $0x600] sm:$0xff] }
 0x3d3   : > { %6386 = vmatmul.mubr.f32.vlgmr.msra.gmra.mrb[4].mxu1 %v9250_v41 }
 0x462   : > { %v6198_v4 = vpop.f32.mrb[8].mxu0 }
 0x463   : > { %v1180_v6 = vpop.f32.mrb[9].mxu0 }
 0x464   : > { %6266 = vmatprep.mubr.f32.mxu0 %v1180_v6  ;;  %v1890_v6 = vld [vmem:[#allocation10 + $0x408] sm:$0xff] }
 0x465   : > { %6267 = vmatmul.mubr.f32.vlgmr.msra.gmra.mrb[10].mxu0 %v6198_v4  ;;  %v1889_v4 = vld [vmem:[#allocation10 + $0x400] sm:$0xff] }
 0x466   : > { %7579 = vmatpush3.bf16.msra.mxu0 %v9237_v5  ;;  %6273 = vmatprep.mubr.msk.f32.mxu0 %vm660_vm0, %v9197_v34  ;;  %v1458_v5 = vld [vmem:[#allocation10 + $0x2c8] sm:$0xff] }
 0x467   : > { %7581 = vmatprep.subr.bf16.mxu0 %v7580_v7  ;;  %v7596_v19 = vpack.c.bf16 %v1458_v5, %v1457_v18  ;;  %v1897_v18 = vld [vmem:[#allocation10 + $0x440] sm:$0xff]  ;;  %v1898_v5 = vld [vmem:[#allocation10 + $0x448] sm:$0xff] }
 0x469   : > { %6274 = vmatmul.mubr.msk.f32.vlgmr.msra.gmra.mrb[12].mxu0 %vm660_vm0, %v9203_v38 }
 0x46a   : > { %7583 = vmatpush3.bf16.msra.mxu0 %v7580_v7  ;;  %v7684_v7 = vpack.c.bf16 %v1890_v6, %v1889_v4  ;;  %v2436_v4 = vld [vmem:[#allocation10 + $0x608] sm:$0xff] }
 0x46b   : > { %7585 = vmatprep.subr.bf16.mxu0 %v7584_v10  ;;  %v7852_v6 = vpack.c.bf16 %v2436_v4, %v2435_v3  ;;  %v3185_v3 = vld [vmem:[#allocation10 + $0x9a8] sm:$0xff] }
 0x46c   : > { %7685 = vmatprep.subr.bf16.mxu1 %v7684_v7 }
 0x46d   : > { %7687 = vmatpush3.bf16.msra.mxu1 %v7684_v7  ;;  %v2437_v7 = vld [vmem:[#allocation10 + $0x610] sm:$0xff] }
 0x46e   : > { %7587 = vmatpush3.bf16.msra.mxu0 %v7584_v10  ;;  %v7688_v10 = vpack.c.bf16 %v1892_v9, %v1891_v8  ;;  %v2438_v8 = vld [vmem:[#allocation10 + $0x618] sm:$0xff] }
 0x46f   : > { %7589 = vmatprep.subr.bf16.mxu0 %v7588_v13  ;;  %v7856_v9 = vpack.c.bf16 %v2438_v8, %v2437_v7  ;;  %v3187_v7 = vld [vmem:[#allocation10 + $0x9b8] sm:$0xff] }
 0x470   : > { %7689 = vmatprep.subr.bf16.mxu1 %v7688_v10 }
 0x471   : > { %7691 = vmatpush3.bf16.msra.mxu1 %v7688_v10  ;;  %v2439_v10 = vld [vmem:[#allocation10 + $0x620] sm:$0xff] }
 0x472   : > { %7591 = vmatpush3.bf16.msra.mxu0 %v7588_v13  ;;  %v7692_v13 = vpack.c.bf16 %v1894_v12, %v1893_v11  ;;  %v2440_v11 = vld [vmem:[#allocation10 + $0x628] sm:$0xff] }
 0x473   : > { %7593 = vmatprep.subr.bf16.mxu0 %v7592_v17  ;;  %v7860_v12 = vpack.c.bf16 %v2440_v11, %v2439_v10  ;;  %v3189_v10 = vld [vmem:[#allocation10 + $0x9c8] sm:$0xff] }
 0x474   : > { %7693 = vmatprep.subr.bf16.mxu1 %v7692_v13 }
 0x475   : > { %7695 = vmatpush3.bf16.msra.mxu1 %v7692_v13  ;;  %v2441_v13 = vld [vmem:[#allocation10 + $0x630] sm:$0xff] }
 0x476   : > { %7595 = vmatpush3.bf16.msra.mxu0 %v7592_v17  ;;  %v7696_v17 = vpack.c.bf16 %v1896_v15, %v1895_v14  ;;  %v2442_v14 = vld [vmem:[#allocation10 + $0x638] sm:$0xff] }
 0x477   : > { %7597 = vmatprep.subr.bf16.mxu0 %v7596_v19  ;;  %v7864_v15 = vpack.c.bf16 %v2442_v14, %v2441_v13  ;;  %v3191_v13 = vld [vmem:[#allocation10 + $0x9d8] sm:$0xff]  ;;  %v3192_v14 = vld [vmem:[#allocation10 + $0x9e0] sm:$0xff] }
 0x478   : > { %7697 = vmatprep.subr.bf16.mxu1 %v7696_v17 }
 0x479   : > { %7699 = vmatpush3.bf16.msra.mxu1 %v7696_v17  ;;  %v2443_v17 = vld [vmem:[#allocation10 + $0x640] sm:$0xff] }
 0x47a   : > { %7599 = vmatpush3.bf16.msra.mxu0 %v7596_v19  ;;  %v7700_v19 = vpack.c.bf16 %v1898_v5, %v1897_v18  ;;  %v2444_v18 = vld [vmem:[#allocation10 + $0x648] sm:$0xff] }
 0x47b   : > { %7601 = vmatprep.subr.bf16.mxu0 %v7600_v26  ;;  %v7868_v5 = vpack.c.bf16 %v2444_v18, %v2443_v17  ;;  %v3194_v18 = vld [vmem:[#allocation10 + $0x9f0] sm:$0xff] }
 0x47c   : > { %7701 = vmatprep.subr.bf16.mxu1 %v7700_v19 }
 0x47d   : > { %7703 = vmatpush3.bf16.msra.mxu1 %v7700_v19  ;;  %v2445_v19 = vld [vmem:[#allocation10 + $0x650] sm:$0xff] }
 0x47e   : > { %7603 = vmatpush3.bf16.msra.mxu0 %v7600_v26  ;;  %v7704_v26 = vpack.c.bf16 %v1900_v21, %v1899_v20  ;;  %v2446_v20 = vld [vmem:[#allocation10 + $0x658] sm:$0xff]  ;;  %v2447_v21 = vld [vmem:[#allocation10 + $0x660] sm:$0xff] }
 0x47f   : > { %7605 = vmatprep.subr.bf16.mxu0 %v7604_v31 }
 0x480   : > { %7705 = vmatprep.subr.bf16.mxu1 %v7704_v26 }
 0x481   : > { %7707 = vmatpush3.bf16.msra.mxu1 %v7704_v26  ;;  %v2448_v26 = vld [vmem:[#allocation10 + $0x668] sm:$0xff] }
 0x482   : > { %7607 = vmatpush3.bf16.msra.mxu0 %v7604_v31  ;;  %v7708_v31 = vpack.c.bf16 %v1902_v29, %v1901_v33  ;;  %v2449_v33 = vld [vmem:[#allocation10 + $0x670] sm:$0xff]  ;;  %v2450_v29 = vld [vmem:[#allocation10 + $0x678] sm:$0xff] }
 0x483   : > { %7609 = vmatprep.subr.bf16.mxu0 %v7608_v36 }
 0x484   : > { %7709 = vmatprep.subr.bf16.mxu1 %v7708_v31 }
 0x485   : > { %7711 = vmatpush3.bf16.msra.mxu1 %v7708_v31  ;;  %v7880_v31 = vpack.c.bf16 %v2450_v29, %v2449_v33  ;;  %v3167_v29 = vld [vmem:[#allocation10 + $0x920] sm:$0xff] }
 0x486   : > { %7611 = vmatpush3.bf16.msra.mxu0 %v7608_v36  ;;  %v7712_v36 = vpack.c.bf16 %v1904_v35, %v1903_v32  ;;  %v2619_v32 = vld [vmem:[#allocation10 + $0x700] sm:$0xff]  ;;  %v2620_v35 = vld [vmem:[#allocation10 + $0x708] sm:$0xff] }
 0x487   : > { %7681 = vmatprep.subr.bf16.mxu0 %v9226_v30 }
 0x488   : > { %7713 = vmatprep.subr.bf16.mxu1 %v7712_v36 }
 0x489   : > { %7715 = vmatpush3.bf16.msra.mxu1 %v7712_v36  ;;  %v7884_v36 = vpack.c.bf16 %v2620_v35, %v2619_v32  ;;  %v3169_v35 = vld [vmem:[#allocation10 + $0x930] sm:$0xff] }
 0x48a   : > { %7821 = vmatprep.subr.bf16.mxu1 %v7820_v43 }
 0x53c   : > { %v6275_v37 = vpop.f32.mrb[12].mxu0 }
 0x53d   : > { %v1439_v39 = vpop.f32.mrb[13].mxu0 }
 0x53e   : > { %6308 = vmatprep.mubr.f32.mxu0 %v1439_v39  ;;  %v2622_v39 = vld [vmem:[#allocation10 + $0x718] sm:$0xff] }
 0x53f   : > { %6309 = vmatmul.mubr.f32.vlgmr.msra.gmra.mrb[10].mxu0 %v6275_v37  ;;  %v2621_v37 = vld [vmem:[#allocation10 + $0x710] sm:$0xff] }
 0x540   : > { %7683 = vmatpush3.bf16.msra.mxu0 %v9226_v30  ;;  %6392 = vmatprep.mubr.msk.f32.mxu0 %vm660_vm0, %v9197_v34  ;;  %v7824_v30 = vpack.c.bf16 %v2455_v46, %v2454_v45  ;;  %v2456_v34 = vld [vmem:[#allocation10 + $0x6a0] sm:$0xff]  ;;  %v7888_v40 = vpack.c.bf16 %v2622_v39, %v2621_v37  ;;  %v2625_v46 = vld [vmem:[#allocation10 + $0x730] sm:$0xff] }
 0x541   : > { %v3171_v39 = vld [vmem:[#allocation10 + $0x940] sm:$0xff] }
 0x543   : > { %6393 = vmatmul.mubr.msk.f32.vlgmr.msra.gmra.mrb[14].mxu0 %vm660_vm0, %v9203_v38  ;;  %v2458_v38 = vld [vmem:[#allocation10 + $0x6b0] sm:$0xff] }
 0x544   : > { %6434 = vmatprep.mubr.msk.f32.mxu0 %vm660_vm0, %v9177_v16  ;;  %v7828_v16 = vpack.c.bf16 %v2457_v49, %v2456_v34  ;;  %v7832_v51 = vpack.c.bf16 %v2459_v50, %v2458_v38  ;;  %v2627_v49 = vld [vmem:[#allocation10 + $0x740] sm:$0xff]  ;;  %v2629_v50 = vld [vmem:[#allocation10 + $0x750] sm:$0xff] }
 0x616   : > { %v9263_v47 = vpop.f32.mrb[14].mxu0 }
 0x617   : > { %v9265_v48 = vpop.f32.mrb[15].mxu0 }
 0x618   : > { %6427 = vmatprep.mubr.f32.mxu1 %v9265_v48 }
 0x619   : > { %6428 = vmatmul.mubr.f32.vlgmr.msra.gmra.mrb[4].mxu1 %v9263_v47 }
 0x61a   : > { %7823 = vmatpush3.bf16.msra.mxu1 %v7820_v43  ;;  %6581 = vmatprep.mubr.f32.mxu1 %v9189_v28  ;;  %v7844_v28 = vpack.c.bf16 %v2465_v61, %v2464_v58  ;;  %v2624_v43 = vld [vmem:[#allocation10 + $0x728] sm:$0xff] }
 0x61b   : > { %7825 = vmatprep.subr.bf16.mxu1 %v7824_v30  ;;  %v7892_v45 = vpack.c.bf16 %v2624_v43, %v2623_v42  ;;  %v3181_v58 = vld [vmem:[#allocation10 + $0x988] sm:$0xff]  ;;  %v3173_v43 = vld [vmem:[#allocation10 + $0x950] sm:$0xff] }
 0x61e   : > { %7827 = vmatpush3.bf16.msra.mxu1 %v7824_v30  ;;  %v2626_v30 = vld [vmem:[#allocation10 + $0x738] sm:$0xff] }
 0x61f   : > { %7829 = vmatprep.subr.bf16.mxu1 %v7828_v16  ;;  %v7896_v34 = vpack.c.bf16 %v2626_v30, %v2625_v46  ;;  %v3175_v30 = vld [vmem:[#allocation10 + $0x960] sm:$0xff] }
 0x622   : > { %7831 = vmatpush3.bf16.msra.mxu1 %v7828_v16  ;;  %v2628_v16 = vld [vmem:[#allocation10 + $0x748] sm:$0xff] }
 0x623   : > { %7833 = vmatprep.subr.bf16.mxu1 %v7832_v51  ;;  %v7900_v38 = vpack.c.bf16 %v2628_v16, %v2627_v49  ;;  %v3177_v16 = vld [vmem:[#allocation10 + $0x970] sm:$0xff] }
 0x626   : > { %7835 = vmatpush3.bf16.msra.mxu1 %v7832_v51  ;;  %v2630_v51 = vld [vmem:[#allocation10 + $0x758] sm:$0xff] }
 0x627   : > { %7837 = vmatprep.subr.bf16.mxu1 %v7836_v54 }
 0x62a   : > { %7839 = vmatpush3.bf16.msra.mxu1 %v7836_v54  ;;  %v2633_v54 = vld [vmem:[#allocation10 + $0x770] sm:$0xff] }
 0x62b   : > { %7841 = vmatprep.subr.bf16.mxu1 %v7840_v57  ;;  %v7912_v56 = vpack.c.bf16 %v2634_v55, %v2633_v54  ;;  %v3351_v55 = vld [vmem:[#allocation10 + $0xa20] sm:$0xff] }
 0x62e   : > { %7843 = vmatpush3.bf16.msra.mxu1 %v7840_v57  ;;  %v3180_v57 = vld [vmem:[#allocation10 + $0x980] sm:$0xff] }
 0x62f   : > { %7845 = vmatprep.subr.bf16.mxu1 %v7844_v28  ;;  %v8020_v61 = vpack.c.bf16 %v3181_v58, %v3180_v57  ;;  %v3353_v58 = vld [vmem:[#allocation10 + $0xa30] sm:$0xff] }
 0x632   : > { %7847 = vmatpush3.bf16.msra.mxu1 %v7844_v28  ;;  %v3182_v28 = vld [vmem:[#allocation10 + $0x990] sm:$0xff] }
 0x633   : > { %7849 = vmatprep.subr.bf16.mxu1 %v7848_v1  ;;  %v8024_v63 = vpack.c.bf16 %v3183_v62, %v3182_v28  ;;  %v3355_v62 = vld [vmem:[#allocation10 + $0xa40] sm:$0xff] }
 0x636   : > { %7851 = vmatpush3.bf16.msra.mxu1 %v7848_v1  ;;  %v3184_v1 = vld [vmem:[#allocation10 + $0x9a0] sm:$0xff] }
 0x637   : > { %7853 = vmatprep.subr.bf16.mxu1 %v7852_v6  ;;  %v8028_v4 = vpack.c.bf16 %v3185_v3, %v3184_v1  ;;  %v3357_v3 = vld [vmem:[#allocation10 + $0xa50] sm:$0xff] }
 0x639   : > { %6582 = vmatmul.mubr.f32.vlgmr.msra.gmra.mrb[6].mxu1 %v9186_v27  ;;  %v7872_v27 = vpack.c.bf16 %v2446_v20, %v2445_v19  ;;  %v3163_v20 = vld [vmem:[#allocation10 + $0x900] sm:$0xff] }
 0x63a   : > { %7855 = vmatpush3.bf16.msra.mxu1 %v7852_v6  ;;  %6616 = vmatprep.mubr.f32.mxu1 %v9211_v60  ;;  %v7876_v60 = vpack.c.bf16 %v2448_v26, %v2447_v21  ;;  %v3186_v6 = vld [vmem:[#allocation10 + $0x9b0] sm:$0xff] }
 0x63b   : > { %7857 = vmatprep.subr.bf16.mxu1 %v7856_v9  ;;  %v8032_v8 = vpack.c.bf16 %v3187_v7, %v3186_v6  ;;  %v3165_v26 = vld [vmem:[#allocation10 + $0x910] sm:$0xff]  ;;  %v3359_v7 = vld [vmem:[#allocation10 + $0xa60] sm:$0xff] }
 0x63e   : > { %7859 = vmatpush3.bf16.msra.mxu1 %v7856_v9  ;;  %v3188_v9 = vld [vmem:[#allocation10 + $0x9c0] sm:$0xff] }
 0x63f   : > { %7861 = vmatprep.subr.bf16.mxu1 %v7860_v12  ;;  %v8036_v11 = vpack.c.bf16 %v3189_v10, %v3188_v9  ;;  %v3361_v10 = vld [vmem:[#allocation10 + $0xa70] sm:$0xff] }
 0x642   : > { %7863 = vmatpush3.bf16.msra.mxu1 %v7860_v12  ;;  %v3190_v12 = vld [vmem:[#allocation10 + $0x9d0] sm:$0xff] }
 0x643   : > { %7865 = vmatprep.subr.bf16.mxu1 %v7864_v15 }
 0x646   : > { %7867 = vmatpush3.bf16.msra.mxu1 %v7864_v15  ;;  %v3193_v15 = vld [vmem:[#allocation10 + $0x9e8] sm:$0xff] }
 0x647   : > { %7869 = vmatprep.subr.bf16.mxu1 %v7868_v5  ;;  %v8044_v17 = vpack.c.bf16 %v3193_v15, %v3192_v14 }
 0x64a   : > { %7871 = vmatpush3.bf16.msra.mxu1 %v7868_v5  ;;  %v3195_v5 = vld [vmem:[#allocation10 + $0x9f8] sm:$0xff] }
 0x64b   : > { %7873 = vmatprep.subr.bf16.mxu1 %v7872_v27  ;;  %v8048_v19 = vpack.c.bf16 %v3195_v5, %v3194_v18 }
 0x64e   : > { %7875 = vmatpush3.bf16.msra.mxu1 %v7872_v27  ;;  %v3164_v27 = vld [vmem:[#allocation10 + $0x908] sm:$0xff] }
 0x64f   : > { %7877 = vmatprep.subr.bf16.mxu1 %v7876_v60  ;;  %v8052_v21 = vpack.c.bf16 %v3164_v27, %v3163_v20  ;;  %v2088_v20 = vld [vmem:[#allocation10 + $0x508] sm:$0xff] }
 0x652   : > { %7879 = vmatpush3.bf16.msra.mxu1 %v7876_v60  ;;  %v3166_v60 = vld [vmem:[#allocation10 + $0x918] sm:$0xff] }
 0x653   : > { %7881 = vmatprep.subr.bf16.mxu1 %v7880_v31  ;;  %v8056_v33 = vpack.c.bf16 %v3166_v60, %v3165_v26  ;;  %v2089_v60 = vld [vmem:[#allocation10 + $0x510] sm:$0xff] }
 0x656   : > { %7883 = vmatpush3.bf16.msra.mxu1 %v7880_v31  ;;  %v3168_v31 = vld [vmem:[#allocation10 + $0x928] sm:$0xff] }
 0x657   : > { %7885 = vmatprep.subr.bf16.mxu1 %v7884_v36  ;;  %v8060_v32 = vpack.c.bf16 %v3168_v31, %v3167_v29  ;;  %v2091_v31 = vld [vmem:[#allocation10 + $0x520] sm:$0xff] }
 0x659   : > { %6617 = vmatmul.mubr.f32.vlgmr.msra.gmra.mrb[6].mxu1 %v9209_v59  ;;  %v7904_v59 = vpack.c.bf16 %v2630_v51, %v2629_v50  ;;  %v3347_v51 = vld [vmem:[#allocation10 + $0xa00] sm:$0xff] }
 0x65a   : > { %7887 = vmatpush3.bf16.msra.mxu1 %v7884_v36  ;;  %6651 = vmatprep.mubr.f32.mxu1 %v9217_v2  ;;  %v7908_v2 = vpack.c.bf16 %v2632_v53, %v2631_v52  ;;  %v3170_v36 = vld [vmem:[#allocation10 + $0x938] sm:$0xff]  ;;  %v3349_v53 = vld [vmem:[#allocation10 + $0xa10] sm:$0xff] }
 0x65b   : > { %7889 = vmatprep.subr.bf16.mxu1 %v7888_v40  ;;  %v8064_v37 = vpack.c.bf16 %v3170_v36, %v3169_v35  ;;  %v9289_v35 = vld [vmem:[#allocation2 + $0x18] sm:$0xff] }
 0x65e   : > { %7891 = vmatpush3.bf16.msra.mxu1 %v7888_v40  ;;  %v3172_v40 = vld [vmem:[#allocation10 + $0x948] sm:$0xff] }
 0x65f   : > { %7893 = vmatprep.subr.bf16.mxu1 %v7892_v45  ;;  %v8068_v42 = vpack.c.bf16 %v3172_v40, %v3171_v39  ;;  %v2094_v39 = vld [vmem:[#allocation10 + $0x538] sm:$0xff] }
 0x662   : > { %7895 = vmatpush3.bf16.msra.mxu1 %v7892_v45  ;;  %v3174_v45 = vld [vmem:[#allocation10 + $0x958] sm:$0xff] }
 0x663   : > { %7897 = vmatprep.subr.bf16.mxu1 %v7896_v34  ;;  %v8072_v46 = vpack.c.bf16 %v3174_v45, %v3173_v43  ;;  %v2096_v43 = vld [vmem:[#allocation10 + $0x548] sm:$0xff] }
 0x666   : > { %7899 = vmatpush3.bf16.msra.mxu1 %v7896_v34  ;;  %v3176_v34 = vld [vmem:[#allocation10 + $0x968] sm:$0xff] }
 0x667   : > { %7901 = vmatprep.subr.bf16.mxu1 %v7900_v38  ;;  %v8076_v49 = vpack.c.bf16 %v3176_v34, %v3175_v30  ;;  %v2098_v30 = vld [vmem:[#allocation10 + $0x558] sm:$0xff] }
 0x66a   : > { %7903 = vmatpush3.bf16.msra.mxu1 %v7900_v38  ;;  %v3178_v38 = vld [vmem:[#allocation10 + $0x978] sm:$0xff] }
 0x66b   : > { %7905 = vmatprep.subr.bf16.mxu1 %v7904_v59  ;;  %v8080_v50 = vpack.c.bf16 %v3178_v38, %v3177_v16  ;;  %v2100_v16 = vld [vmem:[#allocation10 + $0x568] sm:$0xff] }
 0x66e   : > { %7907 = vmatpush3.bf16.msra.mxu1 %v7904_v59  ;;  %v3348_v59 = vld [vmem:[#allocation10 + $0xa08] sm:$0xff] }
 0x66f   : > { %7909 = vmatprep.subr.bf16.mxu1 %v7908_v2  ;;  %v8084_v52 = vpack.c.bf16 %v3348_v59, %v3347_v51  ;;  %v2102_v51 = vld [vmem:[#allocation10 + $0x578] sm:$0xff] }
 0x672   : > { %7911 = vmatpush3.bf16.msra.mxu1 %v7908_v2  ;;  %v3350_v2 = vld [vmem:[#allocation10 + $0xa18] sm:$0xff] }
 0x673   : > { %7913 = vmatprep.subr.bf16.mxu1 %v7912_v56  ;;  %v8088_v54 = vpack.c.bf16 %v3350_v2, %v3349_v53  ;;  %v2071_v53 = vld [vmem:[#allocation10 + $0x488] sm:$0xff] }
 0x676   : > { %7915 = vmatpush3.bf16.msra.mxu1 %v7912_v56  ;;  %v3352_v56 = vld [vmem:[#allocation10 + $0xa28] sm:$0xff] }
 0x677   : > { %8021 = vmatprep.subr.bf16.mxu1 %v8020_v61  ;;  %v8092_v57 = vpack.c.bf16 %v3352_v56, %v3351_v55  ;;  %v2073_v55 = vld [vmem:[#allocation10 + $0x498] sm:$0xff] }
 0x679   : > { %6652 = vmatmul.mubr.f32.vlgmr.msra.gmra.mrb[6].mxu1 %v9215_v0  ;;  %v8040_v0 = vpack.c.bf16 %v3191_v13, %v3190_v12  ;;  %v9281_v13 = vld [vmem:[#allocation2 + $0x20] sm:$0xff] }
 0x67a   : > { %8023 = vmatpush3.bf16.msra.mxu1 %v8020_v61  ;;  %6805 = vmatprep.mubr.f32.mxu1 %v9222_v25  ;;  %v3354_v61 = vld [vmem:[#allocation10 + $0xa38] sm:$0xff] }
 0x67b   : > { %8025 = vmatprep.subr.bf16.mxu1 %v8024_v63  ;;  %v8096_v28 = vpack.c.bf16 %v3354_v61, %v3353_v58  ;;  %v2075_v58 = vld [vmem:[#allocation10 + $0x4a8] sm:$0xff] }
 0x67e   : > { %8027 = vmatpush3.bf16.msra.mxu1 %v8024_v63  ;;  %v3356_v63 = vld [vmem:[#allocation10 + $0xa48] sm:$0xff] }
 0x67f   : > { %8029 = vmatprep.subr.bf16.mxu1 %v8028_v4  ;;  %v8100_v1 = vpack.c.bf16 %v3356_v63, %v3355_v62  ;;  %v2077_v62 = vld [vmem:[#allocation10 + $0x4b8] sm:$0xff] }
 0x682   : > { %8031 = vmatpush3.bf16.msra.mxu1 %v8028_v4  ;;  %v3358_v4 = vld [vmem:[#allocation10 + $0xa58] sm:$0xff] }
 0x683   : > { %8033 = vmatprep.subr.bf16.mxu1 %v8032_v8  ;;  %v8104_v6 = vpack.c.bf16 %v3358_v4, %v3357_v3  ;;  %v2079_v3 = vld [vmem:[#allocation10 + $0x4c8] sm:$0xff] }
 0x686   : > { %8035 = vmatpush3.bf16.msra.mxu1 %v8032_v8  ;;  %v3360_v8 = vld [vmem:[#allocation10 + $0xa68] sm:$0xff] }
 0x687   : > { %8037 = vmatprep.subr.bf16.mxu1 %v8036_v11  ;;  %v8108_v9 = vpack.c.bf16 %v3360_v8, %v3359_v7  ;;  %v2081_v7 = vld [vmem:[#allocation10 + $0x4d8] sm:$0xff] }
 0x68a   : > { %8039 = vmatpush3.bf16.msra.mxu1 %v8036_v11  ;;  %v3362_v11 = vld [vmem:[#allocation10 + $0xa78] sm:$0xff] }
 0x68b   : > { %8041 = vmatprep.subr.bf16.mxu1 %v8040_v0  ;;  %v8112_v12 = vpack.c.bf16 %v3362_v11, %v3361_v10  ;;  %v2083_v10 = vld [vmem:[#allocation10 + $0x4e8] sm:$0xff] }
 0x68e   : > { %8043 = vmatpush3.bf16.msra.mxu1 %v8040_v0  ;;  %v5269_v0 = vld [vmem:[#allocation12 + $0x2] ss:$0 sm:$0xff] }
 0x68f   : > { %8045 = vmatprep.subr.bf16.mxu1 %v8044_v17 }
 0x692   : > { %8047 = vmatpush3.bf16.msra.mxu1 %v8044_v17 }
 0x693   : > { %8049 = vmatprep.subr.bf16.mxu1 %v8048_v19 }
 0x696   : > { %8051 = vmatpush3.bf16.msra.mxu1 %v8048_v19  ;;  %v2087_v19 = vld [vmem:[#allocation10 + $0x500] sm:$0xff] }
 0x697   : > { %8053 = vmatprep.subr.bf16.mxu1 %v8052_v21  ;;  %v7720_v26 = vpack.c.bf16 %v2088_v20, %v2087_v19 }
 0x699   : > { %6806 = vmatmul.mubr.f32.vlgmr.msra.gmra.mrb[8].mxu1 %v9220_v23 }
 0x69a   : > { %8055 = vmatpush3.bf16.msra.mxu1 %v8052_v21  ;;  %6840 = vmatprep.mubr.f32.mxu1 %v9252_v44 }
 0x69b   : > { %8057 = vmatprep.subr.bf16.mxu1 %v8056_v33 }
 0x69e   : > { %8059 = vmatpush3.bf16.msra.mxu1 %v8056_v33  ;;  %v2090_v33 = vld [vmem:[#allocation10 + $0x518] sm:$0xff] }
 0x69f   : > { %8061 = vmatprep.subr.bf16.mxu1 %v8060_v32  ;;  %v7724_v29 = vpack.c.bf16 %v2090_v33, %v2089_v60  ;;  %v3910_v60 = vld [vmem:[#allocation10 + $0xc80] sm:$0xff]  ;;  %v3911_v33 = vld [vmem:[#allocation10 + $0xc88] sm:$0xff] }
 0x6a2   : > { %8063 = vmatpush3.bf16.msra.mxu1 %v8060_v32  ;;  %v2092_v32 = vld [vmem:[#allocation10 + $0x528] sm:$0xff] }
 0x6a3   : > { %8065 = vmatprep.subr.bf16.mxu1 %v8064_v37  ;;  %v7728_v36 = vpack.c.bf16 %v2092_v32, %v2091_v31  ;;  %v8220_v32 = vpack.c.bf16 %v3911_v33, %v3910_v60  ;;  %v2338_v60 = vld [vmem:[#allocation10 + $0x5c8] sm:$0xff] }
 0x6a6   : > { %8067 = vmatpush3.bf16.msra.mxu1 %v8064_v37  ;;  %v2093_v37 = vld [vmem:[#allocation10 + $0x530] sm:$0xff] }
 0x6a7   : > { %8069 = vmatprep.subr.bf16.mxu1 %v8068_v42  ;;  %v7732_v40 = vpack.c.bf16 %v2094_v39, %v2093_v37  ;;  %v3913_v37 = vld [vmem:[#allocation10 + $0xc98] sm:$0xff] }
 0x6aa   : > { %8071 = vmatpush3.bf16.msra.mxu1 %v8068_v42  ;;  %v2095_v42 = vld [vmem:[#allocation10 + $0x540] sm:$0xff] }
 0x6ab   : > { %8073 = vmatprep.subr.bf16.mxu1 %v8072_v46  ;;  %v7736_v45 = vpack.c.bf16 %v2096_v43, %v2095_v42  ;;  %v3915_v42 = vld [vmem:[#allocation10 + $0xca8] sm:$0xff] }
 0x6ac   : > { %v9312_v43 = vld [vmem:[#allocation2 + $0x28] sm:$0xff] }
 0x6ae   : > { %8075 = vmatpush3.bf16.msra.mxu1 %v8072_v46  ;;  %v2097_v46 = vld [vmem:[#allocation10 + $0x550] sm:$0xff] }
 0x6af   : > { %8077 = vmatprep.subr.bf16.mxu1 %v8076_v49  ;;  %v7740_v34 = vpack.c.bf16 %v2098_v30, %v2097_v46  ;;  %v3916_v46 = vld [vmem:[#allocation10 + $0xcb0] sm:$0xff]  ;;  %v3917_v30 = vld [vmem:[#allocation10 + $0xcb8] sm:$0xff] }
 0x6b2   : > { %8079 = vmatpush3.bf16.msra.mxu1 %v8076_v49  ;;  %v2099_v49 = vld [vmem:[#allocation10 + $0x560] sm:$0xff] }
 0x6b3   : > { %8081 = vmatprep.subr.bf16.mxu1 %v8080_v50  ;;  %v7744_v38 = vpack.c.bf16 %v2100_v16, %v2099_v49  ;;  %v3918_v49 = vld [vmem:[#allocation10 + $0xcc0] sm:$0xff]  ;;  %v3919_v16 = vld [vmem:[#allocation10 + $0xcc8] sm:$0xff] }
 0x6b6   : > { %8083 = vmatpush3.bf16.msra.mxu1 %v8080_v50  ;;  %v2101_v50 = vld [vmem:[#allocation10 + $0x570] sm:$0xff] }
 0x6b7   : > { %8085 = vmatprep.subr.bf16.mxu1 %v8084_v52  ;;  %v7748_v59 = vpack.c.bf16 %v2102_v51, %v2101_v50  ;;  %v3920_v50 = vld [vmem:[#allocation10 + $0xcd0] sm:$0xff]  ;;  %v3921_v51 = vld [vmem:[#allocation10 + $0xcd8] sm:$0xff] }
 0x6b9   : > { %6841 = vmatmul.mubr.f32.vlgmr.msra.gmra.mrb[8].mxu1 %v9250_v41 }
 0x6ba   : > { %8087 = vmatpush3.bf16.msra.mxu1 %v8084_v52  ;;  %6875 = vmatprep.mubr.f32.mxu1 %v9265_v48  ;;  %v2070_v52 = vld [vmem:[#allocation10 + $0x480] sm:$0xff] }
 0x6bb   : > { %8089 = vmatprep.subr.bf16.mxu1 %v8088_v54  ;;  %v7752_v2 = vpack.c.bf16 %v2071_v53, %v2070_v52  ;;  %v3922_v52 = vld [vmem:[#allocation10 + $0xce0] sm:$0xff]  ;;  %v3923_v53 = vld [vmem:[#allocation10 + $0xce8] sm:$0xff] }
 0x6be   : > { %8091 = vmatpush3.bf16.msra.mxu1 %v8088_v54  ;;  %v2072_v54 = vld [vmem:[#allocation10 + $0x490] sm:$0xff] }
 0x6bf   : > { %8093 = vmatprep.subr.bf16.mxu1 %v8092_v57  ;;  %v7756_v56 = vpack.c.bf16 %v2073_v55, %v2072_v54  ;;  %v8244_v54 = vpack.c.bf16 %v3923_v53, %v3922_v52 }
 0x6c2   : > { %8095 = vmatpush3.bf16.msra.mxu1 %v8092_v57  ;;  %v2074_v57 = vld [vmem:[#allocation10 + $0x4a0] sm:$0xff] }
 0x6c3   : > { %8097 = vmatprep.subr.bf16.mxu1 %v8096_v28  ;;  %v7760_v61 = vpack.c.bf16 %v2075_v58, %v2074_v57  ;;  %v3925_v57 = vld [vmem:[#allocation10 + $0xcf8] sm:$0xff] }
 0x6c6   : > { %8099 = vmatpush3.bf16.msra.mxu1 %v8096_v28  ;;  %v2076_v28 = vld [vmem:[#allocation10 + $0x4b0] sm:$0xff] }
 0x6c7   : > { %8101 = vmatprep.subr.bf16.mxu1 %v8100_v1  ;;  %v7764_v63 = vpack.c.bf16 %v2077_v62, %v2076_v28  ;;  %v2331_v28 = vld [vmem:[#allocation10 + $0x590] sm:$0xff]  ;;  %v2332_v62 = vld [vmem:[#allocation10 + $0x598] sm:$0xff] }
 0x6ca   : > { %8103 = vmatpush3.bf16.msra.mxu1 %v8100_v1  ;;  %v2078_v1 = vld [vmem:[#allocation10 + $0x4c0] sm:$0xff] }
 0x6cb   : > { %8105 = vmatprep.subr.bf16.mxu1 %v8104_v6  ;;  %v7768_v4 = vpack.c.bf16 %v2079_v3, %v2078_v1  ;;  %v3893_v1 = vld [vmem:[#allocation10 + $0xc00] sm:$0xff]  ;;  %v3894_v3 = vld [vmem:[#allocation10 + $0xc08] sm:$0xff] }
 0x6ce   : > { %8107 = vmatpush3.bf16.msra.mxu1 %v8104_v6  ;;  %v2080_v6 = vld [vmem:[#allocation10 + $0x4d0] sm:$0xff] }
 0x6cf   : > { %8109 = vmatprep.subr.bf16.mxu1 %v8108_v9  ;;  %v7772_v8 = vpack.c.bf16 %v2081_v7, %v2080_v6  ;;  %v2333_v6 = vld [vmem:[#allocation10 + $0x5a0] sm:$0xff]  ;;  %v2334_v7 = vld [vmem:[#allocation10 + $0x5a8] sm:$0xff] }
 0x6d2   : > { %8111 = vmatpush3.bf16.msra.mxu1 %v8108_v9  ;;  %v2082_v9 = vld [vmem:[#allocation10 + $0x4e0] sm:$0xff] }
 0x6d3   : > { %8113 = vmatprep.subr.bf16.mxu1 %v8112_v12  ;;  %v7776_v11 = vpack.c.bf16 %v2083_v10, %v2082_v9  ;;  %v3895_v9 = vld [vmem:[#allocation10 + $0xc10] sm:$0xff]  ;;  %v3896_v10 = vld [vmem:[#allocation10 + $0xc18] sm:$0xff] }
 0x6d6   : > { %8115 = vmatpush3.bf16.msra.mxu1 %v8112_v12  ;;  %v2084_v12 = vld [vmem:[#allocation10 + $0x4f0] sm:$0xff] }
 0x6d9   : > { %6876 = vmatmul.mubr.f32.vlgmr.msra.gmra.mrb[8].mxu1 %v9263_v47 }
 0x6da   : > { %6959 = vmatprep.mubr.msk.f32.mxu1 %vm660_vm0, %v9281_v13 }
 0x6ec   : > { %v6429_v14 = vpop.f32.mrb[4].mxu1 }
 0x6ed   : > { %v1991_v15 = vadd.f32 %v6429_v14, %v5269_v0  ;;  %v1971_v17 = vpop.f32.mrb[5].mxu1 }
 0x6ee   : > { %v1990_v18 = vadd.f32 %v5269_v0, %v1971_v17  ;;  %v2085_v0 = vld [vmem:[#allocation10 + $0x4f8] sm:$0xff] }
 0x6ef   : > { %v1993_v5 = vmax.f32 %v1991_v15, 0.0  ;;  %v7780_v14 = vpack.c.bf16 %v2085_v0, %v2084_v12  ;;  %v2336_v12 = vld [vmem:[#allocation10 + $0x5b8] sm:$0xff]  ;;  %v8256_v0 = vpack.c.bf16 %v3896_v10, %v3895_v9  ;;  %v4083_v10 = vld [vmem:[#allocation10 + $0xd30] sm:$0xff] }
 0x6f0   : > { %v1992_v27 = vmax.f32 %v1990_v18, 0.0  ;;  %v5281_v18 = vld [vmem:[#allocation12 + $0x6] ss:$0 sm:$0xff] }
 0x6f2   : > { %v9285_v21 = vpack.c.bf16 %v1993_v5, %v1992_v27 }
 0x6f4   : > { %7717 = vmatprep.subr.bf16.mxu0 %v9285_v21 }
 0x6f5   : > { %7719 = vmatpush3.bf16.msra.mxu0 %v9285_v21 }
 0x6f6   : > { %7721 = vmatprep.subr.bf16.mxu0 %v7720_v26 }
 0x6f8   : > { %6435 = vmatmul.mubr.msk.f32.vlgmr.msra.gmra.mrb[16].mxu0 %vm660_vm0, %v9289_v35 }
 0x6f9   : > { %7723 = vmatpush3.bf16.msra.mxu0 %v7720_v26  ;;  %6469 = vmatprep.mubr.f32.mxu0 %v1992_v27 }
 0x6fa   : > { %7725 = vmatprep.subr.bf16.mxu0 %v7724_v29 }
 0x6fd   : > { %7727 = vmatpush3.bf16.msra.mxu0 %v7724_v29 }
 0x6fe   : > { %7729 = vmatprep.subr.bf16.mxu0 %v7728_v36 }
 0x701   : > { %7731 = vmatpush3.bf16.msra.mxu0 %v7728_v36  ;;  %v3912_v36 = vld [vmem:[#allocation10 + $0xc90] sm:$0xff] }
 0x702   : > { %7733 = vmatprep.subr.bf16.mxu0 %v7732_v40  ;;  %v8224_v39 = vpack.c.bf16 %v3913_v37, %v3912_v36  ;;  %v3900_v36 = vld [vmem:[#allocation10 + $0xc38] sm:$0xff] }
 0x705   : > { %7735 = vmatpush3.bf16.msra.mxu0 %v7732_v40  ;;  %v3914_v40 = vld [vmem:[#allocation10 + $0xca0] sm:$0xff] }
 0x706   : > { %7737 = vmatprep.subr.bf16.mxu0 %v7736_v45 }
 0x709   : > { %7739 = vmatpush3.bf16.msra.mxu0 %v7736_v45  ;;  %v8228_v45 = vpack.c.bf16 %v3915_v42, %v3914_v40  ;;  %v2340_v40 = vld [vmem:[#allocation10 + $0x5d8] sm:$0xff] }
 0x70a   : > { %7741 = vmatprep.subr.bf16.mxu0 %v7740_v34 }
 0x70d   : > { %7743 = vmatpush3.bf16.msra.mxu0 %v7740_v34  ;;  %v8232_v34 = vpack.c.bf16 %v3917_v30, %v3916_v46  ;;  %v2342_v30 = vld [vmem:[#allocation10 + $0x5e8] sm:$0xff] }
 0x70e   : > { %7745 = vmatprep.subr.bf16.mxu0 %v7744_v38 }
 0x711   : > { %7747 = vmatpush3.bf16.msra.mxu0 %v7744_v38  ;;  %v8236_v38 = vpack.c.bf16 %v3919_v16, %v3918_v49  ;;  %v5275_v49 = vld [vmem:[#allocation12 + $0x4] ss:$0 sm:$0xff]  ;;  %v3903_v16 = vld [vmem:[#allocation10 + $0xc50] sm:$0xff] }
 0x712   : > { %7749 = vmatprep.subr.bf16.mxu0 %v7748_v59 }
 0x715   : > { %7751 = vmatpush3.bf16.msra.mxu0 %v7748_v59  ;;  %v8240_v59 = vpack.c.bf16 %v3921_v51, %v3920_v50  ;;  %v2343_v51 = vld [vmem:[#allocation10 + $0x5f0] sm:$0xff] }
 0x716   : > { %7753 = vmatprep.subr.bf16.mxu0 %v7752_v2 }
 0x718   : > { %6470 = vmatmul.mubr.f32.vlgmr.msra.gmra.mrb[10].mxu0 %v1993_v5 }
 0x719   : > { %7755 = vmatpush3.bf16.msra.mxu0 %v7752_v2  ;;  %v2330_v2 = vld [vmem:[#allocation10 + $0x588] sm:$0xff] }
 0x71a   : > { %7757 = vmatprep.subr.bf16.mxu0 %v7756_v56 }
 0x71d   : > { %7759 = vmatpush3.bf16.msra.mxu0 %v7756_v56  ;;  %v3924_v56 = vld [vmem:[#allocation10 + $0xcf0] sm:$0xff] }
 0x71e   : > { %7761 = vmatprep.subr.bf16.mxu0 %v7760_v61 }
 0x721   : > { %7763 = vmatpush3.bf16.msra.mxu0 %v7760_v61 }
 0x722   : > { %7765 = vmatprep.subr.bf16.mxu0 %v7764_v63 }
 0x725   : > { %7767 = vmatpush3.bf16.msra.mxu0 %v7764_v63  ;;  %v8248_v63 = vpack.c.bf16 %v3925_v57, %v3924_v56 }
 0x726   : > { %7769 = vmatprep.subr.bf16.mxu0 %v7768_v4 }
 0x729   : > { %7771 = vmatpush3.bf16.msra.mxu0 %v7768_v4  ;;  %v7792_v4 = vpack.c.bf16 %v2332_v62, %v2331_v28  ;;  %v4077_v62 = vld [vmem:[#allocation10 + $0xd00] sm:$0xff] }
 0x72a   : > { %7773 = vmatprep.subr.bf16.mxu0 %v7772_v8 }
 0x72d   : > { %7775 = vmatpush3.bf16.msra.mxu0 %v7772_v8  ;;  %v8252_v8 = vpack.c.bf16 %v3894_v3, %v3893_v1  ;;  %v4079_v3 = vld [vmem:[#allocation10 + $0xd10] sm:$0xff] }
 0x72e   : > { %7777 = vmatprep.subr.bf16.mxu0 %v7776_v11 }
 0x731   : > { %7779 = vmatpush3.bf16.msra.mxu0 %v7776_v11  ;;  %v2335_v11 = vld [vmem:[#allocation10 + $0x5b0] sm:$0xff] }
 0x732   : > { %7781 = vmatprep.subr.bf16.mxu0 %v7780_v14 }
 0x735   : > { %7783 = vmatpush3.bf16.msra.mxu0 %v7780_v14  ;;  %v3897_v14 = vld [vmem:[#allocation10 + $0xc20] sm:$0xff] }
 0x736   : > { %7785 = vmatprep.subr.bf16.mxu0 %v9285_v21 }
 0x74c   : > { %v9294_v15 = vpop.f32.mrb[6].mxu1 }
 0x74d   : > { %v9296_v17 = vpop.f32.mrb[7].mxu1  ;;  %v9325_v52 = vadd.f32 %v9294_v15, %v5275_v49  ;;  %v3907_v15 = vld [vmem:[#allocation10 + $0xc70] sm:$0xff] }
 0x74e   : > { %v9328_v53 = vadd.f32 %v5275_v49, %v9296_v17  ;;  %v2821_v49 = vld [vmem:[#allocation10 + $0x820] sm:$0xff] }
 0x74f   : > { %v2723_v56 = vmax.f32 %v9325_v52, 0.0  ;;  %v2812_v52 = vld [vmem:[#allocation10 + $0x7e0] sm:$0xff] }
 0x750   : > { %v2722_v57 = vmax.f32 %v9328_v53, 0.0  ;;  %v2830_v53 = vld [vmem:[#allocation10 + $0x868] sm:$0xff] }
 0x752   : > { %v9336_v17 = vpack.c.bf16 %v2723_v56, %v2722_v57 }
 0x7ac   : > { %v6877_v5 = vpop.f32.mrb[8].mxu1 }
 0x7ad   : > { %v9298_v19 = vadd.f32 %v6877_v5, %v5281_v18  ;;  %v3429_v20 = vpop.f32.mrb[9].mxu1  ;;  %v7800_v5 = vpack.c.bf16 %v2336_v12, %v2335_v11  ;;  %v4085_v12 = vld [vmem:[#allocation10 + $0xd40] sm:$0xff] }
 0x7ae   : > { %v9300_v27 = vadd.f32 %v5281_v18, %v3429_v20  ;;  %v3898_v18 = vld [vmem:[#allocation10 + $0xc28] sm:$0xff]  ;;  %v2337_v20 = vld [vmem:[#allocation10 + $0x5c0] sm:$0xff] }
 0x7af   : > { %v3451_v26 = vmax.f32 %v9298_v19, 0.0  ;;  %v8260_v33 = vpack.c.bf16 %v3898_v18, %v3897_v14  ;;  %v7804_v37 = vpack.c.bf16 %v2338_v60, %v2337_v20  ;;  %v4087_v18 = vld [vmem:[#allocation10 + $0xd50] sm:$0xff]  ;;  %v4089_v20 = vld [vmem:[#allocation10 + $0xd60] sm:$0xff]  ;;  %v4090_v60 = vld [vmem:[#allocation10 + $0xd68] sm:$0xff] }
 0x7b0   : > { %v3450_v29 = vmax.f32 %v9300_v27, 0.0  ;;  %v3558_v27 = vld [vmem:[#allocation10 + $0xb68] sm:$0xff]  ;;  %v3540_v19 = vld [vmem:[#allocation10 + $0xae0] sm:$0xff] }
 0x7b2   : > { %v9308_v31 = vpack.c.bf16 %v3451_v26, %v3450_v29 }
 0x7b4   : > { %8185 = vmatprep.subr.bf16.mxu1 %v9308_v31 }
 0x7b5   : > { %8187 = vmatpush3.bf16.msra.mxu1 %v9308_v31 }
 0x7b6   : > { %8221 = vmatprep.subr.bf16.mxu1 %v8220_v32 }
 0x7b8   : > { %6960 = vmatmul.mubr.msk.f32.vlgmr.msra.gmra.mrb[10].mxu1 %vm660_vm0, %v9312_v43 }
 0x7b9   : > { %8223 = vmatpush3.bf16.msra.mxu1 %v8220_v32  ;;  %7029 = vmatprep.mubr.f32.mxu1 %v9222_v25  ;;  %v2329_v25 = vld [vmem:[#allocation10 + $0x580] sm:$0xff]  ;;  %v3899_v32 = vld [vmem:[#allocation10 + $0xc30] sm:$0xff] }
 0x7ba   : > { %8225 = vmatprep.subr.bf16.mxu1 %v8224_v39  ;;  %v7788_v61 = vpack.c.bf16 %v2330_v2, %v2329_v25  ;;  %v8264_v42 = vpack.c.bf16 %v3900_v36, %v3899_v32  ;;  %v3905_v2 = vld [vmem:[#allocation10 + $0xc60] sm:$0xff]  ;;  %v4092_v32 = vld [vmem:[#allocation10 + $0xd78] sm:$0xff] }
 0x7bd   : > { %8227 = vmatpush3.bf16.msra.mxu1 %v8224_v39  ;;  %v2339_v39 = vld [vmem:[#allocation10 + $0x5d0] sm:$0xff] }
 0x7be   : > { %8229 = vmatprep.subr.bf16.mxu1 %v8228_v45  ;;  %v7808_v46 = vpack.c.bf16 %v2340_v40, %v2339_v39  ;;  %v2817_v40 = vld [vmem:[#allocation10 + $0x800] sm:$0xff] }
 0x7c1   : > { %8231 = vmatpush3.bf16.msra.mxu1 %v8228_v45  ;;  %v3902_v45 = vld [vmem:[#allocation10 + $0xc48] sm:$0xff] }
 0x7c2   : > { %8233 = vmatprep.subr.bf16.mxu1 %v8232_v34 }
 0x7c5   : > { %8235 = vmatpush3.bf16.msra.mxu1 %v8232_v34 }
 0x7c6   : > { %8237 = vmatprep.subr.bf16.mxu1 %v8236_v38 }
 0x7c9   : > { %8239 = vmatpush3.bf16.msra.mxu1 %v8236_v38  ;;  %v3904_v38 = vld [vmem:[#allocation10 + $0xc58] sm:$0xff] }
 0x7ca   : > { %8241 = vmatprep.subr.bf16.mxu1 %v8240_v59  ;;  %v8272_v25 = vpack.c.bf16 %v3904_v38, %v3903_v16  ;;  %v2822_v16 = vld [vmem:[#allocation10 + $0x828] sm:$0xff] }
 0x7cb   : > { %v6436_v55 = vpop.f32.mrb[16].mxu0  ;;  %v7928_v38 = vpack.c.bf16 %v2822_v16, %v2821_v49  ;;  %v4624_v49 = vld [vmem:[#allocation2] sm:$0xff] }
 0x7cc   : > { %v2060_v58 = vpop.f32.mrb[17].mxu0  ;;  %v5264_v16 = vld [vmem:[#allocation12 + $0x1] ss:$0 sm:$0xff] }
 0x7cd   : > { %8243 = vmatpush3.bf16.msra.mxu1 %v8240_v59  ;;  %6504 = vmatprep.mubr.f32.mxu0 %v2060_v58  ;;  %v2344_v59 = vld [vmem:[#allocation10 + $0x5f8] sm:$0xff] }
 0x7ce   : > { %6505 = vmatmul.mubr.f32.vlgmr.msra.gmra.mrb[10].mxu0 %v6436_v55  ;;  %8245 = vmatprep.subr.bf16.mxu1 %v8244_v54  ;;  %v7816_v55 = vpack.c.bf16 %v2344_v59, %v2343_v51  ;;  %v2824_v51 = vld [vmem:[#allocation10 + $0x838] sm:$0xff] }
 0x7cf   : > { %7787 = vmatpush3.bf16.msra.mxu0 %v9285_v21  ;;  %6511 = vmatprep.mubr.msk.f32.mxu0 %vm660_vm0, %v9281_v13  ;;  %v7796_v21 = vpack.c.bf16 %v2334_v7, %v2333_v6  ;;  %v4081_v7 = vld [vmem:[#allocation10 + $0xd20] sm:$0xff] }
 0x7d0   : > { %7789 = vmatprep.subr.bf16.mxu0 %v7788_v61 }
 0x7d1   : > { %8247 = vmatpush3.bf16.msra.mxu1 %v8244_v54  ;;  %v3906_v54 = vld [vmem:[#allocation10 + $0xc68] sm:$0xff] }
 0x7d2   : > { %6512 = vmatmul.mubr.msk.f32.vlgmr.msra.gmra.mrb[18].mxu0 %vm660_vm0, %v9312_v43  ;;  %8249 = vmatprep.subr.bf16.mxu1 %v8248_v63  ;;  %v8276_v58 = vpack.c.bf16 %v3906_v54, %v3905_v2  ;;  %v2826_v2 = vld [vmem:[#allocation10 + $0x848] sm:$0xff] }
 0x7d3   : > { %7791 = vmatpush3.bf16.msra.mxu0 %v7788_v61  ;;  %v3908_v61 = vld [vmem:[#allocation10 + $0xc78] sm:$0xff] }
 0x7d4   : > { %7793 = vmatprep.subr.bf16.mxu0 %v7792_v4  ;;  %v8280_v28 = vpack.c.bf16 %v3908_v61, %v3907_v15  ;;  %v2829_v61 = vld [vmem:[#allocation10 + $0x860] sm:$0xff] }
 0x7d5   : > { %8251 = vmatpush3.bf16.msra.mxu1 %v8248_v63  ;;  %v4078_v63 = vld [vmem:[#allocation10 + $0xd08] sm:$0xff] }
 0x7d6   : > { %8253 = vmatprep.subr.bf16.mxu1 %v8252_v8  ;;  %v8284_v1 = vpack.c.bf16 %v4078_v63, %v4077_v62  ;;  %v2832_v62 = vld [vmem:[#allocation10 + $0x878] sm:$0xff] }
 0x7d7   : > { %7795 = vmatpush3.bf16.msra.mxu0 %v7792_v4  ;;  %v4080_v4 = vld [vmem:[#allocation10 + $0xd18] sm:$0xff] }
 0x7d8   : > { %7030 = vmatmul.mubr.f32.vlgmr.msra.gmra.mrb[12].mxu1 %v9220_v23  ;;  %7797 = vmatprep.subr.bf16.mxu0 %v7796_v21  ;;  %v3901_v23 = vld [vmem:[#allocation10 + $0xc40] sm:$0xff]  ;;  %v8288_v6 = vpack.c.bf16 %v4080_v4, %v4079_v3  ;;  %v2801_v3 = vld [vmem:[#allocation10 + $0x788] sm:$0xff] }
 0x7d9   : > { %8255 = vmatpush3.bf16.msra.mxu1 %v8252_v8  ;;  %7064 = vmatprep.mubr.f32.mxu1 %v9252_v44  ;;  %v2341_v44 = vld [vmem:[#allocation10 + $0x5e0] sm:$0xff]  ;;  %v8268_v34 = vpack.c.bf16 %v3902_v45, %v3901_v23  ;;  %v4082_v8 = vld [vmem:[#allocation10 + $0xd28] sm:$0xff] }
 0x7da   : > { %8257 = vmatprep.subr.bf16.mxu1 %v8256_v0  ;;  %v7812_v50 = vpack.c.bf16 %v2342_v30, %v2341_v44  ;;  %v8292_v9 = vpack.c.bf16 %v4082_v8, %v4081_v7  ;;  %v2819_v44 = vld [vmem:[#allocation10 + $0x810] sm:$0xff]  ;;  %v2820_v30 = vld [vmem:[#allocation10 + $0x818] sm:$0xff] }
 0x7db   : > { %7799 = vmatpush3.bf16.msra.mxu0 %v7796_v21  ;;  %v4084_v21 = vld [vmem:[#allocation10 + $0xd38] sm:$0xff] }
 0x7dc   : > { %7801 = vmatprep.subr.bf16.mxu0 %v7800_v5  ;;  %v8296_v11 = vpack.c.bf16 %v4084_v21, %v4083_v10  ;;  %v2803_v7 = vld [vmem:[#allocation10 + $0x798] sm:$0xff]  ;;  %v2805_v10 = vld [vmem:[#allocation10 + $0x7a8] sm:$0xff] }
 0x7dd   : > { %8259 = vmatpush3.bf16.msra.mxu1 %v8256_v0  ;;  %v4086_v0 = vld [vmem:[#allocation10 + $0xd48] sm:$0xff] }
 0x7de   : > { %8261 = vmatprep.subr.bf16.mxu1 %v8260_v33  ;;  %v8300_v14 = vpack.c.bf16 %v4086_v0, %v4085_v12  ;;  %v2807_v12 = vld [vmem:[#allocation10 + $0x7b8] sm:$0xff] }
 0x7df   : > { %7803 = vmatpush3.bf16.msra.mxu0 %v7800_v5  ;;  %v4088_v5 = vld [vmem:[#allocation10 + $0xd58] sm:$0xff] }
 0x7e0   : > { %7805 = vmatprep.subr.bf16.mxu0 %v7804_v37 }
 0x7e1   : > { %8263 = vmatpush3.bf16.msra.mxu1 %v8260_v33  ;;  %v4091_v33 = vld [vmem:[#allocation10 + $0xd70] sm:$0xff] }
 0x7e2   : > { %8265 = vmatprep.subr.bf16.mxu1 %v8264_v42  ;;  %v8312_v36 = vpack.c.bf16 %v4092_v32, %v4091_v33  ;;  %v2814_v33 = vld [vmem:[#allocation10 + $0x7f0] sm:$0xff]  ;;  %v2815_v32 = vld [vmem:[#allocation10 + $0x7f8] sm:$0xff] }
 0x7e3   : > { %7807 = vmatpush3.bf16.msra.mxu0 %v7804_v37 }
 0x7e4   : > { %7809 = vmatprep.subr.bf16.mxu0 %v7808_v46 }
 0x7e5   : > { %8267 = vmatpush3.bf16.msra.mxu1 %v8264_v42  ;;  %v2818_v42 = vld [vmem:[#allocation10 + $0x808] sm:$0xff] }
 0x7e6   : > { %8269 = vmatprep.subr.bf16.mxu1 %v8268_v34 }
 0x7e7   : > { %7811 = vmatpush3.bf16.msra.mxu0 %v7808_v46  ;;  %v7920_v46 = vpack.c.bf16 %v2818_v42, %v2817_v40  ;;  %v5287_v40 = vld [vmem:[#allocation12 + $0x8] ss:$0 sm:$0xff] }
 0x7e8   : > { %7813 = vmatprep.subr.bf16.mxu0 %v7812_v50 }
 0x7e9   : > { %8271 = vmatpush3.bf16.msra.mxu1 %v8268_v34  ;;  %v9349_v34 = vld [vmem:[#allocation2 + $0x10] sm:$0xff] }
 0x7ea   : > { %8273 = vmatprep.subr.bf16.mxu1 %v8272_v25 }
 0x7eb   : > { %7815 = vmatpush3.bf16.msra.mxu0 %v7812_v50  ;;  %v2823_v50 = vld [vmem:[#allocation10 + $0x830] sm:$0xff] }
 0x7ec   : > { %7817 = vmatprep.subr.bf16.mxu0 %v7816_v55  ;;  %v7932_v59 = vpack.c.bf16 %v2824_v51, %v2823_v50  ;;  %v5274_v50 = vld [vmem:[#allocation12 + $0x3] ss:$0 sm:$0xff] }
 0x7ed   : > { %8275 = vmatpush3.bf16.msra.mxu1 %v8272_v25  ;;  %v2825_v25 = vld [vmem:[#allocation10 + $0x840] sm:$0xff] }
 0x7ee   : > { %8277 = vmatprep.subr.bf16.mxu1 %v8276_v58  ;;  %v7936_v54 = vpack.c.bf16 %v2826_v2, %v2825_v25  ;;  %v3059_v2 = vld [vmem:[#allocation10 + $0x880] sm:$0xff] }
 0x7ef   : > { %7819 = vmatpush3.bf16.msra.mxu0 %v7816_v55  ;;  %v2827_v55 = vld [vmem:[#allocation10 + $0x850] sm:$0xff] }
 0x7f0   : > { %7917 = vmatprep.subr.bf16.mxu0 %v9336_v17 }
 0x7f1   : > { %8279 = vmatpush3.bf16.msra.mxu1 %v8276_v58  ;;  %v2828_v58 = vld [vmem:[#allocation10 + $0x858] sm:$0xff] }
 0x7f2   : > { %8281 = vmatprep.subr.bf16.mxu1 %v8280_v28  ;;  %v7940_v15 = vpack.c.bf16 %v2828_v58, %v2827_v55 }
 0x7f5   : > { %8283 = vmatpush3.bf16.msra.mxu1 %v8280_v28  ;;  %v2831_v28 = vld [vmem:[#allocation10 + $0x870] sm:$0xff] }
 0x7f6   : > { %8285 = vmatprep.subr.bf16.mxu1 %v8284_v1  ;;  %v7948_v63 = vpack.c.bf16 %v2832_v62, %v2831_v28  ;;  %v4725_v28 = vld [vmem:[#allocation10 + $0xf80] sm:$0xff]  ;;  %v4726_v62 = vld [vmem:[#allocation10 + $0xf88] sm:$0xff] }
 0x7f8   : > { %7065 = vmatmul.mubr.f32.vlgmr.msra.gmra.mrb[12].mxu1 %v9250_v41  ;;  %v8304_v41 = vpack.c.bf16 %v4088_v5, %v4087_v18  ;;  %v2809_v18 = vld [vmem:[#allocation10 + $0x7c8] sm:$0xff] }
 0x7f9   : > { %8287 = vmatpush3.bf16.msra.mxu1 %v8284_v1  ;;  %7099 = vmatprep.mubr.f32.mxu1 %v9265_v48  ;;  %v8308_v48 = vpack.c.bf16 %v4090_v60, %v4089_v20  ;;  %v2800_v1 = vld [vmem:[#allocation10 + $0x780] sm:$0xff]  ;;  %v2811_v20 = vld [vmem:[#allocation10 + $0x7d8] sm:$0xff] }
 0x7fa   : > { %8289 = vmatprep.subr.bf16.mxu1 %v8288_v6  ;;  %v7952_v4 = vpack.c.bf16 %v2801_v3, %v2800_v1  ;;  %v3061_v1 = vld [vmem:[#allocation10 + $0x890] sm:$0xff]  ;;  %v3062_v3 = vld [vmem:[#allocation10 + $0x898] sm:$0xff] }
 0x7fd   : > { %8291 = vmatpush3.bf16.msra.mxu1 %v8288_v6  ;;  %v2802_v6 = vld [vmem:[#allocation10 + $0x790] sm:$0xff] }
 0x7fe   : > { %8293 = vmatprep.subr.bf16.mxu1 %v8292_v9  ;;  %v7956_v8 = vpack.c.bf16 %v2803_v7, %v2802_v6  ;;  %v8424_v6 = vpack.c.bf16 %v4726_v62, %v4725_v28  ;;  %v7992_v7 = vpack.c.bf16 %v3062_v3, %v3061_v1  ;;  %v4740_v28 = vld [vmem:[#allocation10 + $0xff8] sm:$0xff]  ;;  %v3546_v1 = vld [vmem:[#allocation10 + $0xb08] sm:$0xff] }
 0x801   : > { %8295 = vmatpush3.bf16.msra.mxu1 %v8292_v9  ;;  %v2804_v9 = vld [vmem:[#allocation10 + $0x7a0] sm:$0xff] }
 0x802   : > { %8297 = vmatprep.subr.bf16.mxu1 %v8296_v11  ;;  %v7960_v21 = vpack.c.bf16 %v2805_v10, %v2804_v9  ;;  %v4728_v9 = vld [vmem:[#allocation10 + $0xf98] sm:$0xff]  ;;  %v3063_v10 = vld [vmem:[#allocation10 + $0x8a0] sm:$0xff] }
 0x805   : > { %8299 = vmatpush3.bf16.msra.mxu1 %v8296_v11  ;;  %v2806_v11 = vld [vmem:[#allocation10 + $0x7b0] sm:$0xff] }
 0x806   : > { %8301 = vmatprep.subr.bf16.mxu1 %v8300_v14  ;;  %v7964_v0 = vpack.c.bf16 %v2807_v12, %v2806_v11  ;;  %v4625_v11 = vld [vmem:[#allocation2 + $0x8] sm:$0xff] }
 0x807   : > { %v4729_v12 = vld [vmem:[#allocation10 + $0xfa0] sm:$0xff] }
 0x809   : > { %8303 = vmatpush3.bf16.msra.mxu1 %v8300_v14  ;;  %v2808_v14 = vld [vmem:[#allocation10 + $0x7c0] sm:$0xff] }
 0x80a   : > { %8305 = vmatprep.subr.bf16.mxu1 %v8304_v41  ;;  %v7968_v5 = vpack.c.bf16 %v2809_v18, %v2808_v14  ;;  %v3065_v14 = vld [vmem:[#allocation10 + $0x8b0] sm:$0xff]  ;;  %v3066_v18 = vld [vmem:[#allocation10 + $0x8b8] sm:$0xff] }
 0x80d   : > { %8307 = vmatpush3.bf16.msra.mxu1 %v8304_v41  ;;  %v2810_v41 = vld [vmem:[#allocation10 + $0x7d0] sm:$0xff] }
 0x80e   : > { %8309 = vmatprep.subr.bf16.mxu1 %v8308_v48  ;;  %v7972_v60 = vpack.c.bf16 %v2811_v20, %v2810_v41  ;;  %v4731_v41 = vld [vmem:[#allocation10 + $0xfb0] sm:$0xff]  ;;  %v4732_v20 = vld [vmem:[#allocation10 + $0xfb8] sm:$0xff] }
 0x811   : > { %8311 = vmatpush3.bf16.msra.mxu1 %v8308_v48 }
 0x812   : > { %8313 = vmatprep.subr.bf16.mxu1 %v8312_v36 }
 0x815   : > { %8315 = vmatpush3.bf16.msra.mxu1 %v8312_v36  ;;  %v7980_v36 = vpack.c.bf16 %v2815_v32, %v2814_v33  ;;  %v4733_v33 = vld [vmem:[#allocation10 + $0xfc0] sm:$0xff]  ;;  %v4734_v32 = vld [vmem:[#allocation10 + $0xfc8] sm:$0xff] }
 0x818   : > { %7100 = vmatmul.mubr.f32.vlgmr.msra.gmra.mrb[12].mxu1 %v9263_v47  ;;  %v7924_v47 = vpack.c.bf16 %v2820_v30, %v2819_v44 }
 0x819   : > { %7183 = vmatprep.mubr.msk.f32.mxu1 %vm660_vm0, %v9281_v13 }
 0x88b   : > { %v9344_v37 = vpop.f32.mrb[10].mxu1 }
 0x88c   : > { %v9346_v39 = vpop.f32.mrb[11].mxu1 }
 0x8a5   : > { %v6513_v23 = vpop.f32.mrb[18].mxu0 }
 0x8a6   : > { %v2319_v45 = vpop.f32.mrb[19].mxu0 }
 0x8a7   : > { %6546 = vmatprep.mubr.f32.mxu0 %v2319_v45 }
 0x8a8   : > { %6547 = vmatmul.mubr.f32.vlgmr.msra.gmra.mrb[10].mxu0 %v6513_v23 }
 0x8a9   : > { %7919 = vmatpush3.bf16.msra.mxu0 %v9336_v17  ;;  %6658 = vmatprep.mubr.msk.f32.mxu0 %vm660_vm0, %v9349_v34 }
 0x8aa   : > { %7921 = vmatprep.subr.bf16.mxu0 %v7920_v46 }
 0x8ac   : > { %6659 = vmatmul.mubr.msk.f32.vlgmr.msra.gmra.mrb[20].mxu0 %vm660_vm0, %v9289_v35 }
 0x8ad   : > { %7923 = vmatpush3.bf16.msra.mxu0 %v7920_v46  ;;  %6693 = vmatprep.mubr.f32.mxu0 %v2722_v57  ;;  %v7944_v57 = vpack.c.bf16 %v2830_v53, %v2829_v61 }
 0x8ae   : > { %7925 = vmatprep.subr.bf16.mxu0 %v7924_v47 }
 0x8b1   : > { %7927 = vmatpush3.bf16.msra.mxu0 %v7924_v47 }
 0x8b2   : > { %7929 = vmatprep.subr.bf16.mxu0 %v7928_v38 }
 0x8b5   : > { %7931 = vmatpush3.bf16.msra.mxu0 %v7928_v38 }
 0x8b6   : > { %7933 = vmatprep.subr.bf16.mxu0 %v7932_v59 }
 0x8b9   : > { %7935 = vmatpush3.bf16.msra.mxu0 %v7932_v59 }
 0x8ba   : > { %7937 = vmatprep.subr.bf16.mxu0 %v7936_v54 }
 0x8bd   : > { %7939 = vmatpush3.bf16.msra.mxu0 %v7936_v54  ;;  %v3060_v54 = vld [vmem:[#allocation10 + $0x888] sm:$0xff] }
 0x8be   : > { %7941 = vmatprep.subr.bf16.mxu0 %v7940_v15 }
 0x8c1   : > { %7943 = vmatpush3.bf16.msra.mxu0 %v7940_v15 }
 0x8c2   : > { %7945 = vmatprep.subr.bf16.mxu0 %v7944_v57 }
 0x8c5   : > { %7947 = vmatpush3.bf16.msra.mxu0 %v7944_v57  ;;  %v7988_v57 = vpack.c.bf16 %v3060_v54, %v3059_v2  ;;  %v4738_v2 = vld [vmem:[#allocation10 + $0xfe8] sm:$0xff]  ;;  %v3073_v54 = vld [vmem:[#allocation10 + $0x8f0] sm:$0xff] }
 0x8c6   : > { %7949 = vmatprep.subr.bf16.mxu0 %v7948_v63 }
 0x8c9   : > { %7951 = vmatpush3.bf16.msra.mxu0 %v7948_v63 }
 0x8ca   : > { %7953 = vmatprep.subr.bf16.mxu0 %v7952_v4 }
 0x8cc   : > { %6694 = vmatmul.mubr.f32.vlgmr.msra.gmra.mrb[22].mxu0 %v2723_v56  ;;  %v2813_v56 = vld [vmem:[#allocation10 + $0x7e8] sm:$0xff] }
 0x8cd   : > { %7955 = vmatpush3.bf16.msra.mxu0 %v7952_v4  ;;  %v7976_v48 = vpack.c.bf16 %v2813_v56, %v2812_v52  ;;  %v3068_v52 = vld [vmem:[#allocation10 + $0x8c8] sm:$0xff]  ;;  %v8436_v56 = vpack.c.bf16 %v4732_v20, %v4731_v41  ;;  %v3560_v41 = vld [vmem:[#allocation10 + $0xb78] sm:$0xff] }
 0x8ce   : > { %7957 = vmatprep.subr.bf16.mxu0 %v7956_v8 }
 0x8d1   : > { %7959 = vmatpush3.bf16.msra.mxu0 %v7956_v8  ;;  %v4727_v8 = vld [vmem:[#allocation10 + $0xf90] sm:$0xff] }
 0x8d2   : > { %7961 = vmatprep.subr.bf16.mxu0 %v7960_v21 }
 0x8d5   : > { %7963 = vmatpush3.bf16.msra.mxu0 %v7960_v21  ;;  %v3064_v21 = vld [vmem:[#allocation10 + $0x8a8] sm:$0xff] }
 0x8d6   : > { %7965 = vmatprep.subr.bf16.mxu0 %v7964_v0 }
 0x8d9   : > { %7967 = vmatpush3.bf16.msra.mxu0 %v7964_v0  ;;  %v4730_v0 = vld [vmem:[#allocation10 + $0xfa8] sm:$0xff] }
 0x8da   : > { %7969 = vmatprep.subr.bf16.mxu0 %v7968_v5 }
 0x8dd   : > { %7971 = vmatpush3.bf16.msra.mxu0 %v7968_v5  ;;  %v8432_v5 = vpack.c.bf16 %v4730_v0, %v4729_v12  ;;  %v3554_v12 = vld [vmem:[#allocation10 + $0xb48] sm:$0xff] }
 0x8de   : > { %7973 = vmatprep.subr.bf16.mxu0 %v7972_v60 }
 0x8e1   : > { %7975 = vmatpush3.bf16.msra.mxu0 %v7972_v60  ;;  %v3067_v60 = vld [vmem:[#allocation10 + $0x8c0] sm:$0xff] }
 0x8e2   : > { %7977 = vmatprep.subr.bf16.mxu0 %v7976_v48 }
 0x8e5   : > { %7979 = vmatpush3.bf16.msra.mxu0 %v7976_v48  ;;  %v8004_v48 = vpack.c.bf16 %v3068_v52, %v3067_v60  ;;  %v3528_v60 = vld [vmem:[#allocation10 + $0xa80] sm:$0xff]  ;;  %v3529_v52 = vld [vmem:[#allocation10 + $0xa88] sm:$0xff] }
 0x8e6   : > { %7981 = vmatprep.subr.bf16.mxu0 %v7980_v36 }
 0x8e9   : > { %7983 = vmatpush3.bf16.msra.mxu0 %v7980_v36  ;;  %v3069_v36 = vld [vmem:[#allocation10 + $0x8d0] sm:$0xff] }
 0x8ea   : > { %7985 = vmatprep.subr.bf16.mxu0 %v9336_v17 }
 0x8eb   : > { %v7101_v42 = vpop.f32.mrb[12].mxu1 }
 0x8ec   : > { %v9360_v23 = vadd.f32 %v7101_v42, %v5287_v40  ;;  %v4159_v45 = vpop.f32.mrb[13].mxu1  ;;  %v8440_v42 = vpack.c.bf16 %v4734_v32, %v4733_v33  ;;  %v3531_v33 = vld [vmem:[#allocation10 + $0xa98] sm:$0xff] }
 0x8ed   : > { %v9362_v46 = vadd.f32 %v5287_v40, %v4159_v45  ;;  %v3070_v40 = vld [vmem:[#allocation10 + $0x8d8] sm:$0xff] }
 0x8ee   : > { %v4181_v44 = vmax.f32 %v9360_v23, 0.0  ;;  %v8008_v45 = vpack.c.bf16 %v3070_v40, %v3069_v36  ;;  %v3532_v36 = vld [vmem:[#allocation10 + $0xaa0] sm:$0xff]  ;;  %v3533_v40 = vld [vmem:[#allocation10 + $0xaa8] sm:$0xff] }
 0x8ef   : > { %v4180_v30 = vmax.f32 %v9362_v46, 0.0  ;;  %v4288_v46 = vld [vmem:[#allocation10 + $0xe68] sm:$0xff]  ;;  %v4270_v23 = vld [vmem:[#allocation10 + $0xde0] sm:$0xff] }
 0x8f1   : > { %v9370_v47 = vpack.c.bf16 %v4181_v44, %v4180_v30 }
 0x8f3   : > { %8385 = vmatprep.subr.bf16.mxu1 %v9370_v47 }
 0x8f4   : > { %8387 = vmatpush3.bf16.msra.mxu1 %v9370_v47 }
 0x8f7   : > { %7184 = vmatmul.mubr.msk.f32.vlgmr.msra.gmra.mrb[14].mxu1 %vm660_vm0, %v9312_v43 }
 0x8f8   : > { %7225 = vmatprep.mubr.msk.f32.mxu1 %vm660_vm0, %v4624_v49  ;;  %v4735_v49 = vld [vmem:[#allocation10 + $0xfd0] sm:$0xff] }
 0x97b   : > { %v6548_v38 = vpop.f32.mrb[10].mxu0 }
 0x97c   : > { %v8524_v51 = vadd.f32 %v6548_v38, %v5264_v16  ;;  %v2411_v59 = vpop.f32.mrb[11].mxu0  ;;  %v3071_v38 = vld [vmem:[#allocation10 + $0x8e0] sm:$0xff] }
 0x97d   : > { %v8526_v25 = vadd.f32 %v5264_v16, %v2411_v59  ;;  %v4736_v16 = vld [vmem:[#allocation10 + $0xfd8] sm:$0xff] }
 0x97e   : > { %v9383_v55 = vadd.f32 %v8524_v51, %v5274_v50  ;;  %v8444_v51 = vpack.c.bf16 %v4736_v16, %v4735_v49  ;;  %v3535_v49 = vld [vmem:[#allocation10 + $0xab8] sm:$0xff] }
 0x97f   : > { %v8527_v58 = vadd.f32 %v8526_v25, %v5274_v50  ;;  %v6660_v15 = vpop.f32.mrb[20].mxu0  ;;  %v3072_v50 = vld [vmem:[#allocation10 + $0x8e8] sm:$0xff]  ;;  %v4737_v25 = vld [vmem:[#allocation10 + $0xfe0] sm:$0xff] }
 0x980   : > { %v4623_v61 = vmax.f32 %v9383_v55, 0.0  ;;  %5082 = vst [vmem:[%s9381_s13 + $0x8] sm:$0xff] %v9383_v55  ;;  %v2790_v53 = vpop.f32.mrb[21].mxu0  ;;  %v8012_v59 = vpack.c.bf16 %v3072_v50, %v3071_v38  ;;  %v3536_v38 = vld [vmem:[#allocation10 + $0xac0] sm:$0xff]  ;;  %v3537_v50 = vld [vmem:[#allocation10 + $0xac8] sm:$0xff] }
 0x981   : > { %v4622_v63 = vmax.f32 %v8527_v58, 0.0  ;;  %5081 = vst [vmem:[%s9381_s13] sm:$0xff] %v8527_v58  ;;  %6728 = vmatprep.mubr.f32.mxu0 %v2790_v53  ;;  %v3074_v58 = vld [vmem:[#allocation10 + $0x8f8] sm:$0xff] }
 0x982   : > { %6729 = vmatmul.mubr.f32.vlgmr.msra.gmra.mrb[22].mxu0 %v6660_v15  ;;  %v8448_v15 = vpack.c.bf16 %v4738_v2, %v4737_v25  ;;  %v8016_v53 = vpack.c.bf16 %v3074_v58, %v3073_v54  ;;  %v3539_v25 = vld [vmem:[#allocation10 + $0xad8] sm:$0xff]  ;;  %v3542_v58 = vld [vmem:[#allocation10 + $0xaf0] sm:$0xff] }
 0x983   : > { %v9391_v4 = vpack.c.bf16 %v4623_v61, %v4622_v63  ;;  %7987 = vmatpush3.bf16.msra.mxu0 %v9336_v17  ;;  %6735 = vmatprep.mubr.msk.f32.mxu0 %vm660_vm0, %v9281_v13  ;;  %v8428_v17 = vpack.c.bf16 %v4728_v9, %v4727_v8  ;;  %v7996_v13 = vpack.c.bf16 %v3064_v21, %v3063_v10  ;;  %v3547_v8 = vld [vmem:[#allocation10 + $0xb10] sm:$0xff]  ;;  %v3548_v9 = vld [vmem:[#allocation10 + $0xb18] sm:$0xff]  ;;  %v3549_v21 = vld [vmem:[#allocation10 + $0xb20] sm:$0xff] }
 0x984   : > { %7989 = vmatprep.subr.bf16.mxu0 %v7988_v57  ;;  %v8124_v10 = vpack.c.bf16 %v3548_v9, %v3547_v8  ;;  %v3791_v8 = vld [vmem:[#allocation10 + $0xba0] sm:$0xff]  ;;  %v3792_v9 = vld [vmem:[#allocation10 + $0xba8] sm:$0xff] }
 0x985   : > { %8421 = vmatprep.subr.bf16.mxu1 %v9391_v4 }
 0x986   : > { %6736 = vmatmul.mubr.msk.f32.vlgmr.msra.gmra.mrb[24].mxu0 %vm660_vm0, %v9312_v43  ;;  %8423 = vmatpush3.bf16.msra.mxu1 %v9391_v4  ;;  %v8000_v43 = vpack.c.bf16 %v3066_v18, %v3065_v14  ;;  %v3555_v14 = vld [vmem:[#allocation10 + $0xb50] sm:$0xff]  ;;  %v3556_v18 = vld [vmem:[#allocation10 + $0xb58] sm:$0xff] }
 0x987   : > { %7991 = vmatpush3.bf16.msra.mxu0 %v7988_v57  ;;  %8425 = vmatprep.subr.bf16.mxu1 %v8424_v6  ;;  %v4739_v57 = vld [vmem:[#allocation10 + $0xff0] sm:$0xff] }
 0x988   : > { %7993 = vmatprep.subr.bf16.mxu0 %v7992_v7  ;;  %v8452_v62 = vpack.c.bf16 %v4740_v28, %v4739_v57  ;;  %v3787_v57 = vld [vmem:[#allocation10 + $0xb80] sm:$0xff]  ;;  %v3788_v28 = vld [vmem:[#allocation10 + $0xb88] sm:$0xff] }
 0x989   : > { %7226 = vmatmul.mubr.msk.f32.vlgmr.msra.gmra.mrb[16].mxu1 %vm660_vm0, %v4625_v11  ;;  %v3550_v11 = vld [vmem:[#allocation10 + $0xb28] sm:$0xff] }
 0x98a   : > { %8427 = vmatpush3.bf16.msra.mxu1 %v8424_v6  ;;  %7260 = vmatprep.mubr.f32.mxu1 %v4622_v63  ;;  %v3545_v63 = vld [vmem:[#allocation10 + $0xb00] sm:$0xff]  ;;  %v8128_v55 = vpack.c.bf16 %v3550_v11, %v3549_v21  ;;  %v3793_v21 = vld [vmem:[#allocation10 + $0xbb0] sm:$0xff]  ;;  %v3794_v11 = vld [vmem:[#allocation10 + $0xbb8] sm:$0xff] }
 0x98b   : > { %7995 = vmatpush3.bf16.msra.mxu0 %v7992_v7  ;;  %8429 = vmatprep.subr.bf16.mxu1 %v8428_v17  ;;  %v8120_v7 = vpack.c.bf16 %v3546_v1, %v3545_v63  ;;  %v3789_v63 = vld [vmem:[#allocation10 + $0xb90] sm:$0xff]  ;;  %v3790_v1 = vld [vmem:[#allocation10 + $0xb98] sm:$0xff] }
 0x98c   : > { %7997 = vmatprep.subr.bf16.mxu0 %v7996_v13 }
 0x98e   : > { %8431 = vmatpush3.bf16.msra.mxu1 %v8428_v17  ;;  %v3552_v17 = vld [vmem:[#allocation10 + $0xb38] sm:$0xff] }
 0x98f   : > { %7999 = vmatpush3.bf16.msra.mxu0 %v7996_v13  ;;  %8433 = vmatprep.subr.bf16.mxu1 %v8432_v5  ;;  %v3553_v13 = vld [vmem:[#allocation10 + $0xb40] sm:$0xff] }
 0x990   : > { %8001 = vmatprep.subr.bf16.mxu0 %v8000_v43  ;;  %v8136_v0 = vpack.c.bf16 %v3554_v12, %v3553_v13  ;;  %v3797_v13 = vld [vmem:[#allocation10 + $0xbd0] sm:$0xff]  ;;  %v3798_v12 = vld [vmem:[#allocation10 + $0xbd8] sm:$0xff] }
 0x992   : > { %8435 = vmatpush3.bf16.msra.mxu1 %v8432_v5  ;;  %v3557_v5 = vld [vmem:[#allocation10 + $0xb60] sm:$0xff] }
 0x993   : > { %8003 = vmatpush3.bf16.msra.mxu0 %v8000_v43  ;;  %8437 = vmatprep.subr.bf16.mxu1 %v8436_v56  ;;  %v3559_v43 = vld [vmem:[#allocation10 + $0xb70] sm:$0xff] }
 0x994   : > { %8005 = vmatprep.subr.bf16.mxu0 %v8004_v48  ;;  %v8148_v20 = vpack.c.bf16 %v3560_v41, %v3559_v43  ;;  %v4276_v43 = vld [vmem:[#allocation10 + $0xe08] sm:$0xff] }
 0x996   : > { %8439 = vmatpush3.bf16.msra.mxu1 %v8436_v56  ;;  %v8152_v56 = vpack.c.bf16 %v3529_v52, %v3528_v60  ;;  %v4278_v60 = vld [vmem:[#allocation10 + $0xe18] sm:$0xff] }
 0x997   : > { %8007 = vmatpush3.bf16.msra.mxu0 %v8004_v48  ;;  %8441 = vmatprep.subr.bf16.mxu1 %v8440_v42  ;;  %v3530_v48 = vld [vmem:[#allocation10 + $0xa90] sm:$0xff] }
 0x998   : > { %8009 = vmatprep.subr.bf16.mxu0 %v8008_v45  ;;  %v8156_v32 = vpack.c.bf16 %v3531_v33, %v3530_v48  ;;  %v4280_v48 = vld [vmem:[#allocation10 + $0xe28] sm:$0xff]  ;;  %v8667_v33 = vld [vmem:[#allocation2 + $0x18] sm:$0xff] }
 0x99a   : > { %8443 = vmatpush3.bf16.msra.mxu1 %v8440_v42  ;;  %v8160_v42 = vpack.c.bf16 %v3533_v40, %v3532_v36  ;;  %v4281_v36 = vld [vmem:[#allocation10 + $0xe30] sm:$0xff]  ;;  %v4283_v40 = vld [vmem:[#allocation10 + $0xe40] sm:$0xff] }
 0x99b   : > { %8011 = vmatpush3.bf16.msra.mxu0 %v8008_v45  ;;  %8445 = vmatprep.subr.bf16.mxu1 %v8444_v51  ;;  %v3534_v45 = vld [vmem:[#allocation10 + $0xab0] sm:$0xff] }
 0x99c   : > { %8013 = vmatprep.subr.bf16.mxu0 %v8012_v59  ;;  %v8164_v16 = vpack.c.bf16 %v3535_v49, %v3534_v45  ;;  %v4285_v45 = vld [vmem:[#allocation10 + $0xe50] sm:$0xff]  ;;  %v4286_v49 = vld [vmem:[#allocation10 + $0xe58] sm:$0xff] }
 0x99e   : > { %8447 = vmatpush3.bf16.msra.mxu1 %v8444_v51  ;;  %v8168_v51 = vpack.c.bf16 %v3537_v50, %v3536_v38  ;;  %v4287_v38 = vld [vmem:[#allocation10 + $0xe60] sm:$0xff]  ;;  %v4289_v50 = vld [vmem:[#allocation10 + $0xe70] sm:$0xff] }
 0x99f   : > { %8015 = vmatpush3.bf16.msra.mxu0 %v8012_v59  ;;  %8449 = vmatprep.subr.bf16.mxu1 %v8448_v15  ;;  %v3538_v59 = vld [vmem:[#allocation10 + $0xad0] sm:$0xff] }
 0x9a0   : > { %8017 = vmatprep.subr.bf16.mxu0 %v8016_v53  ;;  %v8172_v2 = vpack.c.bf16 %v3539_v25, %v3538_v59  ;;  %v4258_v25 = vld [vmem:[#allocation10 + $0xd80] sm:$0xff] }
 0x9a2   : > { %8451 = vmatpush3.bf16.msra.mxu1 %v8448_v15  ;;  %v3543_v15 = vld [vmem:[#allocation10 + $0xaf8] sm:$0xff] }
 0x9a3   : > { %8019 = vmatpush3.bf16.msra.mxu0 %v8016_v53  ;;  %8453 = vmatprep.subr.bf16.mxu1 %v8452_v62  ;;  %v8180_v53 = vpack.c.bf16 %v3543_v15, %v3542_v58  ;;  %v4262_v15 = vld [vmem:[#allocation10 + $0xda0] sm:$0xff] }
 0x9a4   : > { %8117 = vmatprep.subr.bf16.mxu0 %v9308_v31 }
 0x9a6   : > { %8455 = vmatpush3.bf16.msra.mxu1 %v8452_v62  ;;  %v8188_v62 = vpack.c.bf16 %v3788_v28, %v3787_v57  ;;  %v4264_v28 = vld [vmem:[#allocation10 + $0xdb0] sm:$0xff] }
 0x9a9   : > { %7261 = vmatmul.mubr.f32.vlgmr.msra.gmra.mrb[18].mxu1 %v4623_v61  ;;  %v3551_v61 = vld [vmem:[#allocation10 + $0xb30] sm:$0xff] }
 0xa59   : > { %v6737_v3 = vpop.f32.mrb[24].mxu0 }
 0xa5a   : > { %v3049_v6 = vpop.f32.mrb[25].mxu0 }
 0xa5b   : > { %6770 = vmatprep.mubr.f32.mxu0 %v3049_v6 }
 0xa5c   : > { %6771 = vmatmul.mubr.f32.vlgmr.msra.gmra.mrb[22].mxu0 %v6737_v3 }
 0xa5d   : > { %8119 = vmatpush3.bf16.msra.mxu0 %v9308_v31  ;;  %6882 = vmatprep.mubr.msk.f32.mxu0 %vm660_vm0, %v9349_v34  ;;  %v8132_v31 = vpack.c.bf16 %v3552_v17, %v3551_v61  ;;  %v3795_v61 = vld [vmem:[#allocation10 + $0xbc0] sm:$0xff]  ;;  %v3796_v17 = vld [vmem:[#allocation10 + $0xbc8] sm:$0xff] }
 0xa5e   : > { %8121 = vmatprep.subr.bf16.mxu0 %v8120_v7 }
 0xa60   : > { %6883 = vmatmul.mubr.msk.f32.vlgmr.msra.gmra.mrb[26].mxu0 %vm660_vm0, %v9289_v35  ;;  %v8140_v35 = vpack.c.bf16 %v3556_v18, %v3555_v14  ;;  %v3799_v14 = vld [vmem:[#allocation10 + $0xbe0] sm:$0xff]  ;;  %v3800_v18 = vld [vmem:[#allocation10 + $0xbe8] sm:$0xff] }
 0xa61   : > { %8123 = vmatpush3.bf16.msra.mxu0 %v8120_v7  ;;  %6917 = vmatprep.mubr.f32.mxu0 %v3450_v29  ;;  %v8144_v29 = vpack.c.bf16 %v3558_v27, %v3557_v5  ;;  %v8192_v7 = vpack.c.bf16 %v3790_v1, %v3789_v63  ;;  %v3802_v5 = vld [vmem:[#allocation10 + $0xbf8] sm:$0xff]  ;;  %v4266_v1 = vld [vmem:[#allocation10 + $0xdc0] sm:$0xff] }
 0xa62   : > { %8125 = vmatprep.subr.bf16.mxu0 %v8124_v10 }
 0xa65   : > { %8127 = vmatpush3.bf16.msra.mxu0 %v8124_v10  ;;  %v8196_v10 = vpack.c.bf16 %v3792_v9, %v3791_v8  ;;  %v4269_v8 = vld [vmem:[#allocation10 + $0xdd8] sm:$0xff] }
 0xa66   : > { %8129 = vmatprep.subr.bf16.mxu0 %v8128_v55 }
 0xa69   : > { %8131 = vmatpush3.bf16.msra.mxu0 %v8128_v55  ;;  %v8200_v55 = vpack.c.bf16 %v3794_v11, %v3793_v21  ;;  %v4272_v21 = vld [vmem:[#allocation10 + $0xdf0] sm:$0xff]  ;;  %v4273_v11 = vld [vmem:[#allocation10 + $0xdf8] sm:$0xff] }
 0xa6a   : > { %8133 = vmatprep.subr.bf16.mxu0 %v8132_v31 }
 0xa6d   : > { %8135 = vmatpush3.bf16.msra.mxu0 %v8132_v31  ;;  %v8204_v31 = vpack.c.bf16 %v3796_v17, %v3795_v61  ;;  %v4517_v61 = vld [vmem:[#allocation10 + $0xe80] sm:$0xff]  ;;  %v4518_v17 = vld [vmem:[#allocation10 + $0xe88] sm:$0xff] }
 0xa6e   : > { %8137 = vmatprep.subr.bf16.mxu0 %v8136_v0 }
 0xa71   : > { %8139 = vmatpush3.bf16.msra.mxu0 %v8136_v0  ;;  %v8208_v0 = vpack.c.bf16 %v3798_v12, %v3797_v13  ;;  %v9427_v13 = vpop.f32.mrb[14].mxu1 }
 0xa72   : > { %8141 = vmatprep.subr.bf16.mxu0 %v8140_v35  ;;  %v9429_v12 = vpop.f32.mrb[15].mxu1 }
 0xa75   : > { %8143 = vmatpush3.bf16.msra.mxu0 %v8140_v35  ;;  %v3801_v35 = vld [vmem:[#allocation10 + $0xbf0] sm:$0xff] }
 0xa76   : > { %8145 = vmatprep.subr.bf16.mxu0 %v8144_v29  ;;  %v8216_v27 = vpack.c.bf16 %v3802_v5, %v3801_v35  ;;  %v4711_v5 = vld [vmem:[#allocation10 + $0xf18] sm:$0xff] }
 0xa79   : > { %8147 = vmatpush3.bf16.msra.mxu0 %v8144_v29  ;;  %v4275_v29 = vld [vmem:[#allocation10 + $0xe00] sm:$0xff] }
 0xa7a   : > { %8149 = vmatprep.subr.bf16.mxu0 %v8148_v20  ;;  %v8320_v41 = vpack.c.bf16 %v4276_v43, %v4275_v29  ;;  %v4712_v43 = vld [vmem:[#allocation10 + $0xf20] sm:$0xff] }
 0xa7d   : > { %8151 = vmatpush3.bf16.msra.mxu0 %v8148_v20  ;;  %v4277_v20 = vld [vmem:[#allocation10 + $0xe10] sm:$0xff] }
 0xa7e   : > { %8153 = vmatprep.subr.bf16.mxu0 %v8152_v56  ;;  %v8324_v52 = vpack.c.bf16 %v4278_v60, %v4277_v20  ;;  %v4714_v60 = vld [vmem:[#allocation10 + $0xf30] sm:$0xff] }
 0xa80   : > { %6918 = vmatmul.mubr.f32.vlgmr.msra.gmra.mrb[22].mxu0 %v3451_v26  ;;  %v3541_v26 = vld [vmem:[#allocation10 + $0xae8] sm:$0xff] }
 0xa81   : > { %8155 = vmatpush3.bf16.msra.mxu0 %v8152_v56  ;;  %v8176_v54 = vpack.c.bf16 %v3541_v26, %v3540_v19  ;;  %v4279_v56 = vld [vmem:[#allocation10 + $0xe20] sm:$0xff]  ;;  %v4260_v26 = vld [vmem:[#allocation10 + $0xd90] sm:$0xff] }
 0xa82   : > { %8157 = vmatprep.subr.bf16.mxu0 %v8156_v32 }
 0xa85   : > { %8159 = vmatpush3.bf16.msra.mxu0 %v8156_v32  ;;  %v8328_v32 = vpack.c.bf16 %v4280_v48, %v4279_v56  ;;  %v4716_v48 = vld [vmem:[#allocation10 + $0xf40] sm:$0xff] }
 0xa86   : > { %8161 = vmatprep.subr.bf16.mxu0 %v8160_v42 }
 0xa89   : > { %8163 = vmatpush3.bf16.msra.mxu0 %v8160_v42 }
 0xa8a   : > { %8165 = vmatprep.subr.bf16.mxu0 %v8164_v16 }
 0xa8d   : > { %8167 = vmatpush3.bf16.msra.mxu0 %v8164_v16  ;;  %v8340_v16 = vpack.c.bf16 %v4286_v49, %v4285_v45  ;;  %v4722_v45 = vld [vmem:[#allocation10 + $0xf70] sm:$0xff]  ;;  %v4723_v49 = vld [vmem:[#allocation10 + $0xf78] sm:$0xff] }
 0xa8e   : > { %8169 = vmatprep.subr.bf16.mxu0 %v8168_v51 }
 0xa91   : > { %8171 = vmatpush3.bf16.msra.mxu0 %v8168_v51  ;;  %v4290_v51 = vld [vmem:[#allocation10 + $0xe78] sm:$0xff] }
 0xa92   : > { %8173 = vmatprep.subr.bf16.mxu0 %v8172_v2  ;;  %v8348_v59 = vpack.c.bf16 %v4290_v51, %v4289_v50  ;;  %v4978_v50 = vld [vmem:[#allocation10 + $0x1010] sm:$0xff]  ;;  %v4979_v51 = vld [vmem:[#allocation10 + $0x1018] sm:$0xff] }
 0xa95   : > { %8175 = vmatpush3.bf16.msra.mxu0 %v8172_v2  ;;  %v4259_v2 = vld [vmem:[#allocation10 + $0xd88] sm:$0xff] }
 0xa96   : > { %8177 = vmatprep.subr.bf16.mxu0 %v8176_v54  ;;  %v8352_v19 = vpack.c.bf16 %v4259_v2, %v4258_v25  ;;  %v4980_v25 = vld [vmem:[#allocation10 + $0x1020] sm:$0xff]  ;;  %v4981_v2 = vld [vmem:[#allocation10 + $0x1028] sm:$0xff] }
 0xa99   : > { %8179 = vmatpush3.bf16.msra.mxu0 %v8176_v54  ;;  %v4261_v54 = vld [vmem:[#allocation10 + $0xd98] sm:$0xff] }
 0xa9a   : > { %8181 = vmatprep.subr.bf16.mxu0 %v8180_v53  ;;  %v8356_v58 = vpack.c.bf16 %v4261_v54, %v4260_v26  ;;  %v4982_v26 = vld [vmem:[#allocation10 + $0x1030] sm:$0xff]  ;;  %v4983_v54 = vld [vmem:[#allocation10 + $0x1038] sm:$0xff] }
 0xa9d   : > { %8183 = vmatpush3.bf16.msra.mxu0 %v8180_v53  ;;  %v4263_v53 = vld [vmem:[#allocation10 + $0xda8] sm:$0xff] }
 0xa9e   : > { %8189 = vmatprep.subr.bf16.mxu0 %v8188_v62  ;;  %v8360_v57 = vpack.c.bf16 %v4263_v53, %v4262_v15  ;;  %v4984_v15 = vld [vmem:[#allocation10 + $0x1040] sm:$0xff]  ;;  %v4985_v53 = vld [vmem:[#allocation10 + $0x1048] sm:$0xff] }
 0xb33   : > { %v6884_v3 = vpop.f32.mrb[26].mxu0 }
 0xb34   : > { %v3518_v6 = vpop.f32.mrb[27].mxu0 }
 0xb35   : > { %6952 = vmatprep.mubr.f32.mxu0 %v3518_v6 }
 0xb36   : > { %6953 = vmatmul.mubr.f32.vlgmr.msra.gmra.mrb[22].mxu0 %v6884_v3  ;;  %v4267_v3 = vld [vmem:[#allocation10 + $0xdc8] sm:$0xff] }
 0xb37   : > { %8191 = vmatpush3.bf16.msra.mxu0 %v8188_v62  ;;  %6994 = vmatprep.mubr.f32.mxu0 %v9346_v39  ;;  %v8212_v39 = vpack.c.bf16 %v3800_v18, %v3799_v14  ;;  %v4265_v62 = vld [vmem:[#allocation10 + $0xdb8] sm:$0xff]  ;;  %v8368_v6 = vpack.c.bf16 %v4267_v3, %v4266_v1  ;;  %v4709_v14 = vld [vmem:[#allocation10 + $0xf08] sm:$0xff]  ;;  %v4710_v18 = vld [vmem:[#allocation10 + $0xf10] sm:$0xff] }
 0xb38   : > { %8193 = vmatprep.subr.bf16.mxu0 %v8192_v7  ;;  %v8364_v63 = vpack.c.bf16 %v4265_v62, %v4264_v28  ;;  %v8460_v29 = vpack.c.bf16 %v4711_v5, %v4710_v18  ;;  %v4986_v28 = vld [vmem:[#allocation10 + $0x1050] sm:$0xff]  ;;  %v4987_v62 = vld [vmem:[#allocation10 + $0x1058] sm:$0xff]  ;;  %v4988_v1 = vld [vmem:[#allocation10 + $0x1060] sm:$0xff] }
 0xb39   : > { %v4989_v3 = vld [vmem:[#allocation10 + $0x1068] sm:$0xff]  ;;  %v4521_v18 = vld [vmem:[#allocation10 + $0xea0] sm:$0xff]  ;;  %v4523_v5 = vld [vmem:[#allocation10 + $0xeb0] sm:$0xff] }
 0xb3b   : > { %8195 = vmatpush3.bf16.msra.mxu0 %v8192_v7  ;;  %v4268_v7 = vld [vmem:[#allocation10 + $0xdd0] sm:$0xff] }
 0xb3c   : > { %8197 = vmatprep.subr.bf16.mxu0 %v8196_v10  ;;  %v8372_v9 = vpack.c.bf16 %v4269_v8, %v4268_v7  ;;  %v5280_v7 = vld [vmem:[#allocation12 + $0x5] ss:$0 sm:$0xff] }
 0xb3f   : > { %8199 = vmatpush3.bf16.msra.mxu0 %v8196_v10 }
 0xb40   : > { %8201 = vmatprep.subr.bf16.mxu0 %v8200_v55 }
 0xb43   : > { %8203 = vmatpush3.bf16.msra.mxu0 %v8200_v55  ;;  %v8380_v55 = vpack.c.bf16 %v4273_v11, %v4272_v21  ;;  %v4519_v21 = vld [vmem:[#allocation10 + $0xe90] sm:$0xff]  ;;  %v4520_v11 = vld [vmem:[#allocation10 + $0xe98] sm:$0xff] }
 0xb44   : > { %8205 = vmatprep.subr.bf16.mxu0 %v8204_v31 }
 0xb47   : > { %8207 = vmatpush3.bf16.msra.mxu0 %v8204_v31  ;;  %v9424_v31 = vpack.c.bf16 %v4518_v17, %v4517_v61 }
 0xb48   : > { %8209 = vmatprep.subr.bf16.mxu0 %v8208_v0 }
 0xb4b   : > { %8211 = vmatpush3.bf16.msra.mxu0 %v8208_v0  ;;  %v4708_v0 = vld [vmem:[#allocation10 + $0xf00] sm:$0xff] }
 0xb4c   : > { %8213 = vmatprep.subr.bf16.mxu0 %v8212_v39  ;;  %v8456_v35 = vpack.c.bf16 %v4709_v14, %v4708_v0  ;;  %v8392_v14 = vpack.c.bf16 %v4520_v11, %v4519_v21 }
 0xb4e   : > { %8457 = vmatprep.subr.bf16.mxu1 %v8456_v35 }
 0xb4f   : > { %8215 = vmatpush3.bf16.msra.mxu0 %v8212_v39  ;;  %v7227_v39 = vpop.f32.mrb[16].mxu1  ;;  %8459 = vmatpush3.bf16.msra.mxu1 %v8456_v35 }
 0xb50   : > { %8217 = vmatprep.subr.bf16.mxu0 %v8216_v27  ;;  %8461 = vmatprep.subr.bf16.mxu1 %v8460_v29 }
 0xb53   : > { %8219 = vmatpush3.bf16.msra.mxu0 %v8216_v27  ;;  %v4698_v27 = vpop.f32.mrb[17].mxu1  ;;  %8463 = vmatpush3.bf16.msra.mxu1 %v8460_v29 }
 0xb54   : > { %8317 = vmatprep.subr.bf16.mxu0 %v9370_v47  ;;  %7295 = vmatprep.mubr.f32.mxu1 %v4698_v27  ;;  %v4524_v27 = vld [vmem:[#allocation10 + $0xeb8] sm:$0xff] }
 0xb55   : > { %v8400_v29 = vpack.c.bf16 %v4524_v27, %v4523_v5 }
 0xb56   : > { %6995 = vmatmul.mubr.f32.vlgmr.msra.gmra.mrb[22].mxu0 %v9344_v37  ;;  %v4282_v37 = vld [vmem:[#allocation10 + $0xe38] sm:$0xff] }
 0xb57   : > { %8319 = vmatpush3.bf16.msra.mxu0 %v9370_v47  ;;  %7106 = vmatprep.mubr.msk.f32.mxu0 %vm660_vm0, %v9349_v34  ;;  %v8332_v47 = vpack.c.bf16 %v4282_v37, %v4281_v36  ;;  %v4284_v34 = vld [vmem:[#allocation10 + $0xe48] sm:$0xff]  ;;  %v4718_v36 = vld [vmem:[#allocation10 + $0xf50] sm:$0xff]  ;;  %v4719_v37 = vld [vmem:[#allocation10 + $0xf58] sm:$0xff] }
 0xb58   : > { %8321 = vmatprep.subr.bf16.mxu0 %v8320_v41  ;;  %v8336_v42 = vpack.c.bf16 %v4284_v34, %v4283_v40  ;;  %v4720_v40 = vld [vmem:[#allocation10 + $0xf60] sm:$0xff]  ;;  %v4721_v34 = vld [vmem:[#allocation10 + $0xf68] sm:$0xff] }
 0xb5a   : > { %7107 = vmatmul.mubr.msk.f32.vlgmr.msra.gmra.mrb[28].mxu0 %vm660_vm0, %v8667_v33  ;;  %v4717_v33 = vld [vmem:[#allocation10 + $0xf48] sm:$0xff] }
 0xb5b   : > { %8323 = vmatpush3.bf16.msra.mxu0 %v8320_v41  ;;  %7141 = vmatprep.mubr.f32.mxu0 %v4180_v30  ;;  %v8344_v30 = vpack.c.bf16 %v4288_v46, %v4287_v38  ;;  %v4713_v41 = vld [vmem:[#allocation10 + $0xf28] sm:$0xff]  ;;  %v4976_v38 = vld [vmem:[#allocation10 + $0x1000] sm:$0xff] }
 0xb5c   : > { %8325 = vmatprep.subr.bf16.mxu0 %v8324_v52  ;;  %v8464_v20 = vpack.c.bf16 %v4713_v41, %v4712_v43  ;;  %v4977_v46 = vld [vmem:[#allocation10 + $0x1008] sm:$0xff]  ;;  %v4525_v43 = vld [vmem:[#allocation10 + $0xec0] sm:$0xff] }
 0xb5d   : > { %v4526_v41 = vld [vmem:[#allocation10 + $0xec8] sm:$0xff] }
 0xb5e   : > { %8465 = vmatprep.subr.bf16.mxu1 %v8464_v20 }
 0xb5f   : > { %8327 = vmatpush3.bf16.msra.mxu0 %v8324_v52  ;;  %v4715_v52 = vld [vmem:[#allocation10 + $0xf38] sm:$0xff]  ;;  %8467 = vmatpush3.bf16.msra.mxu1 %v8464_v20  ;;  %v8404_v20 = vpack.c.bf16 %v4526_v41, %v4525_v43 }
 0xb60   : > { %8329 = vmatprep.subr.bf16.mxu0 %v8328_v32  ;;  %v8468_v56 = vpack.c.bf16 %v4715_v52, %v4714_v60  ;;  %v4527_v60 = vld [vmem:[#allocation10 + $0xed0] sm:$0xff]  ;;  %v4528_v52 = vld [vmem:[#allocation10 + $0xed8] sm:$0xff] }
 0xb62   : > { %8469 = vmatprep.subr.bf16.mxu1 %v8468_v56 }
 0xb63   : > { %8331 = vmatpush3.bf16.msra.mxu0 %v8328_v32  ;;  %v8472_v32 = vpack.c.bf16 %v4717_v33, %v4716_v48  ;;  %8471 = vmatpush3.bf16.msra.mxu1 %v8468_v56  ;;  %v8408_v56 = vpack.c.bf16 %v4528_v52, %v4527_v60  ;;  %v4530_v48 = vld [vmem:[#allocation10 + $0xee8] sm:$0xff]  ;;  %v4531_v33 = vld [vmem:[#allocation10 + $0xef0] sm:$0xff] }
 0xb64   : > { %8333 = vmatprep.subr.bf16.mxu0 %v8332_v47 }
 0xb65   : > { %8473 = vmatprep.subr.bf16.mxu1 %v8472_v32 }
 0xb67   : > { %8335 = vmatpush3.bf16.msra.mxu0 %v8332_v47  ;;  %v8476_v47 = vpack.c.bf16 %v4719_v37, %v4718_v36  ;;  %8475 = vmatpush3.bf16.msra.mxu1 %v8472_v32  ;;  %v4532_v32 = vld [vmem:[#allocation10 + $0xef8] sm:$0xff]  ;;  %v4892_v37 = vld [vmem:[#allocation2 + $0x30] sm:$0xff] }
 0xb68   : > { %8337 = vmatprep.subr.bf16.mxu0 %v8336_v42  ;;  %v8416_v36 = vpack.c.bf16 %v4532_v32, %v4531_v33 }
 0xb69   : > { %8477 = vmatprep.subr.bf16.mxu1 %v8476_v47 }
 0xb6b   : > { %8339 = vmatpush3.bf16.msra.mxu0 %v8336_v42  ;;  %v8480_v42 = vpack.c.bf16 %v4721_v34, %v4720_v40  ;;  %8479 = vmatpush3.bf16.msra.mxu1 %v8476_v47  ;;  %v4893_v47 = vld [vmem:[#allocation2 + $0x38] sm:$0xff] }
 0xb6c   : > { %8341 = vmatprep.subr.bf16.mxu0 %v8340_v16  ;;  %v4990_v40 = vld [vmem:[#allocation10 + $0x1070] sm:$0xff]  ;;  %v4991_v34 = vld [vmem:[#allocation10 + $0x1078] sm:$0xff] }
 0xb6d   : > { %8481 = vmatprep.subr.bf16.mxu1 %v8480_v42 }
 0xb6f   : > { %8343 = vmatpush3.bf16.msra.mxu0 %v8340_v16  ;;  %v8484_v16 = vpack.c.bf16 %v4723_v49, %v4722_v45  ;;  %8483 = vmatpush3.bf16.msra.mxu1 %v8480_v42  ;;  %v8520_v42 = vpack.c.bf16 %v4991_v34, %v4990_v40  ;;  %v5292_v45 = vld [vmem:[#allocation12 + $0x9] ss:$0 sm:$0xff] }
 0xb70   : > { %8345 = vmatprep.subr.bf16.mxu0 %v8344_v30 }
 0xb71   : > { %8485 = vmatprep.subr.bf16.mxu1 %v8484_v16 }
 0xb73   : > { %8347 = vmatpush3.bf16.msra.mxu0 %v8344_v30  ;;  %v8492_v30 = vpack.c.bf16 %v4977_v46, %v4976_v38  ;;  %8487 = vmatpush3.bf16.msra.mxu1 %v8484_v16 }
 0xb74   : > { %8349 = vmatprep.subr.bf16.mxu0 %v8348_v59 }
 0xb75   : > { %8493 = vmatprep.subr.bf16.mxu1 %v8492_v30 }
 0xb76   : > { %7296 = vmatmul.mubr.f32.vlgmr.msra.gmra.mrb[18].mxu1 %v7227_v39  ;;  %v4522_v39 = vld [vmem:[#allocation10 + $0xea8] sm:$0xff] }
 0xb77   : > { %8351 = vmatpush3.bf16.msra.mxu0 %v8348_v59  ;;  %v8496_v59 = vpack.c.bf16 %v4979_v51, %v4978_v50  ;;  %8495 = vmatpush3.bf16.msra.mxu1 %v8492_v30  ;;  %v8396_v35 = vpack.c.bf16 %v4522_v39, %v4521_v18  ;;  %v5297_v51 = vld [vmem:[#allocation12 + $0xa] ss:$0 sm:$0xff] }
 0xb78   : > { %8353 = vmatprep.subr.bf16.mxu0 %v8352_v19 }
 0xb79   : > { %8497 = vmatprep.subr.bf16.mxu1 %v8496_v59 }
 0xb7a   : > { %7142 = vmatmul.mubr.f32.vlgmr.msra.gmra.mrb[30].mxu0 %v4181_v44  ;;  %v4271_v44 = vld [vmem:[#allocation10 + $0xde8] sm:$0xff] }
 0xb7b   : > { %8355 = vmatpush3.bf16.msra.mxu0 %v8352_v19  ;;  %v8376_v10 = vpack.c.bf16 %v4271_v44, %v4270_v23  ;;  %v8500_v19 = vpack.c.bf16 %v4981_v2, %v4980_v25  ;;  %8499 = vmatpush3.bf16.msra.mxu1 %v8496_v59 }
 0xb7c   : > { %8357 = vmatprep.subr.bf16.mxu0 %v8356_v58 }
 0xb7d   : > { %8501 = vmatprep.subr.bf16.mxu1 %v8500_v19 }
 0xb7f   : > { %8359 = vmatpush3.bf16.msra.mxu0 %v8356_v58  ;;  %v8504_v58 = vpack.c.bf16 %v4983_v54, %v4982_v26  ;;  %8503 = vmatpush3.bf16.msra.mxu1 %v8500_v19 }
 0xb80   : > { %8361 = vmatprep.subr.bf16.mxu0 %v8360_v57 }
 0xb81   : > { %8505 = vmatprep.subr.bf16.mxu1 %v8504_v58 }
 0xb83   : > { %8363 = vmatpush3.bf16.msra.mxu0 %v8360_v57  ;;  %v8508_v57 = vpack.c.bf16 %v4985_v53, %v4984_v15  ;;  %8507 = vmatpush3.bf16.msra.mxu1 %v8504_v58 }
 0xb84   : > { %8365 = vmatprep.subr.bf16.mxu0 %v8364_v63 }
 0xb85   : > { %8509 = vmatprep.subr.bf16.mxu1 %v8508_v57 }
 0xb87   : > { %8367 = vmatpush3.bf16.msra.mxu0 %v8364_v63  ;;  %v8512_v63 = vpack.c.bf16 %v4987_v62, %v4986_v28  ;;  %8511 = vmatpush3.bf16.msra.mxu1 %v8508_v57 }
 0xb88   : > { %8369 = vmatprep.subr.bf16.mxu0 %v8368_v6 }
 0xb89   : > { %8513 = vmatprep.subr.bf16.mxu1 %v8512_v63 }
 0xb8b   : > { %8371 = vmatpush3.bf16.msra.mxu0 %v8368_v6  ;;  %v8516_v6 = vpack.c.bf16 %v4989_v3, %v4988_v1  ;;  %8515 = vmatpush3.bf16.msra.mxu1 %v8512_v63 }
 0xb8c   : > { %8373 = vmatprep.subr.bf16.mxu0 %v8372_v9 }
 0xb8d   : > { %8517 = vmatprep.subr.bf16.mxu1 %v8516_v6 }
 0xb8f   : > { %8375 = vmatpush3.bf16.msra.mxu0 %v8372_v9  ;;  %8519 = vmatpush3.bf16.msra.mxu1 %v8516_v6  ;;  %v5286_v9 = vld [vmem:[#allocation12 + $0x7] ss:$0 sm:$0xff] }
 0xb90   : > { %8377 = vmatprep.subr.bf16.mxu0 %v8376_v10  ;;  %8521 = vmatprep.subr.bf16.mxu1 %v8520_v42 }
 0xb93   : > { %8379 = vmatpush3.bf16.msra.mxu0 %v8376_v10  ;;  %8523 = vmatpush3.bf16.msra.mxu1 %v8520_v42 }
 0xb94   : > { %8381 = vmatprep.subr.bf16.mxu0 %v8380_v55 }
 0xb97   : > { %8383 = vmatpush3.bf16.msra.mxu0 %v8380_v55 }
 0xb98   : > { %8389 = vmatprep.subr.bf16.mxu0 %v9424_v31 }
 0xc29   : > { %v6996_v8 = vpop.f32.mrb[22].mxu0 }
 0xc2a   : > { %v8528_v23 = vadd.f32 %v6996_v8, %v5280_v7  ;;  %v3869_v44 = vpop.f32.mrb[23].mxu0 }
 0xc2b   : > { %v8530_v10 = vadd.f32 %v5280_v7, %v3869_v44 }
 0xc2c   : > { %v8529_v55 = vadd.f32 %v8528_v23, %v5286_v9 }
 0xc2d   : > { %v8531_v61 = vadd.f32 %v8530_v10, %v5286_v9  ;;  %v7108_v17 = vpop.f32.mrb[28].mxu0 }
 0xc2e   : > { %5299 = vst [vmem:[%s9381_s13 + $0x18] sm:$0xff] %v8529_v55  ;;  %v4248_v0 = vpop.f32.mrb[29].mxu0 }
 0xc2f   : > { %5298 = vst [vmem:[%s9381_s13 + $0x10] sm:$0xff] %v8531_v61  ;;  %7176 = vmatprep.mubr.f32.mxu0 %v4248_v0 }
 0xc30   : > { %7177 = vmatmul.mubr.f32.vlgmr.msra.gmra.mrb[30].mxu0 %v7108_v17 }
 0xc31   : > { %8391 = vmatpush3.bf16.msra.mxu0 %v9424_v31  ;;  %7218 = vmatprep.mubr.f32.mxu0 %v9429_v12  ;;  %v4529_v31 = vld [vmem:[#allocation10 + $0xee0] sm:$0xff] }
 0xc32   : > { %8393 = vmatprep.subr.bf16.mxu0 %v8392_v14  ;;  %v8412_v12 = vpack.c.bf16 %v4530_v48, %v4529_v31 }
 0xc35   : > { %8395 = vmatpush3.bf16.msra.mxu0 %v8392_v14 }
 0xc36   : > { %8397 = vmatprep.subr.bf16.mxu0 %v8396_v35 }
 0xc39   : > { %8399 = vmatpush3.bf16.msra.mxu0 %v8396_v35 }
 0xc3a   : > { %8401 = vmatprep.subr.bf16.mxu0 %v8400_v29 }
 0xc3d   : > { %8403 = vmatpush3.bf16.msra.mxu0 %v8400_v29 }
 0xc3e   : > { %8405 = vmatprep.subr.bf16.mxu0 %v8404_v20 }
 0xc41   : > { %8407 = vmatpush3.bf16.msra.mxu0 %v8404_v20 }
 0xc42   : > { %8409 = vmatprep.subr.bf16.mxu0 %v8408_v56 }
 0xc45   : > { %8411 = vmatpush3.bf16.msra.mxu0 %v8408_v56 }
 0xc46   : > { %8413 = vmatprep.subr.bf16.mxu0 %v8412_v12 }
 0xc49   : > { %8415 = vmatpush3.bf16.msra.mxu0 %v8412_v12 }
 0xc4a   : > { %8417 = vmatprep.subr.bf16.mxu0 %v8416_v36 }
 0xc4d   : > { %8419 = vmatpush3.bf16.msra.mxu0 %v8416_v36 }
 0xc4e   : > { %8489 = vmatprep.subr.bf16.mxu0 %v9391_v4 }
 0xc50   : > { %7219 = vmatmul.mubr.f32.vlgmr.msra.gmra.mrb[30].mxu0 %v9427_v13 }
 0xc51   : > { %8491 = vmatpush3.bf16.msra.mxu0 %v9391_v4  ;;  %7302 = vmatprep.mubr.msk.f32.mxu0 %vm660_vm0, %v4892_v37 }
 0xc54   : > { %7303 = vmatmul.mubr.msk.f32.vlgmr.msra.gmra.mrb[32].mxu0 %vm660_vm0, %v4893_v47 }
 0xd23   : > { %v7220_v49 = vpop.f32.mrb[30].mxu0 }
 0xd24   : > { %v4619_v16 = vadd.f32 %v7220_v49, %v5292_v45  ;;  %v4599_v38 = vpop.f32.mrb[31].mxu0 }
 0xd25   : > { %v4618_v46 = vadd.f32 %v5292_v45, %v4599_v38 }
 0xd26   : > { %v4621_v4 = vadd.f32 %v4619_v16, %v9181_v22 }
 0xd27   : > { %v4620_v13 = vadd.f32 %v4618_v46, %v9183_v24  ;;  %v7304_v30 = vpop.f32.mrb[32].mxu0 }
 0xd28   : > { %5301 = vst [vmem:[%s9381_s13 + $0x28] sm:$0xff] %v4621_v4  ;;  %v4966_v50 = vpop.f32.mrb[33].mxu0 }
 0xd29   : > { %5300 = vst [vmem:[%s9381_s13 + $0x20] sm:$0xff] %v4620_v13  ;;  %7337 = vmatprep.mubr.f32.mxu1 %v4966_v50 }
 0xd2a   : > { %7338 = vmatmul.mubr.f32.vlgmr.msra.gmra.mrb[18].mxu1 %v7304_v30 }
 0xdfd   : > { %v7339_v59 = vpop.f32.mrb[18].mxu1 }
 0xdfe   : > { %v5078_v25 = vadd.f32 %v7339_v59, %v5297_v51  ;;  %v5058_v2 = vpop.f32.mrb[19].mxu1 }
 0xdff   : > { %v5077_v19 = vadd.f32 %v5297_v51, %v5058_v2 }
 0xe00   : > { %v5080_v26 = vadd.f32 %v5078_v25, %v9181_v22 }
 0xe01   : > { %v5079_v54 = vadd.f32 %v5077_v19, %v9183_v24 }
 0xe02   : > { %5303 = vst [vmem:[%s9381_s13 + $0x38] sm:$0xff] %v5080_v26 }
 0xe03   : > { %5302 = vst [vmem:[%s9381_s13 + $0x30] sm:$0xff] %v5079_v54 }
 0xe04 PF: > { %s23_s30 = sadd.s32 1, %s8886_s30  }
 0xe05   : > { %p20_p9 = scmp.ge.s32.totalorder %s23_s30, 4  }
 0xe07   :  { %22 = sbr.rel (!%p20_p9) target bundleno = 4 (0x4), region = 166 }
 0xe0e   :  { %5113 = vsyncpa [#allocation3], 1 }
 0xe0f   :  { %5115 = vsyncpa [#allocation3 + $0x1], 1 }
 0xe10   :  { %5116 = vsyncpa [#allocation5], 1 }
 0xe11   :  { %5117 = vsyncpa [#allocation8], 1 }
 0xe12   :  { %5118 = vsyncpa [#allocation11], 1 }

</bundles_post_ra>
